<compile_context>
chip_gen: v6e
topology: v6e:2x2x1
jax: 0.10.0
libtpu: 0.0.40
codegen_flags: <defaults>
</compile_context>

<pallas_src>
import functools
import math

import jax
import jax.numpy as jnp
from jax.experimental import pallas as pl
from jax.experimental.pallas import tpu as pltpu

# ----------------------------- configuration --------------------------------
OUT_DIM = 16        # motion feature dim (stand-in for 263)
EMBED_DIM = 64      # hidden size
C_IN_DIM = 32       # latent condition dim (stand-in for 512)
C_PROJ_DIM = 32     # projected condition dim
NUM_HEADS = 4
MLP_RATIO = 4
DEPTH = 2
FREQ_DIM = 256      # frequency_embedding_size of TimestepEmbedder
LATENT_UP = 4       # repeat_interleave factor == StackLinear latent_frame_size (quant_factor=2)

B = 2
T_LAT = 4
T = T_LAT * LATENT_UP       # sequence length seen by the transformer

MLP_HIDDEN = EMBED_DIM * MLP_RATIO
MXU_DTYPE = jnp.bfloat16    # matmul operand dtype (accumulation is f32)
LN_EPS = 1e-6               # DiT LayerNorm(eps=1e-6, elementwise_affine=False)


# ----------------------------- in-kernel helpers ------------------------------
def _mm(a, w):
    """MXU matmul: cast activation to the weight dtype (bf16), accumulate f32."""
    return jnp.dot(a.astype(w.dtype), w, preferred_element_type=jnp.float32)


def _layernorm(v, eps=LN_EPS):
    mu = jnp.mean(v, axis=-1, keepdims=True)
    var = jnp.mean((v - mu) ** 2, axis=-1, keepdims=True)
    return (v - mu) * jax.lax.rsqrt(var + eps)


def _silu(v):
    return v * (1.0 / (1.0 + jnp.exp(-v)))


def _gelu_tanh(v):
    c0 = 0.7978845608028654  # sqrt(2/pi)
    return 0.5 * v * (1.0 + jnp.tanh(c0 * (v + 0.044715 * v * v * v)))


# ----------------------------- fused kernel -----------------------------------
def _fused_forward_kernel(
    x_ref, yun_ref, tfreq_ref,
    t_w1_ref, t_b1_ref, t_w2_ref, t_b2_ref,
    in_wx_ref, in_wy_ref, in_b_ref,
    w_ada_ref, b_ada_ref, wqkv_ref, bqkv_ref, wo_ref, bo_ref,
    w1_ref, b1_ref, w2_ref, b2_ref,
    f_wada_ref, f_bada_ref, f_w_ref, f_b_ref,
    o_ref, *, depth, num_heads):
    """Entire DiT1DforFlowDecoder forward for one batch element (grid=(B,))."""
    x = x_ref[0]          # (T, OUT_DIM)  f32
    yun = yun_ref[0]      # (T, Cin)      f32   (already un-stacked condition)
    tfreq = tfreq_ref[0]  # (1, FREQ_DIM) f32

    # --- TimestepEmbedder MLP: Linear -> SiLU -> Linear ---
    th = _silu(_mm(tfreq, t_w1_ref[...]) + t_b1_ref[...])
    c = _mm(th, t_w2_ref[...]) + t_b2_ref[...]          # (1, D) f32
    c_act = _silu(c)                                    # shared by every adaLN layer

    # --- in_proj fused with the condition projection:
    #     h = x @ W_x + y_un @ (c_w2 @ W_y) + (in_b + c_b2 @ W_y)
    h = _mm(x, in_wx_ref[...]) + _mm(yun, in_wy_ref[...]) + in_b_ref[...]   # (T, D) f32

    D = h.shape[-1]
    dh = D // num_heads
    inv_sqrt_dh = 1.0 / math.sqrt(dh)

    for l in range(depth):                              # small depth -> unrolled
        ada = _mm(c_act, w_ada_ref[l]) + b_ada_ref[l]   # (1, 6D)
        shift_msa = ada[:, 0 * D:1 * D]
        scale_msa = ada[:, 1 * D:2 * D]
        gate_msa = ada[:, 2 * D:3 * D]
        shift_mlp = ada[:, 3 * D:4 * D]
        scale_mlp = ada[:, 4 * D:5 * D]
        gate_mlp = ada[:, 5 * D:6 * D]

        # ---- attention branch (adaLN modulate -> MHA -> gate) ----
        xm = _layernorm(h) * (1.0 + scale_msa) + shift_msa
        qkv = _mm(xm, wqkv_ref[l]) + bqkv_ref[l]        # (T, 3D) f32
        q = qkv[:, 0:D]
        k = qkv[:, D:2 * D]
        v = qkv[:, 2 * D:3 * D]

        heads = []
        for hh in range(num_heads):                     # static head loop (lane slices)
            sl = slice(hh * dh, (hh + 1) * dh)
            s = jax.lax.dot_general(
                q[:, sl].astype(MXU_DTYPE), k[:, sl].astype(MXU_DTYPE),
                (((1,), (1,)), ((), ())),
                preferred_element_type=jnp.float32)     # (T, T)
            s = s * inv_sqrt_dh
            s = s - jnp.max(s, axis=-1, keepdims=True)
            p = jnp.exp(s)
            p = p * pl.reciprocal(jnp.sum(p, axis=-1, keepdims=True), approx=True)
            heads.append(jnp.dot(p.astype(MXU_DTYPE), v[:, sl].astype(MXU_DTYPE),
                                 preferred_element_type=jnp.float32))
        attn = jnp.concatenate(heads, axis=-1)          # (T, D)
        attn = _mm(attn, wo_ref[l]) + bo_ref[l]         # single merged out-projection
        h = h + gate_msa * attn

        # ---- MLP branch ----
        xm2 = _layernorm(h) * (1.0 + scale_mlp) + shift_mlp
        m = _gelu_tanh(_mm(xm2, w1_ref[l]) + b1_ref[l])
        h = h + gate_mlp * (_mm(m, w2_ref[l]) + b2_ref[l])

    # ---- FinalLayer1D ----
    ada_f = _mm(c_act, f_wada_ref[...]) + f_bada_ref[...]   # (1, 2D): shift | scale
    xm = _layernorm(h) * (1.0 + ada_f[:, D:]) + ada_f[:, :D]
    o_ref[0] = (_mm(xm, f_w_ref[...]) + f_b_ref[...]).astype(o_ref.dtype)


# ----------------------------- parameters ------------------------------------
def init_params(key):
    keys = list(jax.random.split(key, 256))
    kit = iter(keys)

    def rnd(shape, scale=0.05):
        return scale * jax.random.normal(next(kit), shape, jnp.float32)

    params = {
        # TimestepEmbedder: Linear(256,D) -> SiLU -> Linear(D,D)
        "t_w1": rnd((FREQ_DIM, EMBED_DIM)), "t_b1": rnd((EMBED_DIM,)),
        "t_w2": rnd((EMBED_DIM, EMBED_DIM)), "t_b2": rnd((EMBED_DIM,)),
        # cin_proj: Stack -> Linear(4*Cin,4*Cin) -> Unstack -> Linear(Cin,Cproj)
        "c_w1": rnd((C_IN_DIM * 4, C_IN_DIM * 4)), "c_b1": rnd((C_IN_DIM * 4,)),
        "c_w2": rnd((C_IN_DIM, C_PROJ_DIM)), "c_b2": rnd((C_PROJ_DIM,)),
        # in_proj: Linear(out_dim + c_proj, D)
        "in_w": rnd((OUT_DIM + C_PROJ_DIM, EMBED_DIM)), "in_b": rnd((EMBED_DIM,)),
        "blocks": [],
        "final": {
            "w_ada": rnd((EMBED_DIM, 2 * EMBED_DIM)), "b_ada": rnd((2 * EMBED_DIM,)),
            "w": rnd((EMBED_DIM, OUT_DIM)), "b": rnd((OUT_DIM,)),
        },
    }
    for _ in range(DEPTH):
        params["blocks"].append({
            "w_ada": rnd((EMBED_DIM, 6 * EMBED_DIM)), "b_ada": rnd((6 * EMBED_DIM,)),
            "wq": rnd((EMBED_DIM, EMBED_DIM)), "bq": rnd((EMBED_DIM,)),
            "wk": rnd((EMBED_DIM, EMBED_DIM)), "bk": rnd((EMBED_DIM,)),
            "wv": rnd((EMBED_DIM, EMBED_DIM)), "bv": rnd((EMBED_DIM,)),
            "wo": rnd((EMBED_DIM, EMBED_DIM)), "bo": rnd((EMBED_DIM,)),
            "w1": rnd((EMBED_DIM, MLP_HIDDEN)), "b1": rnd((MLP_HIDDEN,)),
            "w2": rnd((MLP_HIDDEN, EMBED_DIM)), "b2": rnd((EMBED_DIM,)),
        })
    return params


def prepare_params(params):
    """One-time weight folding / stacking / bf16 cast (host-side, outside the kernel)."""
    cd = MXU_DTYPE
    Cin = C_IN_DIM

    # Repeat_and_stack fold: each stacked group is 4 identical copies of y_t, so
    #   concat(y_t,y_t,y_t,y_t) @ c_w1 == y_t @ (sum of the 4 row blocks of c_w1).
    w_eff = params["c_w1"].reshape(LATENT_UP, Cin, LATENT_UP * Cin).sum(axis=0)  # (Cin, 4Cin)

    # Fold cin_proj's second Linear into in_proj's condition columns.
    in_wx = params["in_w"][:OUT_DIM]                  # (OUT_DIM, D)
    in_wy_raw = params["in_w"][OUT_DIM:]              # (Cproj, D)
    in_wy = params["c_w2"] @ in_wy_raw                # (Cin, D)
    in_b = params["in_b"] + params["c_b2"] @ in_wy_raw

    blocks = params["blocks"]
    stack = lambda name: jnp.stack([blk[name] for blk in blocks])
    fin = params["final"]
    return {
        "w_eff": w_eff, "c_b1": params["c_b1"],
        "t_w1": params["t_w1"].astype(cd), "t_b1": params["t_b1"][None],
        "t_w2": params["t_w2"].astype(cd), "t_b2": params["t_b2"][None],
        "in_wx": in_wx.astype(cd), "in_wy": in_wy.astype(cd), "in_b": in_b[None],
        "w_ada": stack("w_ada").astype(cd), "b_ada": stack("b_ada")[:, None, :],
        "wqkv": jnp.stack([jnp.concatenate([b_["wq"], b_["wk"], b_["wv"]], axis=1)
                           for b_ in blocks]).astype(cd),
        "bqkv": jnp.stack([jnp.concatenate([b_["bq"], b_["bk"], b_["bv"]])
                           for b_ in blocks])[:, None, :],
        "wo": stack("wo").astype(cd), "bo": stack("bo")[:, None, :],
        "w1": stack("w1").astype(cd), "b1": stack("b1")[:, None, :],
        "w2": stack("w2").astype(cd), "b2": stack("b2")[:, None, :],
        "f_wada": fin["w_ada"].astype(cd), "f_bada": fin["b_ada"][None],
        "f_w": fin["w"].astype(cd), "f_b": fin["b"][None],
    }


# ----------------------------- forward ----------------------------------------
@jax.jit
def dit1d_flow_decoder_forward(prep, x, times, y):
    """x: (B, T, OUT_DIM), times: (B,), y: (B, T_LAT, C_IN_DIM) -> (B, T, OUT_DIM)."""
    Bn, Tn, _ = x.shape
    f32 = jnp.float32

    # TimestepEmbedder.timestep_embedding (tiny elementwise glue, fused by XLA).
    half = FREQ_DIM // 2
    freqs = jnp.exp(-math.log(10000.0) * jnp.arange(half, dtype=f32) / half)
    args = times.astype(f32)[:, None] * freqs[None, :]
    t_freq = jnp.concatenate([jnp.cos(args), jnp.sin(args)], axis=-1)[:, None, :]  # (B,1,256)

    # Folded condition path: (B,T_lat,Cin) @ (Cin,4Cin) + b1, then unstack -> (B,T,Cin).
    # (No T-length repeat materialized; exactly equivalent to Repeat+Stack+Linear+Unstack.)
    y_un = (jnp.einsum("btc,cf->btf", y, prep["w_eff"]) + prep["c_b1"]).reshape(
        Bn, Tn, C_IN_DIM)

    def full(shape):
        return pl.BlockSpec(shape, lambda b: (0,) * len(shape))

    def per_batch(shape):
        return pl.BlockSpec(shape, lambda b: (b,) + (0,) * (len(shape) - 1))

    kern = functools.partial(_fused_forward_kernel, depth=DEPTH, num_heads=NUM_HEADS)

    return pl.pallas_call(
        kern,
        out_shape=jax.ShapeDtypeStruct((Bn, Tn, OUT_DIM), jnp.float32),
        grid=(Bn,),
        in_specs=[
            per_batch((1, Tn, OUT_DIM)),                    # x
            per_batch((1, Tn, C_IN_DIM)),                   # y_un
            per_batch((1, 1, FREQ_DIM)),                    # t_freq
            full((FREQ_DIM, EMBED_DIM)), full((1, EMBED_DIM)),        # t MLP 1
            full((EMBED_DIM, EMBED_DIM)), full((1, EMBED_DIM)),       # t MLP 2
            full((OUT_DIM, EMBED_DIM)),                     # in_wx
            full((C_IN_DIM, EMBED_DIM)),                    # in_wy (folded)
            full((1, EMBED_DIM)),                           # in_b (folded)
            full((DEPTH, EMBED_DIM, 6 * EMBED_DIM)), full((DEPTH, 1, 6 * EMBED_DIM)),
            full((DEPTH, EMBED_DIM, 3 * EMBED_DIM)), full((DEPTH, 1, 3 * EMBED_DIM)),
            full((DEPTH, EMBED_DIM, EMBED_DIM)), full((DEPTH, 1, EMBED_DIM)),
            full((DEPTH, EMBED_DIM, MLP_HIDDEN)), full((DEPTH, 1, MLP_HIDDEN)),
            full((DEPTH, MLP_HIDDEN, EMBED_DIM)), full((DEPTH, 1, EMBED_DIM)),
            full((EMBED_DIM, 2 * EMBED_DIM)), full((1, 2 * EMBED_DIM)),
            full((EMBED_DIM, OUT_DIM)), full((1, OUT_DIM)),
        ],
        out_specs=per_batch((1, Tn, OUT_DIM)),
        compiler_params=pltpu.CompilerParams(
            dimension_semantics=("parallel",)),             # batch -> both TCs on v7x
    )(
        x, y_un, t_freq,
        prep["t_w1"], prep["t_b1"], prep["t_w2"], prep["t_b2"],
        prep["in_wx"], prep["in_wy"], prep["in_b"],
        prep["w_ada"], prep["b_ada"], prep["wqkv"], prep["bqkv"],
        prep["wo"], prep["bo"], prep["w1"], prep["b1"], prep["w2"], prep["b2"],
        prep["f_wada"], prep["f_bada"], prep["f_w"], prep["f_b"],
    )


# ----------------------------- main -------------------------------------------
if __name__ == "__main__":
    key = jax.random.PRNGKey(0)
    k_p, k_x, k_t, k_y = jax.random.split(key, 4)

    params = init_params(k_p)
    prep = prepare_params(params)

    x = jax.random.normal(k_x, (B, T, OUT_DIM), jnp.float32)
    times = jax.random.uniform(k_t, (B,), jnp.float32)
    y = jax.random.normal(k_y, (B, T_LAT, C_IN_DIM), jnp.float32)

    out = dit1d_flow_decoder_forward(prep, x, times, y)
    out = jax.block_until_ready(out)
    assert out.shape == (B, T, OUT_DIM), out.shape
    assert bool(jnp.all(jnp.isfinite(out)))
    print("KERNEL_OK")
</pallas_src>

<mosaic_0001>
module attributes {stable_mosaic.version = 11 : i64} {
  func.func @_fused_forward_kernel(%arg0: i32, %arg1: memref<1x16x16xf32, #tpu.memory_space<vmem>>, %arg2: memref<1x16x32xf32, #tpu.memory_space<vmem>>, %arg3: memref<1x1x256xf32, #tpu.memory_space<vmem>>, %arg4: memref<256x64xbf16, #tpu.memory_space<vmem>>, %arg5: memref<1x64xf32, #tpu.memory_space<vmem>>, %arg6: memref<64x64xbf16, #tpu.memory_space<vmem>>, %arg7: memref<1x64xf32, #tpu.memory_space<vmem>>, %arg8: memref<16x64xbf16, #tpu.memory_space<vmem>>, %arg9: memref<32x64xbf16, #tpu.memory_space<vmem>>, %arg10: memref<1x64xf32, #tpu.memory_space<vmem>>, %arg11: memref<2x64x384xbf16, #tpu.memory_space<vmem>>, %arg12: memref<2x1x384xf32, #tpu.memory_space<vmem>>, %arg13: memref<2x64x192xbf16, #tpu.memory_space<vmem>>, %arg14: memref<2x1x192xf32, #tpu.memory_space<vmem>>, %arg15: memref<2x64x64xbf16, #tpu.memory_space<vmem>>, %arg16: memref<2x1x64xf32, #tpu.memory_space<vmem>>, %arg17: memref<2x64x256xbf16, #tpu.memory_space<vmem>>, %arg18: memref<2x1x256xf32, #tpu.memory_space<vmem>>, %arg19: memref<2x256x64xbf16, #tpu.memory_space<vmem>>, %arg20: memref<2x1x64xf32, #tpu.memory_space<vmem>>, %arg21: memref<64x128xbf16, #tpu.memory_space<vmem>>, %arg22: memref<1x128xf32, #tpu.memory_space<vmem>>, %arg23: memref<64x16xbf16, #tpu.memory_space<vmem>>, %arg24: memref<1x16xf32, #tpu.memory_space<vmem>>, %arg25: memref<1x16x16xf32, #tpu.memory_space<vmem>>) attributes {dimension_semantics = [#tpu.dimension_semantics<parallel>], iteration_bounds = array<i64: 2>, scalar_prefetch = 0 : i64, scratch_operands = 0 : i64, tpu.core_type = #tpu.core_type<tc>, window_params = [{transform_indices = @transform_0, window_bounds = array<i64: 1, 16, 16>}, {transform_indices = @transform_1, window_bounds = array<i64: 1, 16, 32>}, {transform_indices = @transform_2, window_bounds = array<i64: 1, 1, 256>}, {pipeline_mode = #tpu.pipeline_mode<synchronous>, transform_indices = @transform_3, window_bounds = array<i64: 256, 64>}, {pipeline_mode = #tpu.pipeline_mode<synchronous>, transform_indices = @transform_4, window_bounds = array<i64: 1, 64>}, {pipeline_mode = #tpu.pipeline_mode<synchronous>, transform_indices = @transform_5, window_bounds = array<i64: 64, 64>}, {pipeline_mode = #tpu.pipeline_mode<synchronous>, transform_indices = @transform_6, window_bounds = array<i64: 1, 64>}, {pipeline_mode = #tpu.pipeline_mode<synchronous>, transform_indices = @transform_7, window_bounds = array<i64: 16, 64>}, {pipeline_mode = #tpu.pipeline_mode<synchronous>, transform_indices = @transform_8, window_bounds = array<i64: 32, 64>}, {pipeline_mode = #tpu.pipeline_mode<synchronous>, transform_indices = @transform_9, window_bounds = array<i64: 1, 64>}, {pipeline_mode = #tpu.pipeline_mode<synchronous>, transform_indices = @transform_10, window_bounds = array<i64: 2, 64, 384>}, {pipeline_mode = #tpu.pipeline_mode<synchronous>, transform_indices = @transform_11, window_bounds = array<i64: 2, 1, 384>}, {pipeline_mode = #tpu.pipeline_mode<synchronous>, transform_indices = @transform_12, window_bounds = array<i64: 2, 64, 192>}, {pipeline_mode = #tpu.pipeline_mode<synchronous>, transform_indices = @transform_13, window_bounds = array<i64: 2, 1, 192>}, {pipeline_mode = #tpu.pipeline_mode<synchronous>, transform_indices = @transform_14, window_bounds = array<i64: 2, 64, 64>}, {pipeline_mode = #tpu.pipeline_mode<synchronous>, transform_indices = @transform_15, window_bounds = array<i64: 2, 1, 64>}, {pipeline_mode = #tpu.pipeline_mode<synchronous>, transform_indices = @transform_16, window_bounds = array<i64: 2, 64, 256>}, {pipeline_mode = #tpu.pipeline_mode<synchronous>, transform_indices = @transform_17, window_bounds = array<i64: 2, 1, 256>}, {pipeline_mode = #tpu.pipeline_mode<synchronous>, transform_indices = @transform_18, window_bounds = array<i64: 2, 256, 64>}, {pipeline_mode = #tpu.pipeline_mode<synchronous>, transform_indices = @transform_19, window_bounds = array<i64: 2, 1, 64>}, {pipeline_mode = #tpu.pipeline_mode<synchronous>, transform_indices = @transform_20, window_bounds = array<i64: 64, 128>}, {pipeline_mode = #tpu.pipeline_mode<synchronous>, transform_indices = @transform_21, window_bounds = array<i64: 1, 128>}, {pipeline_mode = #tpu.pipeline_mode<synchronous>, transform_indices = @transform_22, window_bounds = array<i64: 64, 16>}, {pipeline_mode = #tpu.pipeline_mode<synchronous>, transform_indices = @transform_23, window_bounds = array<i64: 1, 16>}, {transform_indices = @transform_24, window_bounds = array<i64: 1, 16, 16>}]} {
    %c0 = arith.constant 0 : index
    %c0_0 = arith.constant 0 : index
    %c0_1 = arith.constant 0 : index
    %0 = vector.load %arg1[%c0, %c0_0, %c0_1] : memref<1x16x16xf32, #tpu.memory_space<vmem>>, vector<1x16x16xf32>
    %1 = vector.shape_cast %0 : vector<1x16x16xf32> to vector<16x16xf32>
    %c0_2 = arith.constant 0 : index
    %c0_3 = arith.constant 0 : index
    %c0_4 = arith.constant 0 : index
    %2 = vector.load %arg2[%c0_2, %c0_3, %c0_4] : memref<1x16x32xf32, #tpu.memory_space<vmem>>, vector<1x16x32xf32>
    %3 = vector.shape_cast %2 : vector<1x16x32xf32> to vector<16x32xf32>
    %c0_5 = arith.constant 0 : index
    %c0_6 = arith.constant 0 : index
    %c0_7 = arith.constant 0 : index
    %4 = vector.load %arg3[%c0_5, %c0_6, %c0_7] : memref<1x1x256xf32, #tpu.memory_space<vmem>>, vector<1x1x256xf32>
    %5 = vector.shape_cast %4 : vector<1x1x256xf32> to vector<1x256xf32>
    %c0_8 = arith.constant 0 : index
    %c0_9 = arith.constant 0 : index
    %6 = vector.load %arg4[%c0_8, %c0_9] : memref<256x64xbf16, #tpu.memory_space<vmem>>, vector<256x64xbf16>
    %7 = arith.truncf %5 : vector<1x256xf32> to vector<1x256xbf16>
    %cst = arith.constant dense<0.000000e+00> : vector<1x64xf32>
    %8 = tpu.matmul %7, %6, %cst {dimension_numbers = #tpu.dot_dimension_numbers<[1], [0], [0], [1], [0, 0, 1, 1], [], []>} : vector<1x256xbf16>, vector<256x64xbf16>, vector<1x64xf32> -> vector<1x64xf32>
    %c0_10 = arith.constant 0 : index
    %c0_11 = arith.constant 0 : index
    %9 = vector.load %arg5[%c0_10, %c0_11] : memref<1x64xf32, #tpu.memory_space<vmem>>, vector<1x64xf32>
    %10 = arith.addf %8, %9 : vector<1x64xf32>
    %cst_12 = arith.constant 0.000000e+00 : f32
    %11 = vector.broadcast %cst_12 : f32 to vector<1x64xf32>
    %12 = arith.subf %11, %10 : vector<1x64xf32>
    %13 = math.exp %12 : vector<1x64xf32>
    %cst_13 = arith.constant 1.000000e+00 : f32
    %14 = vector.broadcast %cst_13 : f32 to vector<1x64xf32>
    %15 = arith.addf %14, %13 : vector<1x64xf32>
    %cst_14 = arith.constant 1.000000e+00 : f32
    %16 = vector.broadcast %cst_14 : f32 to vector<1x64xf32>
    %17 = arith.divf %16, %15 : vector<1x64xf32>
    %18 = arith.mulf %10, %17 : vector<1x64xf32>
    %c0_15 = arith.constant 0 : index
    %c0_16 = arith.constant 0 : index
    %19 = vector.load %arg6[%c0_15, %c0_16] : memref<64x64xbf16, #tpu.memory_space<vmem>>, vector<64x64xbf16>
    %20 = arith.truncf %18 : vector<1x64xf32> to vector<1x64xbf16>
    %cst_17 = arith.constant dense<0.000000e+00> : vector<1x64xf32>
    %21 = tpu.matmul %20, %19, %cst_17 {dimension_numbers = #tpu.dot_dimension_numbers<[1], [0], [0], [1], [0, 0, 1, 1], [], []>} : vector<1x64xbf16>, vector<64x64xbf16>, vector<1x64xf32> -> vector<1x64xf32>
    %c0_18 = arith.constant 0 : index
    %c0_19 = arith.constant 0 : index
    %22 = vector.load %arg7[%c0_18, %c0_19] : memref<1x64xf32, #tpu.memory_space<vmem>>, vector<1x64xf32>
    %23 = arith.addf %21, %22 : vector<1x64xf32>
    %cst_20 = arith.constant 0.000000e+00 : f32
    %24 = vector.broadcast %cst_20 : f32 to vector<1x64xf32>
    %25 = arith.subf %24, %23 : vector<1x64xf32>
    %26 = math.exp %25 : vector<1x64xf32>
    %cst_21 = arith.constant 1.000000e+00 : f32
    %27 = vector.broadcast %cst_21 : f32 to vector<1x64xf32>
    %28 = arith.addf %27, %26 : vector<1x64xf32>
    %cst_22 = arith.constant 1.000000e+00 : f32
    %29 = vector.broadcast %cst_22 : f32 to vector<1x64xf32>
    %30 = arith.divf %29, %28 : vector<1x64xf32>
    %31 = arith.mulf %23, %30 : vector<1x64xf32>
    %c0_23 = arith.constant 0 : index
    %c0_24 = arith.constant 0 : index
    %32 = vector.load %arg8[%c0_23, %c0_24] : memref<16x64xbf16, #tpu.memory_space<vmem>>, vector<16x64xbf16>
    %33 = arith.truncf %1 : vector<16x16xf32> to vector<16x16xbf16>
    %cst_25 = arith.constant dense<0.000000e+00> : vector<16x64xf32>
    %34 = tpu.matmul %33, %32, %cst_25 {dimension_numbers = #tpu.dot_dimension_numbers<[1], [0], [0], [1], [0, 0, 1, 1], [], []>} : vector<16x16xbf16>, vector<16x64xbf16>, vector<16x64xf32> -> vector<16x64xf32>
    %c0_26 = arith.constant 0 : index
    %c0_27 = arith.constant 0 : index
    %35 = vector.load %arg9[%c0_26, %c0_27] : memref<32x64xbf16, #tpu.memory_space<vmem>>, vector<32x64xbf16>
    %36 = arith.truncf %3 : vector<16x32xf32> to vector<16x32xbf16>
    %cst_28 = arith.constant dense<0.000000e+00> : vector<16x64xf32>
    %37 = tpu.matmul %36, %35, %cst_28 {dimension_numbers = #tpu.dot_dimension_numbers<[1], [0], [0], [1], [0, 0, 1, 1], [], []>} : vector<16x32xbf16>, vector<32x64xbf16>, vector<16x64xf32> -> vector<16x64xf32>
    %38 = arith.addf %34, %37 : vector<16x64xf32>
    %c0_29 = arith.constant 0 : index
    %c0_30 = arith.constant 0 : index
    %39 = vector.load %arg10[%c0_29, %c0_30] : memref<1x64xf32, #tpu.memory_space<vmem>>, vector<1x64xf32>
    %40 = vector.broadcast %39 : vector<1x64xf32> to vector<16x64xf32>
    %41 = arith.addf %38, %40 : vector<16x64xf32>
    %c0_31 = arith.constant 0 : index
    %c0_32 = arith.constant 0 : index
    %c0_33 = arith.constant 0 : index
    %42 = vector.load %arg11[%c0_31, %c0_32, %c0_33] : memref<2x64x384xbf16, #tpu.memory_space<vmem>>, vector<1x64x384xbf16>
    %43 = vector.shape_cast %42 : vector<1x64x384xbf16> to vector<64x384xbf16>
    %44 = arith.truncf %31 : vector<1x64xf32> to vector<1x64xbf16>
    %cst_34 = arith.constant dense<0.000000e+00> : vector<1x384xf32>
    %45 = tpu.matmul %44, %43, %cst_34 {dimension_numbers = #tpu.dot_dimension_numbers<[1], [0], [0], [1], [0, 0, 1, 1], [], []>} : vector<1x64xbf16>, vector<64x384xbf16>, vector<1x384xf32> -> vector<1x384xf32>
    %c0_35 = arith.constant 0 : index
    %c0_36 = arith.constant 0 : index
    %c0_37 = arith.constant 0 : index
    %46 = vector.load %arg12[%c0_35, %c0_36, %c0_37] : memref<2x1x384xf32, #tpu.memory_space<vmem>>, vector<1x1x384xf32>
    %47 = vector.shape_cast %46 : vector<1x1x384xf32> to vector<1x384xf32>
    %48 = arith.addf %45, %47 : vector<1x384xf32>
    %49 = vector.extract_strided_slice %48 {offsets = [0, 0], sizes = [1, 64], strides = [1, 1]} : vector<1x384xf32> to vector<1x64xf32>
    %50 = vector.extract_strided_slice %48 {offsets = [0, 64], sizes = [1, 64], strides = [1, 1]} : vector<1x384xf32> to vector<1x64xf32>
    %51 = vector.extract_strided_slice %48 {offsets = [0, 128], sizes = [1, 64], strides = [1, 1]} : vector<1x384xf32> to vector<1x64xf32>
    %52 = vector.extract_strided_slice %48 {offsets = [0, 192], sizes = [1, 64], strides = [1, 1]} : vector<1x384xf32> to vector<1x64xf32>
    %53 = vector.extract_strided_slice %48 {offsets = [0, 256], sizes = [1, 64], strides = [1, 1]} : vector<1x384xf32> to vector<1x64xf32>
    %54 = vector.extract_strided_slice %48 {offsets = [0, 320], sizes = [1, 64], strides = [1, 1]} : vector<1x384xf32> to vector<1x64xf32>
    %cst_38 = arith.constant dense<0.000000e+00> : vector<16xf32>
    %55 = vector.multi_reduction <add>, %41, %cst_38 [1] : vector<16x64xf32> to vector<16xf32>
    %56 = vector.shape_cast %55 : vector<16xf32> to vector<16x1xf32>
    %cst_39 = arith.constant 6.400000e+01 : f32
    %57 = vector.broadcast %cst_39 : f32 to vector<16x1xf32>
    %58 = arith.divf %56, %57 : vector<16x1xf32>
    %59 = vector.broadcast %58 : vector<16x1xf32> to vector<16x64xf32>
    %60 = arith.subf %41, %59 : vector<16x64xf32>
    %61 = arith.mulf %60, %60 : vector<16x64xf32>
    %cst_40 = arith.constant dense<0.000000e+00> : vector<16xf32>
    %62 = vector.multi_reduction <add>, %61, %cst_40 [1] : vector<16x64xf32> to vector<16xf32>
    %63 = vector.shape_cast %62 : vector<16xf32> to vector<16x1xf32>
    %cst_41 = arith.constant 6.400000e+01 : f32
    %64 = vector.broadcast %cst_41 : f32 to vector<16x1xf32>
    %65 = arith.divf %63, %64 : vector<16x1xf32>
    %66 = vector.broadcast %58 : vector<16x1xf32> to vector<16x64xf32>
    %67 = arith.subf %41, %66 : vector<16x64xf32>
    %cst_42 = arith.constant 9.99999997E-7 : f32
    %68 = vector.broadcast %cst_42 : f32 to vector<16x1xf32>
    %69 = arith.addf %65, %68 : vector<16x1xf32>
    %70 = math.rsqrt %69 : vector<16x1xf32>
    %71 = vector.broadcast %70 : vector<16x1xf32> to vector<16x64xf32>
    %72 = arith.mulf %67, %71 : vector<16x64xf32>
    %cst_43 = arith.constant 1.000000e+00 : f32
    %73 = vector.broadcast %cst_43 : f32 to vector<1x64xf32>
    %74 = arith.addf %73, %50 : vector<1x64xf32>
    %75 = vector.broadcast %74 : vector<1x64xf32> to vector<16x64xf32>
    %76 = arith.mulf %72, %75 : vector<16x64xf32>
    %77 = vector.broadcast %49 : vector<1x64xf32> to vector<16x64xf32>
    %78 = arith.addf %76, %77 : vector<16x64xf32>
    %c0_44 = arith.constant 0 : index
    %c0_45 = arith.constant 0 : index
    %c0_46 = arith.constant 0 : index
    %79 = vector.load %arg13[%c0_44, %c0_45, %c0_46] : memref<2x64x192xbf16, #tpu.memory_space<vmem>>, vector<1x64x192xbf16>
    %80 = vector.shape_cast %79 : vector<1x64x192xbf16> to vector<64x192xbf16>
    %81 = arith.truncf %78 : vector<16x64xf32> to vector<16x64xbf16>
    %cst_47 = arith.constant dense<0.000000e+00> : vector<16x192xf32>
    %82 = tpu.matmul %81, %80, %cst_47 {dimension_numbers = #tpu.dot_dimension_numbers<[1], [0], [0], [1], [0, 0, 1, 1], [], []>} : vector<16x64xbf16>, vector<64x192xbf16>, vector<16x192xf32> -> vector<16x192xf32>
    %c0_48 = arith.constant 0 : index
    %c0_49 = arith.constant 0 : index
    %c0_50 = arith.constant 0 : index
    %83 = vector.load %arg14[%c0_48, %c0_49, %c0_50] : memref<2x1x192xf32, #tpu.memory_space<vmem>>, vector<1x1x192xf32>
    %84 = vector.shape_cast %83 : vector<1x1x192xf32> to vector<1x192xf32>
    %85 = vector.broadcast %84 : vector<1x192xf32> to vector<16x192xf32>
    %86 = arith.addf %82, %85 : vector<16x192xf32>
    %87 = vector.extract_strided_slice %86 {offsets = [0, 0], sizes = [16, 64], strides = [1, 1]} : vector<16x192xf32> to vector<16x64xf32>
    %88 = vector.extract_strided_slice %86 {offsets = [0, 64], sizes = [16, 64], strides = [1, 1]} : vector<16x192xf32> to vector<16x64xf32>
    %89 = vector.extract_strided_slice %86 {offsets = [0, 128], sizes = [16, 64], strides = [1, 1]} : vector<16x192xf32> to vector<16x64xf32>
    %90 = vector.extract_strided_slice %87 {offsets = [0, 0], sizes = [16, 16], strides = [1, 1]} : vector<16x64xf32> to vector<16x16xf32>
    %91 = arith.truncf %90 : vector<16x16xf32> to vector<16x16xbf16>
    %92 = vector.extract_strided_slice %88 {offsets = [0, 0], sizes = [16, 16], strides = [1, 1]} : vector<16x64xf32> to vector<16x16xf32>
    %93 = arith.truncf %92 : vector<16x16xf32> to vector<16x16xbf16>
    %cst_51 = arith.constant dense<0.000000e+00> : vector<16x16xf32>
    %94 = tpu.matmul %91, %93, %cst_51 {dimension_numbers = #tpu.dot_dimension_numbers<[1], [1], [0], [0], [0, 0, 1, 0], [], []>} : vector<16x16xbf16>, vector<16x16xbf16>, vector<16x16xf32> -> vector<16x16xf32>
    %cst_52 = arith.constant 2.500000e-01 : f32
    %95 = vector.broadcast %cst_52 : f32 to vector<16x16xf32>
    %96 = arith.mulf %94, %95 : vector<16x16xf32>
    %cst_53 = arith.constant dense<0xFF800000> : vector<16xf32>
    %97 = vector.multi_reduction <maximumf>, %96, %cst_53 [1] : vector<16x16xf32> to vector<16xf32>
    %98 = vector.shape_cast %97 : vector<16xf32> to vector<16x1xf32>
    %99 = vector.broadcast %98 : vector<16x1xf32> to vector<16x16xf32>
    %100 = arith.subf %96, %99 : vector<16x16xf32>
    %101 = math.exp %100 : vector<16x16xf32>
    %cst_54 = arith.constant dense<0.000000e+00> : vector<16xf32>
    %102 = vector.multi_reduction <add>, %101, %cst_54 [1] : vector<16x16xf32> to vector<16xf32>
    %103 = vector.shape_cast %102 : vector<16xf32> to vector<16x1xf32>
    %104 = tpu.reciprocal %103 {approx = true} : vector<16x1xf32> -> vector<16x1xf32>
    %105 = vector.broadcast %104 : vector<16x1xf32> to vector<16x16xf32>
    %106 = arith.mulf %101, %105 : vector<16x16xf32>
    %107 = arith.truncf %106 : vector<16x16xf32> to vector<16x16xbf16>
    %108 = vector.extract_strided_slice %89 {offsets = [0, 0], sizes = [16, 16], strides = [1, 1]} : vector<16x64xf32> to vector<16x16xf32>
    %109 = arith.truncf %108 : vector<16x16xf32> to vector<16x16xbf16>
    %cst_55 = arith.constant dense<0.000000e+00> : vector<16x16xf32>
    %110 = tpu.matmul %107, %109, %cst_55 {dimension_numbers = #tpu.dot_dimension_numbers<[1], [0], [0], [1], [0, 0, 1, 1], [], []>} : vector<16x16xbf16>, vector<16x16xbf16>, vector<16x16xf32> -> vector<16x16xf32>
    %111 = vector.extract_strided_slice %87 {offsets = [0, 16], sizes = [16, 16], strides = [1, 1]} : vector<16x64xf32> to vector<16x16xf32>
    %112 = arith.truncf %111 : vector<16x16xf32> to vector<16x16xbf16>
    %113 = vector.extract_strided_slice %88 {offsets = [0, 16], sizes = [16, 16], strides = [1, 1]} : vector<16x64xf32> to vector<16x16xf32>
    %114 = arith.truncf %113 : vector<16x16xf32> to vector<16x16xbf16>
    %cst_56 = arith.constant dense<0.000000e+00> : vector<16x16xf32>
    %115 = tpu.matmul %112, %114, %cst_56 {dimension_numbers = #tpu.dot_dimension_numbers<[1], [1], [0], [0], [0, 0, 1, 0], [], []>} : vector<16x16xbf16>, vector<16x16xbf16>, vector<16x16xf32> -> vector<16x16xf32>
    %cst_57 = arith.constant 2.500000e-01 : f32
    %116 = vector.broadcast %cst_57 : f32 to vector<16x16xf32>
    %117 = arith.mulf %115, %116 : vector<16x16xf32>
    %cst_58 = arith.constant dense<0xFF800000> : vector<16xf32>
    %118 = vector.multi_reduction <maximumf>, %117, %cst_58 [1] : vector<16x16xf32> to vector<16xf32>
    %119 = vector.shape_cast %118 : vector<16xf32> to vector<16x1xf32>
    %120 = vector.broadcast %119 : vector<16x1xf32> to vector<16x16xf32>
    %121 = arith.subf %117, %120 : vector<16x16xf32>
    %122 = math.exp %121 : vector<16x16xf32>
    %cst_59 = arith.constant dense<0.000000e+00> : vector<16xf32>
    %123 = vector.multi_reduction <add>, %122, %cst_59 [1] : vector<16x16xf32> to vector<16xf32>
    %124 = vector.shape_cast %123 : vector<16xf32> to vector<16x1xf32>
    %125 = tpu.reciprocal %124 {approx = true} : vector<16x1xf32> -> vector<16x1xf32>
    %126 = vector.broadcast %125 : vector<16x1xf32> to vector<16x16xf32>
    %127 = arith.mulf %122, %126 : vector<16x16xf32>
    %128 = arith.truncf %127 : vector<16x16xf32> to vector<16x16xbf16>
    %129 = vector.extract_strided_slice %89 {offsets = [0, 16], sizes = [16, 16], strides = [1, 1]} : vector<16x64xf32> to vector<16x16xf32>
    %130 = arith.truncf %129 : vector<16x16xf32> to vector<16x16xbf16>
    %cst_60 = arith.constant dense<0.000000e+00> : vector<16x16xf32>
    %131 = tpu.matmul %128, %130, %cst_60 {dimension_numbers = #tpu.dot_dimension_numbers<[1], [0], [0], [1], [0, 0, 1, 1], [], []>} : vector<16x16xbf16>, vector<16x16xbf16>, vector<16x16xf32> -> vector<16x16xf32>
    %132 = vector.extract_strided_slice %87 {offsets = [0, 32], sizes = [16, 16], strides = [1, 1]} : vector<16x64xf32> to vector<16x16xf32>
    %133 = arith.truncf %132 : vector<16x16xf32> to vector<16x16xbf16>
    %134 = vector.extract_strided_slice %88 {offsets = [0, 32], sizes = [16, 16], strides = [1, 1]} : vector<16x64xf32> to vector<16x16xf32>
    %135 = arith.truncf %134 : vector<16x16xf32> to vector<16x16xbf16>
    %cst_61 = arith.constant dense<0.000000e+00> : vector<16x16xf32>
    %136 = tpu.matmul %133, %135, %cst_61 {dimension_numbers = #tpu.dot_dimension_numbers<[1], [1], [0], [0], [0, 0, 1, 0], [], []>} : vector<16x16xbf16>, vector<16x16xbf16>, vector<16x16xf32> -> vector<16x16xf32>
    %cst_62 = arith.constant 2.500000e-01 : f32
    %137 = vector.broadcast %cst_62 : f32 to vector<16x16xf32>
    %138 = arith.mulf %136, %137 : vector<16x16xf32>
    %cst_63 = arith.constant dense<0xFF800000> : vector<16xf32>
    %139 = vector.multi_reduction <maximumf>, %138, %cst_63 [1] : vector<16x16xf32> to vector<16xf32>
    %140 = vector.shape_cast %139 : vector<16xf32> to vector<16x1xf32>
    %141 = vector.broadcast %140 : vector<16x1xf32> to vector<16x16xf32>
    %142 = arith.subf %138, %141 : vector<16x16xf32>
    %143 = math.exp %142 : vector<16x16xf32>
    %cst_64 = arith.constant dense<0.000000e+00> : vector<16xf32>
    %144 = vector.multi_reduction <add>, %143, %cst_64 [1] : vector<16x16xf32> to vector<16xf32>
    %145 = vector.shape_cast %144 : vector<16xf32> to vector<16x1xf32>
    %146 = tpu.reciprocal %145 {approx = true} : vector<16x1xf32> -> vector<16x1xf32>
    %147 = vector.broadcast %146 : vector<16x1xf32> to vector<16x16xf32>
    %148 = arith.mulf %143, %147 : vector<16x16xf32>
    %149 = arith.truncf %148 : vector<16x16xf32> to vector<16x16xbf16>
    %150 = vector.extract_strided_slice %89 {offsets = [0, 32], sizes = [16, 16], strides = [1, 1]} : vector<16x64xf32> to vector<16x16xf32>
    %151 = arith.truncf %150 : vector<16x16xf32> to vector<16x16xbf16>
    %cst_65 = arith.constant dense<0.000000e+00> : vector<16x16xf32>
    %152 = tpu.matmul %149, %151, %cst_65 {dimension_numbers = #tpu.dot_dimension_numbers<[1], [0], [0], [1], [0, 0, 1, 1], [], []>} : vector<16x16xbf16>, vector<16x16xbf16>, vector<16x16xf32> -> vector<16x16xf32>
    %153 = vector.extract_strided_slice %87 {offsets = [0, 48], sizes = [16, 16], strides = [1, 1]} : vector<16x64xf32> to vector<16x16xf32>
    %154 = arith.truncf %153 : vector<16x16xf32> to vector<16x16xbf16>
    %155 = vector.extract_strided_slice %88 {offsets = [0, 48], sizes = [16, 16], strides = [1, 1]} : vector<16x64xf32> to vector<16x16xf32>
    %156 = arith.truncf %155 : vector<16x16xf32> to vector<16x16xbf16>
    %cst_66 = arith.constant dense<0.000000e+00> : vector<16x16xf32>
    %157 = tpu.matmul %154, %156, %cst_66 {dimension_numbers = #tpu.dot_dimension_numbers<[1], [1], [0], [0], [0, 0, 1, 0], [], []>} : vector<16x16xbf16>, vector<16x16xbf16>, vector<16x16xf32> -> vector<16x16xf32>
    %cst_67 = arith.constant 2.500000e-01 : f32
    %158 = vector.broadcast %cst_67 : f32 to vector<16x16xf32>
    %159 = arith.mulf %157, %158 : vector<16x16xf32>
    %cst_68 = arith.constant dense<0xFF800000> : vector<16xf32>
    %160 = vector.multi_reduction <maximumf>, %159, %cst_68 [1] : vector<16x16xf32> to vector<16xf32>
    %161 = vector.shape_cast %160 : vector<16xf32> to vector<16x1xf32>
    %162 = vector.broadcast %161 : vector<16x1xf32> to vector<16x16xf32>
    %163 = arith.subf %159, %162 : vector<16x16xf32>
    %164 = math.exp %163 : vector<16x16xf32>
    %cst_69 = arith.constant dense<0.000000e+00> : vector<16xf32>
    %165 = vector.multi_reduction <add>, %164, %cst_69 [1] : vector<16x16xf32> to vector<16xf32>
    %166 = vector.shape_cast %165 : vector<16xf32> to vector<16x1xf32>
    %167 = tpu.reciprocal %166 {approx = true} : vector<16x1xf32> -> vector<16x1xf32>
    %168 = vector.broadcast %167 : vector<16x1xf32> to vector<16x16xf32>
    %169 = arith.mulf %164, %168 : vector<16x16xf32>
    %170 = arith.truncf %169 : vector<16x16xf32> to vector<16x16xbf16>
    %171 = vector.extract_strided_slice %89 {offsets = [0, 48], sizes = [16, 16], strides = [1, 1]} : vector<16x64xf32> to vector<16x16xf32>
    %172 = arith.truncf %171 : vector<16x16xf32> to vector<16x16xbf16>
    %cst_70 = arith.constant dense<0.000000e+00> : vector<16x16xf32>
    %173 = tpu.matmul %170, %172, %cst_70 {dimension_numbers = #tpu.dot_dimension_numbers<[1], [0], [0], [1], [0, 0, 1, 1], [], []>} : vector<16x16xbf16>, vector<16x16xbf16>, vector<16x16xf32> -> vector<16x16xf32>
    %174 = tpu.concatenate %110, %131, %152, %173 in 1 : vector<16x16xf32>, vector<16x16xf32>, vector<16x16xf32>, vector<16x16xf32> -> vector<16x64xf32>
    %c0_71 = arith.constant 0 : index
    %c0_72 = arith.constant 0 : index
    %c0_73 = arith.constant 0 : index
    %175 = vector.load %arg15[%c0_71, %c0_72, %c0_73] : memref<2x64x64xbf16, #tpu.memory_space<vmem>>, vector<1x64x64xbf16>
    %176 = vector.shape_cast %175 : vector<1x64x64xbf16> to vector<64x64xbf16>
    %177 = arith.truncf %174 : vector<16x64xf32> to vector<16x64xbf16>
    %cst_74 = arith.constant dense<0.000000e+00> : vector<16x64xf32>
    %178 = tpu.matmul %177, %176, %cst_74 {dimension_numbers = #tpu.dot_dimension_numbers<[1], [0], [0], [1], [0, 0, 1, 1], [], []>} : vector<16x64xbf16>, vector<64x64xbf16>, vector<16x64xf32> -> vector<16x64xf32>
    %c0_75 = arith.constant 0 : index
    %c0_76 = arith.constant 0 : index
    %c0_77 = arith.constant 0 : index
    %179 = vector.load %arg16[%c0_75, %c0_76, %c0_77] : memref<2x1x64xf32, #tpu.memory_space<vmem>>, vector<1x1x64xf32>
    %180 = vector.shape_cast %179 : vector<1x1x64xf32> to vector<1x64xf32>
    %181 = vector.broadcast %180 : vector<1x64xf32> to vector<16x64xf32>
    %182 = arith.addf %178, %181 : vector<16x64xf32>
    %183 = vector.broadcast %51 : vector<1x64xf32> to vector<16x64xf32>
    %184 = arith.mulf %183, %182 : vector<16x64xf32>
    %185 = arith.addf %41, %184 : vector<16x64xf32>
    %cst_78 = arith.constant dense<0.000000e+00> : vector<16xf32>
    %186 = vector.multi_reduction <add>, %185, %cst_78 [1] : vector<16x64xf32> to vector<16xf32>
    %187 = vector.shape_cast %186 : vector<16xf32> to vector<16x1xf32>
    %cst_79 = arith.constant 6.400000e+01 : f32
    %188 = vector.broadcast %cst_79 : f32 to vector<16x1xf32>
    %189 = arith.divf %187, %188 : vector<16x1xf32>
    %190 = vector.broadcast %189 : vector<16x1xf32> to vector<16x64xf32>
    %191 = arith.subf %185, %190 : vector<16x64xf32>
    %192 = arith.mulf %191, %191 : vector<16x64xf32>
    %cst_80 = arith.constant dense<0.000000e+00> : vector<16xf32>
    %193 = vector.multi_reduction <add>, %192, %cst_80 [1] : vector<16x64xf32> to vector<16xf32>
    %194 = vector.shape_cast %193 : vector<16xf32> to vector<16x1xf32>
    %cst_81 = arith.constant 6.400000e+01 : f32
    %195 = vector.broadcast %cst_81 : f32 to vector<16x1xf32>
    %196 = arith.divf %194, %195 : vector<16x1xf32>
    %197 = vector.broadcast %189 : vector<16x1xf32> to vector<16x64xf32>
    %198 = arith.subf %185, %197 : vector<16x64xf32>
    %cst_82 = arith.constant 9.99999997E-7 : f32
    %199 = vector.broadcast %cst_82 : f32 to vector<16x1xf32>
    %200 = arith.addf %196, %199 : vector<16x1xf32>
    %201 = math.rsqrt %200 : vector<16x1xf32>
    %202 = vector.broadcast %201 : vector<16x1xf32> to vector<16x64xf32>
    %203 = arith.mulf %198, %202 : vector<16x64xf32>
    %cst_83 = arith.constant 1.000000e+00 : f32
    %204 = vector.broadcast %cst_83 : f32 to vector<1x64xf32>
    %205 = arith.addf %204, %53 : vector<1x64xf32>
    %206 = vector.broadcast %205 : vector<1x64xf32> to vector<16x64xf32>
    %207 = arith.mulf %203, %206 : vector<16x64xf32>
    %208 = vector.broadcast %52 : vector<1x64xf32> to vector<16x64xf32>
    %209 = arith.addf %207, %208 : vector<16x64xf32>
    %c0_84 = arith.constant 0 : index
    %c0_85 = arith.constant 0 : index
    %c0_86 = arith.constant 0 : index
    %210 = vector.load %arg17[%c0_84, %c0_85, %c0_86] : memref<2x64x256xbf16, #tpu.memory_space<vmem>>, vector<1x64x256xbf16>
    %211 = vector.shape_cast %210 : vector<1x64x256xbf16> to vector<64x256xbf16>
    %212 = arith.truncf %209 : vector<16x64xf32> to vector<16x64xbf16>
    %cst_87 = arith.constant dense<0.000000e+00> : vector<16x256xf32>
    %213 = tpu.matmul %212, %211, %cst_87 {dimension_numbers = #tpu.dot_dimension_numbers<[1], [0], [0], [1], [0, 0, 1, 1], [], []>} : vector<16x64xbf16>, vector<64x256xbf16>, vector<16x256xf32> -> vector<16x256xf32>
    %c0_88 = arith.constant 0 : index
    %c0_89 = arith.constant 0 : index
    %c0_90 = arith.constant 0 : index
    %214 = vector.load %arg18[%c0_88, %c0_89, %c0_90] : memref<2x1x256xf32, #tpu.memory_space<vmem>>, vector<1x1x256xf32>
    %215 = vector.shape_cast %214 : vector<1x1x256xf32> to vector<1x256xf32>
    %216 = vector.broadcast %215 : vector<1x256xf32> to vector<16x256xf32>
    %217 = arith.addf %213, %216 : vector<16x256xf32>
    %cst_91 = arith.constant 5.000000e-01 : f32
    %218 = vector.broadcast %cst_91 : f32 to vector<16x256xf32>
    %219 = arith.mulf %218, %217 : vector<16x256xf32>
    %cst_92 = arith.constant 4.471500e-02 : f32
    %220 = vector.broadcast %cst_92 : f32 to vector<16x256xf32>
    %221 = arith.mulf %220, %217 : vector<16x256xf32>
    %222 = arith.mulf %221, %217 : vector<16x256xf32>
    %223 = arith.mulf %222, %217 : vector<16x256xf32>
    %224 = arith.addf %217, %223 : vector<16x256xf32>
    %cst_93 = arith.constant 0.797884583 : f32
    %225 = vector.broadcast %cst_93 : f32 to vector<16x256xf32>
    %226 = arith.mulf %225, %224 : vector<16x256xf32>
    %227 = math.tanh %226 : vector<16x256xf32>
    %cst_94 = arith.constant 1.000000e+00 : f32
    %228 = vector.broadcast %cst_94 : f32 to vector<16x256xf32>
    %229 = arith.addf %228, %227 : vector<16x256xf32>
    %230 = arith.mulf %219, %229 : vector<16x256xf32>
    %c0_95 = arith.constant 0 : index
    %c0_96 = arith.constant 0 : index
    %c0_97 = arith.constant 0 : index
    %231 = vector.load %arg19[%c0_95, %c0_96, %c0_97] : memref<2x256x64xbf16, #tpu.memory_space<vmem>>, vector<1x256x64xbf16>
    %232 = vector.shape_cast %231 : vector<1x256x64xbf16> to vector<256x64xbf16>
    %233 = arith.truncf %230 : vector<16x256xf32> to vector<16x256xbf16>
    %cst_98 = arith.constant dense<0.000000e+00> : vector<16x64xf32>
    %234 = tpu.matmul %233, %232, %cst_98 {dimension_numbers = #tpu.dot_dimension_numbers<[1], [0], [0], [1], [0, 0, 1, 1], [], []>} : vector<16x256xbf16>, vector<256x64xbf16>, vector<16x64xf32> -> vector<16x64xf32>
    %c0_99 = arith.constant 0 : index
    %c0_100 = arith.constant 0 : index
    %c0_101 = arith.constant 0 : index
    %235 = vector.load %arg20[%c0_99, %c0_100, %c0_101] : memref<2x1x64xf32, #tpu.memory_space<vmem>>, vector<1x1x64xf32>
    %236 = vector.shape_cast %235 : vector<1x1x64xf32> to vector<1x64xf32>
    %237 = vector.broadcast %236 : vector<1x64xf32> to vector<16x64xf32>
    %238 = arith.addf %234, %237 : vector<16x64xf32>
    %239 = vector.broadcast %54 : vector<1x64xf32> to vector<16x64xf32>
    %240 = arith.mulf %239, %238 : vector<16x64xf32>
    %241 = arith.addf %185, %240 : vector<16x64xf32>
    %c1 = arith.constant 1 : index
    %c0_102 = arith.constant 0 : index
    %c0_103 = arith.constant 0 : index
    %242 = vector.load %arg11[%c1, %c0_102, %c0_103] : memref<2x64x384xbf16, #tpu.memory_space<vmem>>, vector<1x64x384xbf16>
    %243 = vector.shape_cast %242 : vector<1x64x384xbf16> to vector<64x384xbf16>
    %244 = arith.truncf %31 : vector<1x64xf32> to vector<1x64xbf16>
    %cst_104 = arith.constant dense<0.000000e+00> : vector<1x384xf32>
    %245 = tpu.matmul %244, %243, %cst_104 {dimension_numbers = #tpu.dot_dimension_numbers<[1], [0], [0], [1], [0, 0, 1, 1], [], []>} : vector<1x64xbf16>, vector<64x384xbf16>, vector<1x384xf32> -> vector<1x384xf32>
    %c1_105 = arith.constant 1 : index
    %c0_106 = arith.constant 0 : index
    %c0_107 = arith.constant 0 : index
    %246 = vector.load %arg12[%c1_105, %c0_106, %c0_107] : memref<2x1x384xf32, #tpu.memory_space<vmem>>, vector<1x1x384xf32>
    %247 = vector.shape_cast %246 : vector<1x1x384xf32> to vector<1x384xf32>
    %248 = arith.addf %245, %247 : vector<1x384xf32>
    %249 = vector.extract_strided_slice %248 {offsets = [0, 0], sizes = [1, 64], strides = [1, 1]} : vector<1x384xf32> to vector<1x64xf32>
    %250 = vector.extract_strided_slice %248 {offsets = [0, 64], sizes = [1, 64], strides = [1, 1]} : vector<1x384xf32> to vector<1x64xf32>
    %251 = vector.extract_strided_slice %248 {offsets = [0, 128], sizes = [1, 64], strides = [1, 1]} : vector<1x384xf32> to vector<1x64xf32>
    %252 = vector.extract_strided_slice %248 {offsets = [0, 192], sizes = [1, 64], strides = [1, 1]} : vector<1x384xf32> to vector<1x64xf32>
    %253 = vector.extract_strided_slice %248 {offsets = [0, 256], sizes = [1, 64], strides = [1, 1]} : vector<1x384xf32> to vector<1x64xf32>
    %254 = vector.extract_strided_slice %248 {offsets = [0, 320], sizes = [1, 64], strides = [1, 1]} : vector<1x384xf32> to vector<1x64xf32>
    %cst_108 = arith.constant dense<0.000000e+00> : vector<16xf32>
    %255 = vector.multi_reduction <add>, %241, %cst_108 [1] : vector<16x64xf32> to vector<16xf32>
    %256 = vector.shape_cast %255 : vector<16xf32> to vector<16x1xf32>
    %cst_109 = arith.constant 6.400000e+01 : f32
    %257 = vector.broadcast %cst_109 : f32 to vector<16x1xf32>
    %258 = arith.divf %256, %257 : vector<16x1xf32>
    %259 = vector.broadcast %258 : vector<16x1xf32> to vector<16x64xf32>
    %260 = arith.subf %241, %259 : vector<16x64xf32>
    %261 = arith.mulf %260, %260 : vector<16x64xf32>
    %cst_110 = arith.constant dense<0.000000e+00> : vector<16xf32>
    %262 = vector.multi_reduction <add>, %261, %cst_110 [1] : vector<16x64xf32> to vector<16xf32>
    %263 = vector.shape_cast %262 : vector<16xf32> to vector<16x1xf32>
    %cst_111 = arith.constant 6.400000e+01 : f32
    %264 = vector.broadcast %cst_111 : f32 to vector<16x1xf32>
    %265 = arith.divf %263, %264 : vector<16x1xf32>
    %266 = vector.broadcast %258 : vector<16x1xf32> to vector<16x64xf32>
    %267 = arith.subf %241, %266 : vector<16x64xf32>
    %cst_112 = arith.constant 9.99999997E-7 : f32
    %268 = vector.broadcast %cst_112 : f32 to vector<16x1xf32>
    %269 = arith.addf %265, %268 : vector<16x1xf32>
    %270 = math.rsqrt %269 : vector<16x1xf32>
    %271 = vector.broadcast %270 : vector<16x1xf32> to vector<16x64xf32>
    %272 = arith.mulf %267, %271 : vector<16x64xf32>
    %cst_113 = arith.constant 1.000000e+00 : f32
    %273 = vector.broadcast %cst_113 : f32 to vector<1x64xf32>
    %274 = arith.addf %273, %250 : vector<1x64xf32>
    %275 = vector.broadcast %274 : vector<1x64xf32> to vector<16x64xf32>
    %276 = arith.mulf %272, %275 : vector<16x64xf32>
    %277 = vector.broadcast %249 : vector<1x64xf32> to vector<16x64xf32>
    %278 = arith.addf %276, %277 : vector<16x64xf32>
    %c1_114 = arith.constant 1 : index
    %c0_115 = arith.constant 0 : index
    %c0_116 = arith.constant 0 : index
    %279 = vector.load %arg13[%c1_114, %c0_115, %c0_116] : memref<2x64x192xbf16, #tpu.memory_space<vmem>>, vector<1x64x192xbf16>
    %280 = vector.shape_cast %279 : vector<1x64x192xbf16> to vector<64x192xbf16>
    %281 = arith.truncf %278 : vector<16x64xf32> to vector<16x64xbf16>
    %cst_117 = arith.constant dense<0.000000e+00> : vector<16x192xf32>
    %282 = tpu.matmul %281, %280, %cst_117 {dimension_numbers = #tpu.dot_dimension_numbers<[1], [0], [0], [1], [0, 0, 1, 1], [], []>} : vector<16x64xbf16>, vector<64x192xbf16>, vector<16x192xf32> -> vector<16x192xf32>
    %c1_118 = arith.constant 1 : index
    %c0_119 = arith.constant 0 : index
    %c0_120 = arith.constant 0 : index
    %283 = vector.load %arg14[%c1_118, %c0_119, %c0_120] : memref<2x1x192xf32, #tpu.memory_space<vmem>>, vector<1x1x192xf32>
    %284 = vector.shape_cast %283 : vector<1x1x192xf32> to vector<1x192xf32>
    %285 = vector.broadcast %284 : vector<1x192xf32> to vector<16x192xf32>
    %286 = arith.addf %282, %285 : vector<16x192xf32>
    %287 = vector.extract_strided_slice %286 {offsets = [0, 0], sizes = [16, 64], strides = [1, 1]} : vector<16x192xf32> to vector<16x64xf32>
    %288 = vector.extract_strided_slice %286 {offsets = [0, 64], sizes = [16, 64], strides = [1, 1]} : vector<16x192xf32> to vector<16x64xf32>
    %289 = vector.extract_strided_slice %286 {offsets = [0, 128], sizes = [16, 64], strides = [1, 1]} : vector<16x192xf32> to vector<16x64xf32>
    %290 = vector.extract_strided_slice %287 {offsets = [0, 0], sizes = [16, 16], strides = [1, 1]} : vector<16x64xf32> to vector<16x16xf32>
    %291 = arith.truncf %290 : vector<16x16xf32> to vector<16x16xbf16>
    %292 = vector.extract_strided_slice %288 {offsets = [0, 0], sizes = [16, 16], strides = [1, 1]} : vector<16x64xf32> to vector<16x16xf32>
    %293 = arith.truncf %292 : vector<16x16xf32> to vector<16x16xbf16>
    %cst_121 = arith.constant dense<0.000000e+00> : vector<16x16xf32>
    %294 = tpu.matmul %291, %293, %cst_121 {dimension_numbers = #tpu.dot_dimension_numbers<[1], [1], [0], [0], [0, 0, 1, 0], [], []>} : vector<16x16xbf16>, vector<16x16xbf16>, vector<16x16xf32> -> vector<16x16xf32>
    %cst_122 = arith.constant 2.500000e-01 : f32
    %295 = vector.broadcast %cst_122 : f32 to vector<16x16xf32>
    %296 = arith.mulf %294, %295 : vector<16x16xf32>
    %cst_123 = arith.constant dense<0xFF800000> : vector<16xf32>
    %297 = vector.multi_reduction <maximumf>, %296, %cst_123 [1] : vector<16x16xf32> to vector<16xf32>
    %298 = vector.shape_cast %297 : vector<16xf32> to vector<16x1xf32>
    %299 = vector.broadcast %298 : vector<16x1xf32> to vector<16x16xf32>
    %300 = arith.subf %296, %299 : vector<16x16xf32>
    %301 = math.exp %300 : vector<16x16xf32>
    %cst_124 = arith.constant dense<0.000000e+00> : vector<16xf32>
    %302 = vector.multi_reduction <add>, %301, %cst_124 [1] : vector<16x16xf32> to vector<16xf32>
    %303 = vector.shape_cast %302 : vector<16xf32> to vector<16x1xf32>
    %304 = tpu.reciprocal %303 {approx = true} : vector<16x1xf32> -> vector<16x1xf32>
    %305 = vector.broadcast %304 : vector<16x1xf32> to vector<16x16xf32>
    %306 = arith.mulf %301, %305 : vector<16x16xf32>
    %307 = arith.truncf %306 : vector<16x16xf32> to vector<16x16xbf16>
    %308 = vector.extract_strided_slice %289 {offsets = [0, 0], sizes = [16, 16], strides = [1, 1]} : vector<16x64xf32> to vector<16x16xf32>
    %309 = arith.truncf %308 : vector<16x16xf32> to vector<16x16xbf16>
    %cst_125 = arith.constant dense<0.000000e+00> : vector<16x16xf32>
    %310 = tpu.matmul %307, %309, %cst_125 {dimension_numbers = #tpu.dot_dimension_numbers<[1], [0], [0], [1], [0, 0, 1, 1], [], []>} : vector<16x16xbf16>, vector<16x16xbf16>, vector<16x16xf32> -> vector<16x16xf32>
    %311 = vector.extract_strided_slice %287 {offsets = [0, 16], sizes = [16, 16], strides = [1, 1]} : vector<16x64xf32> to vector<16x16xf32>
    %312 = arith.truncf %311 : vector<16x16xf32> to vector<16x16xbf16>
    %313 = vector.extract_strided_slice %288 {offsets = [0, 16], sizes = [16, 16], strides = [1, 1]} : vector<16x64xf32> to vector<16x16xf32>
    %314 = arith.truncf %313 : vector<16x16xf32> to vector<16x16xbf16>
    %cst_126 = arith.constant dense<0.000000e+00> : vector<16x16xf32>
    %315 = tpu.matmul %312, %314, %cst_126 {dimension_numbers = #tpu.dot_dimension_numbers<[1], [1], [0], [0], [0, 0, 1, 0], [], []>} : vector<16x16xbf16>, vector<16x16xbf16>, vector<16x16xf32> -> vector<16x16xf32>
    %cst_127 = arith.constant 2.500000e-01 : f32
    %316 = vector.broadcast %cst_127 : f32 to vector<16x16xf32>
    %317 = arith.mulf %315, %316 : vector<16x16xf32>
    %cst_128 = arith.constant dense<0xFF800000> : vector<16xf32>
    %318 = vector.multi_reduction <maximumf>, %317, %cst_128 [1] : vector<16x16xf32> to vector<16xf32>
    %319 = vector.shape_cast %318 : vector<16xf32> to vector<16x1xf32>
    %320 = vector.broadcast %319 : vector<16x1xf32> to vector<16x16xf32>
    %321 = arith.subf %317, %320 : vector<16x16xf32>
    %322 = math.exp %321 : vector<16x16xf32>
    %cst_129 = arith.constant dense<0.000000e+00> : vector<16xf32>
    %323 = vector.multi_reduction <add>, %322, %cst_129 [1] : vector<16x16xf32> to vector<16xf32>
    %324 = vector.shape_cast %323 : vector<16xf32> to vector<16x1xf32>
    %325 = tpu.reciprocal %324 {approx = true} : vector<16x1xf32> -> vector<16x1xf32>
    %326 = vector.broadcast %325 : vector<16x1xf32> to vector<16x16xf32>
    %327 = arith.mulf %322, %326 : vector<16x16xf32>
    %328 = arith.truncf %327 : vector<16x16xf32> to vector<16x16xbf16>
    %329 = vector.extract_strided_slice %289 {offsets = [0, 16], sizes = [16, 16], strides = [1, 1]} : vector<16x64xf32> to vector<16x16xf32>
    %330 = arith.truncf %329 : vector<16x16xf32> to vector<16x16xbf16>
    %cst_130 = arith.constant dense<0.000000e+00> : vector<16x16xf32>
    %331 = tpu.matmul %328, %330, %cst_130 {dimension_numbers = #tpu.dot_dimension_numbers<[1], [0], [0], [1], [0, 0, 1, 1], [], []>} : vector<16x16xbf16>, vector<16x16xbf16>, vector<16x16xf32> -> vector<16x16xf32>
    %332 = vector.extract_strided_slice %287 {offsets = [0, 32], sizes = [16, 16], strides = [1, 1]} : vector<16x64xf32> to vector<16x16xf32>
    %333 = arith.truncf %332 : vector<16x16xf32> to vector<16x16xbf16>
    %334 = vector.extract_strided_slice %288 {offsets = [0, 32], sizes = [16, 16], strides = [1, 1]} : vector<16x64xf32> to vector<16x16xf32>
    %335 = arith.truncf %334 : vector<16x16xf32> to vector<16x16xbf16>
    %cst_131 = arith.constant dense<0.000000e+00> : vector<16x16xf32>
    %336 = tpu.matmul %333, %335, %cst_131 {dimension_numbers = #tpu.dot_dimension_numbers<[1], [1], [0], [0], [0, 0, 1, 0], [], []>} : vector<16x16xbf16>, vector<16x16xbf16>, vector<16x16xf32> -> vector<16x16xf32>
    %cst_132 = arith.constant 2.500000e-01 : f32
    %337 = vector.broadcast %cst_132 : f32 to vector<16x16xf32>
    %338 = arith.mulf %336, %337 : vector<16x16xf32>
    %cst_133 = arith.constant dense<0xFF800000> : vector<16xf32>
    %339 = vector.multi_reduction <maximumf>, %338, %cst_133 [1] : vector<16x16xf32> to vector<16xf32>
    %340 = vector.shape_cast %339 : vector<16xf32> to vector<16x1xf32>
    %341 = vector.broadcast %340 : vector<16x1xf32> to vector<16x16xf32>
    %342 = arith.subf %338, %341 : vector<16x16xf32>
    %343 = math.exp %342 : vector<16x16xf32>
    %cst_134 = arith.constant dense<0.000000e+00> : vector<16xf32>
    %344 = vector.multi_reduction <add>, %343, %cst_134 [1] : vector<16x16xf32> to vector<16xf32>
    %345 = vector.shape_cast %344 : vector<16xf32> to vector<16x1xf32>
    %346 = tpu.reciprocal %345 {approx = true} : vector<16x1xf32> -> vector<16x1xf32>
    %347 = vector.broadcast %346 : vector<16x1xf32> to vector<16x16xf32>
    %348 = arith.mulf %343, %347 : vector<16x16xf32>
    %349 = arith.truncf %348 : vector<16x16xf32> to vector<16x16xbf16>
    %350 = vector.extract_strided_slice %289 {offsets = [0, 32], sizes = [16, 16], strides = [1, 1]} : vector<16x64xf32> to vector<16x16xf32>
    %351 = arith.truncf %350 : vector<16x16xf32> to vector<16x16xbf16>
    %cst_135 = arith.constant dense<0.000000e+00> : vector<16x16xf32>
    %352 = tpu.matmul %349, %351, %cst_135 {dimension_numbers = #tpu.dot_dimension_numbers<[1], [0], [0], [1], [0, 0, 1, 1], [], []>} : vector<16x16xbf16>, vector<16x16xbf16>, vector<16x16xf32> -> vector<16x16xf32>
    %353 = vector.extract_strided_slice %287 {offsets = [0, 48], sizes = [16, 16], strides = [1, 1]} : vector<16x64xf32> to vector<16x16xf32>
    %354 = arith.truncf %353 : vector<16x16xf32> to vector<16x16xbf16>
    %355 = vector.extract_strided_slice %288 {offsets = [0, 48], sizes = [16, 16], strides = [1, 1]} : vector<16x64xf32> to vector<16x16xf32>
    %356 = arith.truncf %355 : vector<16x16xf32> to vector<16x16xbf16>
    %cst_136 = arith.constant dense<0.000000e+00> : vector<16x16xf32>
    %357 = tpu.matmul %354, %356, %cst_136 {dimension_numbers = #tpu.dot_dimension_numbers<[1], [1], [0], [0], [0, 0, 1, 0], [], []>} : vector<16x16xbf16>, vector<16x16xbf16>, vector<16x16xf32> -> vector<16x16xf32>
    %cst_137 = arith.constant 2.500000e-01 : f32
    %358 = vector.broadcast %cst_137 : f32 to vector<16x16xf32>
    %359 = arith.mulf %357, %358 : vector<16x16xf32>
    %cst_138 = arith.constant dense<0xFF800000> : vector<16xf32>
    %360 = vector.multi_reduction <maximumf>, %359, %cst_138 [1] : vector<16x16xf32> to vector<16xf32>
    %361 = vector.shape_cast %360 : vector<16xf32> to vector<16x1xf32>
    %362 = vector.broadcast %361 : vector<16x1xf32> to vector<16x16xf32>
    %363 = arith.subf %359, %362 : vector<16x16xf32>
    %364 = math.exp %363 : vector<16x16xf32>
    %cst_139 = arith.constant dense<0.000000e+00> : vector<16xf32>
    %365 = vector.multi_reduction <add>, %364, %cst_139 [1] : vector<16x16xf32> to vector<16xf32>
    %366 = vector.shape_cast %365 : vector<16xf32> to vector<16x1xf32>
    %367 = tpu.reciprocal %366 {approx = true} : vector<16x1xf32> -> vector<16x1xf32>
    %368 = vector.broadcast %367 : vector<16x1xf32> to vector<16x16xf32>
    %369 = arith.mulf %364, %368 : vector<16x16xf32>
    %370 = arith.truncf %369 : vector<16x16xf32> to vector<16x16xbf16>
    %371 = vector.extract_strided_slice %289 {offsets = [0, 48], sizes = [16, 16], strides = [1, 1]} : vector<16x64xf32> to vector<16x16xf32>
    %372 = arith.truncf %371 : vector<16x16xf32> to vector<16x16xbf16>
    %cst_140 = arith.constant dense<0.000000e+00> : vector<16x16xf32>
    %373 = tpu.matmul %370, %372, %cst_140 {dimension_numbers = #tpu.dot_dimension_numbers<[1], [0], [0], [1], [0, 0, 1, 1], [], []>} : vector<16x16xbf16>, vector<16x16xbf16>, vector<16x16xf32> -> vector<16x16xf32>
    %374 = tpu.concatenate %310, %331, %352, %373 in 1 : vector<16x16xf32>, vector<16x16xf32>, vector<16x16xf32>, vector<16x16xf32> -> vector<16x64xf32>
    %c1_141 = arith.constant 1 : index
    %c0_142 = arith.constant 0 : index
    %c0_143 = arith.constant 0 : index
    %375 = vector.load %arg15[%c1_141, %c0_142, %c0_143] : memref<2x64x64xbf16, #tpu.memory_space<vmem>>, vector<1x64x64xbf16>
    %376 = vector.shape_cast %375 : vector<1x64x64xbf16> to vector<64x64xbf16>
    %377 = arith.truncf %374 : vector<16x64xf32> to vector<16x64xbf16>
    %cst_144 = arith.constant dense<0.000000e+00> : vector<16x64xf32>
    %378 = tpu.matmul %377, %376, %cst_144 {dimension_numbers = #tpu.dot_dimension_numbers<[1], [0], [0], [1], [0, 0, 1, 1], [], []>} : vector<16x64xbf16>, vector<64x64xbf16>, vector<16x64xf32> -> vector<16x64xf32>
    %c1_145 = arith.constant 1 : index
    %c0_146 = arith.constant 0 : index
    %c0_147 = arith.constant 0 : index
    %379 = vector.load %arg16[%c1_145, %c0_146, %c0_147] : memref<2x1x64xf32, #tpu.memory_space<vmem>>, vector<1x1x64xf32>
    %380 = vector.shape_cast %379 : vector<1x1x64xf32> to vector<1x64xf32>
    %381 = vector.broadcast %380 : vector<1x64xf32> to vector<16x64xf32>
    %382 = arith.addf %378, %381 : vector<16x64xf32>
    %383 = vector.broadcast %251 : vector<1x64xf32> to vector<16x64xf32>
    %384 = arith.mulf %383, %382 : vector<16x64xf32>
    %385 = arith.addf %241, %384 : vector<16x64xf32>
    %cst_148 = arith.constant dense<0.000000e+00> : vector<16xf32>
    %386 = vector.multi_reduction <add>, %385, %cst_148 [1] : vector<16x64xf32> to vector<16xf32>
    %387 = vector.shape_cast %386 : vector<16xf32> to vector<16x1xf32>
    %cst_149 = arith.constant 6.400000e+01 : f32
    %388 = vector.broadcast %cst_149 : f32 to vector<16x1xf32>
    %389 = arith.divf %387, %388 : vector<16x1xf32>
    %390 = vector.broadcast %389 : vector<16x1xf32> to vector<16x64xf32>
    %391 = arith.subf %385, %390 : vector<16x64xf32>
    %392 = arith.mulf %391, %391 : vector<16x64xf32>
    %cst_150 = arith.constant dense<0.000000e+00> : vector<16xf32>
    %393 = vector.multi_reduction <add>, %392, %cst_150 [1] : vector<16x64xf32> to vector<16xf32>
    %394 = vector.shape_cast %393 : vector<16xf32> to vector<16x1xf32>
    %cst_151 = arith.constant 6.400000e+01 : f32
    %395 = vector.broadcast %cst_151 : f32 to vector<16x1xf32>
    %396 = arith.divf %394, %395 : vector<16x1xf32>
    %397 = vector.broadcast %389 : vector<16x1xf32> to vector<16x64xf32>
    %398 = arith.subf %385, %397 : vector<16x64xf32>
    %cst_152 = arith.constant 9.99999997E-7 : f32
    %399 = vector.broadcast %cst_152 : f32 to vector<16x1xf32>
    %400 = arith.addf %396, %399 : vector<16x1xf32>
    %401 = math.rsqrt %400 : vector<16x1xf32>
    %402 = vector.broadcast %401 : vector<16x1xf32> to vector<16x64xf32>
    %403 = arith.mulf %398, %402 : vector<16x64xf32>
    %cst_153 = arith.constant 1.000000e+00 : f32
    %404 = vector.broadcast %cst_153 : f32 to vector<1x64xf32>
    %405 = arith.addf %404, %253 : vector<1x64xf32>
    %406 = vector.broadcast %405 : vector<1x64xf32> to vector<16x64xf32>
    %407 = arith.mulf %403, %406 : vector<16x64xf32>
    %408 = vector.broadcast %252 : vector<1x64xf32> to vector<16x64xf32>
    %409 = arith.addf %407, %408 : vector<16x64xf32>
    %c1_154 = arith.constant 1 : index
    %c0_155 = arith.constant 0 : index
    %c0_156 = arith.constant 0 : index
    %410 = vector.load %arg17[%c1_154, %c0_155, %c0_156] : memref<2x64x256xbf16, #tpu.memory_space<vmem>>, vector<1x64x256xbf16>
    %411 = vector.shape_cast %410 : vector<1x64x256xbf16> to vector<64x256xbf16>
    %412 = arith.truncf %409 : vector<16x64xf32> to vector<16x64xbf16>
    %cst_157 = arith.constant dense<0.000000e+00> : vector<16x256xf32>
    %413 = tpu.matmul %412, %411, %cst_157 {dimension_numbers = #tpu.dot_dimension_numbers<[1], [0], [0], [1], [0, 0, 1, 1], [], []>} : vector<16x64xbf16>, vector<64x256xbf16>, vector<16x256xf32> -> vector<16x256xf32>
    %c1_158 = arith.constant 1 : index
    %c0_159 = arith.constant 0 : index
    %c0_160 = arith.constant 0 : index
    %414 = vector.load %arg18[%c1_158, %c0_159, %c0_160] : memref<2x1x256xf32, #tpu.memory_space<vmem>>, vector<1x1x256xf32>
    %415 = vector.shape_cast %414 : vector<1x1x256xf32> to vector<1x256xf32>
    %416 = vector.broadcast %415 : vector<1x256xf32> to vector<16x256xf32>
    %417 = arith.addf %413, %416 : vector<16x256xf32>
    %cst_161 = arith.constant 5.000000e-01 : f32
    %418 = vector.broadcast %cst_161 : f32 to vector<16x256xf32>
    %419 = arith.mulf %418, %417 : vector<16x256xf32>
    %cst_162 = arith.constant 4.471500e-02 : f32
    %420 = vector.broadcast %cst_162 : f32 to vector<16x256xf32>
    %421 = arith.mulf %420, %417 : vector<16x256xf32>
    %422 = arith.mulf %421, %417 : vector<16x256xf32>
    %423 = arith.mulf %422, %417 : vector<16x256xf32>
    %424 = arith.addf %417, %423 : vector<16x256xf32>
    %cst_163 = arith.constant 0.797884583 : f32
    %425 = vector.broadcast %cst_163 : f32 to vector<16x256xf32>
    %426 = arith.mulf %425, %424 : vector<16x256xf32>
    %427 = math.tanh %426 : vector<16x256xf32>
    %cst_164 = arith.constant 1.000000e+00 : f32
    %428 = vector.broadcast %cst_164 : f32 to vector<16x256xf32>
    %429 = arith.addf %428, %427 : vector<16x256xf32>
    %430 = arith.mulf %419, %429 : vector<16x256xf32>
    %c1_165 = arith.constant 1 : index
    %c0_166 = arith.constant 0 : index
    %c0_167 = arith.constant 0 : index
    %431 = vector.load %arg19[%c1_165, %c0_166, %c0_167] : memref<2x256x64xbf16, #tpu.memory_space<vmem>>, vector<1x256x64xbf16>
    %432 = vector.shape_cast %431 : vector<1x256x64xbf16> to vector<256x64xbf16>
    %433 = arith.truncf %430 : vector<16x256xf32> to vector<16x256xbf16>
    %cst_168 = arith.constant dense<0.000000e+00> : vector<16x64xf32>
    %434 = tpu.matmul %433, %432, %cst_168 {dimension_numbers = #tpu.dot_dimension_numbers<[1], [0], [0], [1], [0, 0, 1, 1], [], []>} : vector<16x256xbf16>, vector<256x64xbf16>, vector<16x64xf32> -> vector<16x64xf32>
    %c1_169 = arith.constant 1 : index
    %c0_170 = arith.constant 0 : index
    %c0_171 = arith.constant 0 : index
    %435 = vector.load %arg20[%c1_169, %c0_170, %c0_171] : memref<2x1x64xf32, #tpu.memory_space<vmem>>, vector<1x1x64xf32>
    %436 = vector.shape_cast %435 : vector<1x1x64xf32> to vector<1x64xf32>
    %437 = vector.broadcast %436 : vector<1x64xf32> to vector<16x64xf32>
    %438 = arith.addf %434, %437 : vector<16x64xf32>
    %439 = vector.broadcast %254 : vector<1x64xf32> to vector<16x64xf32>
    %440 = arith.mulf %439, %438 : vector<16x64xf32>
    %441 = arith.addf %385, %440 : vector<16x64xf32>
    %c0_172 = arith.constant 0 : index
    %c0_173 = arith.constant 0 : index
    %442 = vector.load %arg21[%c0_172, %c0_173] : memref<64x128xbf16, #tpu.memory_space<vmem>>, vector<64x128xbf16>
    %443 = arith.truncf %31 : vector<1x64xf32> to vector<1x64xbf16>
    %cst_174 = arith.constant dense<0.000000e+00> : vector<1x128xf32>
    %444 = tpu.matmul %443, %442, %cst_174 {dimension_numbers = #tpu.dot_dimension_numbers<[1], [0], [0], [1], [0, 0, 1, 1], [], []>} : vector<1x64xbf16>, vector<64x128xbf16>, vector<1x128xf32> -> vector<1x128xf32>
    %c0_175 = arith.constant 0 : index
    %c0_176 = arith.constant 0 : index
    %445 = vector.load %arg22[%c0_175, %c0_176] : memref<1x128xf32, #tpu.memory_space<vmem>>, vector<1x128xf32>
    %446 = arith.addf %444, %445 : vector<1x128xf32>
    %cst_177 = arith.constant dense<0.000000e+00> : vector<16xf32>
    %447 = vector.multi_reduction <add>, %441, %cst_177 [1] : vector<16x64xf32> to vector<16xf32>
    %448 = vector.shape_cast %447 : vector<16xf32> to vector<16x1xf32>
    %cst_178 = arith.constant 6.400000e+01 : f32
    %449 = vector.broadcast %cst_178 : f32 to vector<16x1xf32>
    %450 = arith.divf %448, %449 : vector<16x1xf32>
    %451 = vector.broadcast %450 : vector<16x1xf32> to vector<16x64xf32>
    %452 = arith.subf %441, %451 : vector<16x64xf32>
    %453 = arith.mulf %452, %452 : vector<16x64xf32>
    %cst_179 = arith.constant dense<0.000000e+00> : vector<16xf32>
    %454 = vector.multi_reduction <add>, %453, %cst_179 [1] : vector<16x64xf32> to vector<16xf32>
    %455 = vector.shape_cast %454 : vector<16xf32> to vector<16x1xf32>
    %cst_180 = arith.constant 6.400000e+01 : f32
    %456 = vector.broadcast %cst_180 : f32 to vector<16x1xf32>
    %457 = arith.divf %455, %456 : vector<16x1xf32>
    %458 = vector.broadcast %450 : vector<16x1xf32> to vector<16x64xf32>
    %459 = arith.subf %441, %458 : vector<16x64xf32>
    %cst_181 = arith.constant 9.99999997E-7 : f32
    %460 = vector.broadcast %cst_181 : f32 to vector<16x1xf32>
    %461 = arith.addf %457, %460 : vector<16x1xf32>
    %462 = math.rsqrt %461 : vector<16x1xf32>
    %463 = vector.broadcast %462 : vector<16x1xf32> to vector<16x64xf32>
    %464 = arith.mulf %459, %463 : vector<16x64xf32>
    %465 = vector.extract_strided_slice %446 {offsets = [0, 64], sizes = [1, 64], strides = [1, 1]} : vector<1x128xf32> to vector<1x64xf32>
    %cst_182 = arith.constant 1.000000e+00 : f32
    %466 = vector.broadcast %cst_182 : f32 to vector<1x64xf32>
    %467 = arith.addf %466, %465 : vector<1x64xf32>
    %468 = vector.broadcast %467 : vector<1x64xf32> to vector<16x64xf32>
    %469 = arith.mulf %464, %468 : vector<16x64xf32>
    %470 = vector.extract_strided_slice %446 {offsets = [0, 0], sizes = [1, 64], strides = [1, 1]} : vector<1x128xf32> to vector<1x64xf32>
    %471 = vector.broadcast %470 : vector<1x64xf32> to vector<16x64xf32>
    %472 = arith.addf %469, %471 : vector<16x64xf32>
    %c0_183 = arith.constant 0 : index
    %c0_184 = arith.constant 0 : index
    %473 = vector.load %arg23[%c0_183, %c0_184] : memref<64x16xbf16, #tpu.memory_space<vmem>>, vector<64x16xbf16>
    %474 = arith.truncf %472 : vector<16x64xf32> to vector<16x64xbf16>
    %cst_185 = arith.constant dense<0.000000e+00> : vector<16x16xf32>
    %475 = tpu.matmul %474, %473, %cst_185 {dimension_numbers = #tpu.dot_dimension_numbers<[1], [0], [0], [1], [0, 0, 1, 1], [], []>} : vector<16x64xbf16>, vector<64x16xbf16>, vector<16x16xf32> -> vector<16x16xf32>
    %c0_186 = arith.constant 0 : index
    %c0_187 = arith.constant 0 : index
    %476 = vector.load %arg24[%c0_186, %c0_187] : memref<1x16xf32, #tpu.memory_space<vmem>>, vector<1x16xf32>
    %477 = vector.broadcast %476 : vector<1x16xf32> to vector<16x16xf32>
    %478 = arith.addf %475, %477 : vector<16x16xf32>
    %c0_188 = arith.constant 0 : index
    %c0_189 = arith.constant 0 : index
    %c0_190 = arith.constant 0 : index
    %479 = vector.load %arg25[%c0_188, %c0_189, %c0_190] : memref<1x16x16xf32, #tpu.memory_space<vmem>>, vector<1x16x16xf32>
    %480 = vector.shape_cast %479 : vector<1x16x16xf32> to vector<16x16xf32>
    %481 = vector.shape_cast %478 : vector<16x16xf32> to vector<1x16x16xf32>
    tpu.vector_store %arg25[%c0_188, %c0_189, %c0_190], %481 {strides = array<i32>} : memref<1x16x16xf32, #tpu.memory_space<vmem>>, vector<1x16x16xf32>,
    return
  }
  func.func @transform_0(%arg0: i32) -> (i32, i32, i32) {
    %c0_i32 = arith.constant 0 : i32
    %c0_i32_0 = arith.constant 0 : i32
    %c0_i32_1 = arith.constant 0 : i32
    return %arg0, %c0_i32, %c0_i32_0 : i32, i32, i32
  }
  func.func @transform_1(%arg0: i32) -> (i32, i32, i32) {
    %c0_i32 = arith.constant 0 : i32
    %c0_i32_0 = arith.constant 0 : i32
    %c0_i32_1 = arith.constant 0 : i32
    return %arg0, %c0_i32, %c0_i32_0 : i32, i32, i32
  }
  func.func @transform_2(%arg0: i32) -> (i32, i32, i32) {
    %c0_i32 = arith.constant 0 : i32
    %c0_i32_0 = arith.constant 0 : i32
    %c0_i32_1 = arith.constant 0 : i32
    return %arg0, %c0_i32, %c0_i32_0 : i32, i32, i32
  }
  func.func @transform_3(%arg0: i32) -> (i32, i32) {
    %c0_i32 = arith.constant 0 : i32
    %c0_i32_0 = arith.constant 0 : i32
    %c0_i32_1 = arith.constant 0 : i32
    return %c0_i32, %c0_i32_0 : i32, i32
  }
  func.func @transform_4(%arg0: i32) -> (i32, i32) {
    %c0_i32 = arith.constant 0 : i32
    %c0_i32_0 = arith.constant 0 : i32
    %c0_i32_1 = arith.constant 0 : i32
    return %c0_i32, %c0_i32_0 : i32, i32
  }
  func.func @transform_5(%arg0: i32) -> (i32, i32) {
    %c0_i32 = arith.constant 0 : i32
    %c0_i32_0 = arith.constant 0 : i32
    %c0_i32_1 = arith.constant 0 : i32
    return %c0_i32, %c0_i32_0 : i32, i32
  }
  func.func @transform_6(%arg0: i32) -> (i32, i32) {
    %c0_i32 = arith.constant 0 : i32
    %c0_i32_0 = arith.constant 0 : i32
    %c0_i32_1 = arith.constant 0 : i32
    return %c0_i32, %c0_i32_0 : i32, i32
  }
  func.func @transform_7(%arg0: i32) -> (i32, i32) {
    %c0_i32 = arith.constant 0 : i32
    %c0_i32_0 = arith.constant 0 : i32
    %c0_i32_1 = arith.constant 0 : i32
    return %c0_i32, %c0_i32_0 : i32, i32
  }
  func.func @transform_8(%arg0: i32) -> (i32, i32) {
    %c0_i32 = arith.constant 0 : i32
    %c0_i32_0 = arith.constant 0 : i32
    %c0_i32_1 = arith.constant 0 : i32
    return %c0_i32, %c0_i32_0 : i32, i32
  }
  func.func @transform_9(%arg0: i32) -> (i32, i32) {
    %c0_i32 = arith.constant 0 : i32
    %c0_i32_0 = arith.constant 0 : i32
    %c0_i32_1 = arith.constant 0 : i32
    return %c0_i32, %c0_i32_0 : i32, i32
  }
  func.func @transform_10(%arg0: i32) -> (i32, i32, i32) {
    %c0_i32 = arith.constant 0 : i32
    %c0_i32_0 = arith.constant 0 : i32
    %c0_i32_1 = arith.constant 0 : i32
    %c0_i32_2 = arith.constant 0 : i32
    return %c0_i32, %c0_i32_0, %c0_i32_1 : i32, i32, i32
  }
  func.func @transform_11(%arg0: i32) -> (i32, i32, i32) {
    %c0_i32 = arith.constant 0 : i32
    %c0_i32_0 = arith.constant 0 : i32
    %c0_i32_1 = arith.constant 0 : i32
    %c0_i32_2 = arith.constant 0 : i32
    return %c0_i32, %c0_i32_0, %c0_i32_1 : i32, i32, i32
  }
  func.func @transform_12(%arg0: i32) -> (i32, i32, i32) {
    %c0_i32 = arith.constant 0 : i32
    %c0_i32_0 = arith.constant 0 : i32
    %c0_i32_1 = arith.constant 0 : i32
    %c0_i32_2 = arith.constant 0 : i32
    return %c0_i32, %c0_i32_0, %c0_i32_1 : i32, i32, i32
  }
  func.func @transform_13(%arg0: i32) -> (i32, i32, i32) {
    %c0_i32 = arith.constant 0 : i32
    %c0_i32_0 = arith.constant 0 : i32
    %c0_i32_1 = arith.constant 0 : i32
    %c0_i32_2 = arith.constant 0 : i32
    return %c0_i32, %c0_i32_0, %c0_i32_1 : i32, i32, i32
  }
  func.func @transform_14(%arg0: i32) -> (i32, i32, i32) {
    %c0_i32 = arith.constant 0 : i32
    %c0_i32_0 = arith.constant 0 : i32
    %c0_i32_1 = arith.constant 0 : i32
    %c0_i32_2 = arith.constant 0 : i32
    return %c0_i32, %c0_i32_0, %c0_i32_1 : i32, i32, i32
  }
  func.func @transform_15(%arg0: i32) -> (i32, i32, i32) {
    %c0_i32 = arith.constant 0 : i32
    %c0_i32_0 = arith.constant 0 : i32
    %c0_i32_1 = arith.constant 0 : i32
    %c0_i32_2 = arith.constant 0 : i32
    return %c0_i32, %c0_i32_0, %c0_i32_1 : i32, i32, i32
  }
  func.func @transform_16(%arg0: i32) -> (i32, i32, i32) {
    %c0_i32 = arith.constant 0 : i32
    %c0_i32_0 = arith.constant 0 : i32
    %c0_i32_1 = arith.constant 0 : i32
    %c0_i32_2 = arith.constant 0 : i32
    return %c0_i32, %c0_i32_0, %c0_i32_1 : i32, i32, i32
  }
  func.func @transform_17(%arg0: i32) -> (i32, i32, i32) {
    %c0_i32 = arith.constant 0 : i32
    %c0_i32_0 = arith.constant 0 : i32
    %c0_i32_1 = arith.constant 0 : i32
    %c0_i32_2 = arith.constant 0 : i32
    return %c0_i32, %c0_i32_0, %c0_i32_1 : i32, i32, i32
  }
  func.func @transform_18(%arg0: i32) -> (i32, i32, i32) {
    %c0_i32 = arith.constant 0 : i32
    %c0_i32_0 = arith.constant 0 : i32
    %c0_i32_1 = arith.constant 0 : i32
    %c0_i32_2 = arith.constant 0 : i32
    return %c0_i32, %c0_i32_0, %c0_i32_1 : i32, i32, i32
  }
  func.func @transform_19(%arg0: i32) -> (i32, i32, i32) {
    %c0_i32 = arith.constant 0 : i32
    %c0_i32_0 = arith.constant 0 : i32
    %c0_i32_1 = arith.constant 0 : i32
    %c0_i32_2 = arith.constant 0 : i32
    return %c0_i32, %c0_i32_0, %c0_i32_1 : i32, i32, i32
  }
  func.func @transform_20(%arg0: i32) -> (i32, i32) {
    %c0_i32 = arith.constant 0 : i32
    %c0_i32_0 = arith.constant 0 : i32
    %c0_i32_1 = arith.constant 0 : i32
    return %c0_i32, %c0_i32_0 : i32, i32
  }
  func.func @transform_21(%arg0: i32) -> (i32, i32) {
    %c0_i32 = arith.constant 0 : i32
    %c0_i32_0 = arith.constant 0 : i32
    %c0_i32_1 = arith.constant 0 : i32
    return %c0_i32, %c0_i32_0 : i32, i32
  }
  func.func @transform_22(%arg0: i32) -> (i32, i32) {
    %c0_i32 = arith.constant 0 : i32
    %c0_i32_0 = arith.constant 0 : i32
    %c0_i32_1 = arith.constant 0 : i32
    return %c0_i32, %c0_i32_0 : i32, i32
  }
  func.func @transform_23(%arg0: i32) -> (i32, i32) {
    %c0_i32 = arith.constant 0 : i32
    %c0_i32_0 = arith.constant 0 : i32
    %c0_i32_1 = arith.constant 0 : i32
    return %c0_i32, %c0_i32_0 : i32, i32
  }
  func.func @transform_24(%arg0: i32) -> (i32, i32, i32) {
    %c0_i32 = arith.constant 0 : i32
    %c0_i32_0 = arith.constant 0 : i32
    %c0_i32_1 = arith.constant 0 : i32
    return %arg0, %c0_i32, %c0_i32_0 : i32, i32, i32
  }
}

</mosaic_0001>

<bundles_post_ra>
// kernel: dit1d_flow_decoder_forward.1
= control target key start
LH: loop header
LB: loop body
LE: loop exit
PB: predicated region body
PF: predicated region fallthrough
CT: control target
= control target key end

     0   :  { %s7060_s0 = inlined_call_operand.vmem [shape: f32[2,16,16], index: 0, kind: input, shape index: {}]   ;;  %s7061_s1 = inlined_call_operand.vmem [shape: f32[2,16,32], index: 1, kind: input, shape index: {}]   ;;  %s7062_s2 = inlined_call_operand.vmem [shape: f32[2,1,256], index: 2, kind: input, shape index: {}]   ;;  %s7063_s3 = inlined_call_operand.vmem [shape: bf16[256,64], index: 3, kind: input, shape index: {}]   ;;  %s7064_s4 = inlined_call_operand.hbm [shape: f32[1,64], index: 4, kind: input, shape index: {}]   ;;  %s7065_s5 = inlined_call_operand.hbm [shape: bf16[64,64], index: 5, kind: input, shape index: {}]   ;;  %s7066_s6 = inlined_call_operand.vmem [shape: f32[1,64], index: 6, kind: input, shape index: {}]   ;;  %s7067_s7 = inlined_call_operand.vmem [shape: bf16[16,64], index: 7, kind: input, shape index: {}]   ;;  %s7068_s8 = inlined_call_operand.hbm [shape: bf16[32,64], index: 8, kind: input, shape index: {}]   ;;  %s7069_s9 = inlined_call_operand.hbm [shape: f32[1,64], index: 9, kind: input, shape index: {}]   ;;  %s7070_s10 = inlined_call_operand.vmem [shape: bf16[2,64,384], index: 10, kind: input, shape index: {}]   ;;  %s7071_s11 = inlined_call_operand.hbm [shape: f32[2,1,384], index: 11, kind: input, shape index: {}]   ;;  %s7072_s12 = inlined_call_operand.vmem [shape: bf16[2,64,192], index: 12, kind: input, shape index: {}]   ;;  %s7073_s13 = inlined_call_operand.hbm [shape: f32[2,1,192], index: 13, kind: input, shape index: {}]   ;;  %s7074_s14 = inlined_call_operand.vmem [shape: bf16[2,64,64], index: 14, kind: input, shape index: {}]   ;;  %s7075_s15 = inlined_call_operand.hbm [shape: f32[2,1,64], index: 15, kind: input, shape index: {}]   ;;  %s7076_s16 = inlined_call_operand.vmem [shape: bf16[2,64,256], index: 16, kind: input, shape index: {}]   ;;  %s7077_s17 = inlined_call_operand.hbm [shape: f32[2,1,256], index: 17, kind: input, shape index: {}]   ;;  %s7078_s18 = inlined_call_operand.vmem [shape: bf16[2,256,64], index: 18, kind: input, shape index: {}]   ;;  %s7079_s19 = inlined_call_operand.hbm [shape: f32[2,1,64], index: 19, kind: input, shape index: {}]   ;;  %s7080_s20 = inlined_call_operand.hbm [shape: bf16[64,128], index: 20, kind: input, shape index: {}]   ;;  %s7081_s21 = inlined_call_operand.hbm [shape: f32[1,128], index: 21, kind: input, shape index: {}]   ;;  %s7082_s22 = inlined_call_operand.vmem [shape: bf16[64,16], index: 22, kind: input, shape index: {}]   ;;  %s7083_s23 = inlined_call_operand.hbm [shape: f32[1,16], index: 23, kind: input, shape index: {}]   ;;  %s7084_s24 = inlined_call_operand.hbm [shape: f32[2,16,16], index: 24, kind: output, shape index: {}]  }
   0x1   :  { %7107 = sst [smem:[#allocation39_spill]] %s7060_s0 }
   0x2   :  { %7108 = sst [smem:[#allocation40_spill]] %s7061_s1 }
   0x3   :  { %7109 = sst [smem:[#allocation41_spill]] %s7062_s2 }
   0x4   :  { %7110 = sst [smem:[#allocation42_spill]] %s7063_s3 }
   0x5   :  { %7111 = sst [smem:[#allocation43_spill]] %s7064_s4 }
   0x6   :  { %7112 = sst [smem:[#allocation44_spill]] %s7065_s5 }
   0x7   :  { %7113 = sst [smem:[#allocation45_spill]] %s7066_s6 }
   0x8   :  { %7114 = sst [smem:[#allocation46_spill]] %s7067_s7 }
   0x9   :  { %7115 = sst [smem:[#allocation47_spill]] %s7068_s8 }
   0xa   :  { %7116 = sst [smem:[#allocation48_spill]] %s7084_s24 }
   0xb   :  { %29 = vsyncpa [#allocation3], 0 }
   0xc   :  { %30 = vsyncpa [#allocation6], 0 }
   0xd   :  { %31 = vsyncpa [#allocation9], 0 }
   0xe   :  { %32 = vsyncpa [#allocation12], 0 }
   0xf   :  { %33 = vsyncpa [#allocation15], 0 }
  0x10   :  { %34 = vsyncpa [#allocation18], 0 }
  0x11   :  { %35 = vsyncpa [#allocation21], 0 }
  0x12   :  { %36 = vsyncpa [#allocation4], 0 }
  0x13   :  { %38 = vsyncpa [#allocation4 + $0x1], 0  ;;  %s6069_s5 = smov 0   ;;  %s6071_s26 = smov 0  }
  0x14   :  { %s6073_s27 = smov 0   ;;  %s6075_s28 = smov 0  }
  0x15 LB: > { %7117 = sst [smem:[#allocation31_spill]] %s5897_s5  ;;  %s6090_s6 = sadd.s32 4294967295, %s5909_s28   ;;  %s5909_s28 = sphi %s6075_s28, %s7166_s28   ;;  %s5905_s27 = sphi %s6073_s27, %s7169_s27   ;;  %s5901_s26 = sphi %s6071_s26, %s7168_s26   ;;  %s5897_s5 = sphi %s6069_s5, %s7167_s5  }
  0x16   : > { %7118 = sst [smem:[#allocation32_spill]] %s5901_s26  ;;  %s4430_s2 = sadd.s32 4294967294, %s5909_s28  }
  0x17   : > { %7119 = sst [smem:[#allocation33_spill]] %s5905_s27  ;;  %s6094_s29 = sadd.s32 1, %s5909_s28  }
  0x18   : > { %7120 = sst [smem:[#allocation34_spill]] %s5909_s28  ;;  %s570_s0 = sadd.s32 1, %s5905_s27 }
  0x19   : > { %7121 = sst [smem:[#allocation35_spill]] %s6094_s29  ;;  %s567_s7 = ssub.s32 %s5909_s28, %s6094_s29 }
  0x1a   : > { %p580_p0 = scmp.ne.s32.totalorder %s5905_s27, %s5901_s26  ;;  %p568_p1 = scmp.eq.s32.totalorder %s567_s7, 0 }
  0x1b   : > { %p581_p2 = scmp.eq.s32.totalorder %s6090_s6, 1  ;;  %p586_p3 = scmp.ne.s32.totalorder %s5901_s26, %s5897_s5 }
  0x1c   : > { %p587_p4 = scmp.eq.s32.totalorder %s4430_s2, 1  ;;  %p4431_p7 = scmp.ge.s32.totalorder %s5909_s28, 1 }
  0x1d   : > { %s6105_s30 = scalar_select %p568_p1, %s5905_s27, %s570_s0  }
  0x1e   : > { %p6107_p5 = por %p581_p2, %p580_p0  ;;  %p6111_p6 = por %p587_p4, %p586_p3 }
  0x1f   : > { %7122 = sst [smem:[#allocation36_spill]] %s6105_s30  ;;  %p594_p8 = scmp.lt.s32.totalorder %s5909_s28, 3 }
  0x20   : > { %s7123_s3 = scalar_select %p6107_p5, 1, 0 }
  0x21   : > { %s7125_s25 = scalar_select %p6111_p6, 1, 0 }
  0x22   : > { %7124 = sst [smem:[#allocation37_spill]] %s7123_s3  ;;  %p7096_p9 = scmp.eq.s32.totalorder %s6090_s6, 0 }
  0x23   : > { %7126 = sst [smem:[#allocation38_spill]] %s7125_s25  ;;  %p6118_p10 = pnand %p4431_p7, %p594_p8 }
  0x24   : > { %s5911_s4 = smov [#allocation5]   ;;  %s5912_s0 = smov [#allocation8]  }
  0x25   : > { %s7127_s8 = scalar_select %p6118_p10, 1, 0 }
  0x26   : > { %s620_s1 = sshll.u32 %s5911_s4, 4  ;;  %p5090_p11 = pneg %p6118_p10  ;;  %s621_s1 = int_to_ptr.vmem [resolvable:$true] %s620_s1 }
  0x27   : > { %s653_s7 = sshll.u32 %s5912_s0, 4  ;;  %s5913_s30 = smov [#allocation11]   ;;  %s654_s7 = int_to_ptr.vmem [resolvable:$true] %s653_s7 }
  0x28   : > { %p6126_p12 = pnand %p7096_p9, %p5090_p11  ;;  %s682_s27 = sshll.u32 %s5913_s30, 4  ;;  %s683_s27 = int_to_ptr.vmem [resolvable:$true] %s682_s27 }
  0x29   : > { %s5520_s4 = scalar_lea.vmem %s621_s1, 512  ;;  %p5528_p3 = scmp.lt.s32.totalorder %s621_s1, %s621_s1 }
  0x2a   : > { %p6132_p13 = pneg %p6126_p12  ;;  %p5521_p0 = scmp.ne.s32.totalorder %s621_s1, %s5520_s4 }
  0x2b   : > { %p5529_p4 = scmp.lt.s32.totalorder %s5520_s4, %s5520_s4 }
  0x2c   : > { %p5523_p1 = pnand %p5521_p0, %p6132_p13 }
  0x2d   : > { %p5530_p7 = por %p5529_p4, %p5528_p3 }
  0x2e   : > { %p5524_p2 = pneg %p5523_p1 }
  0x30   : > { %p5531_p8 = pnand %p5530_p7, %p5524_p2 }
  0x32   : > { %5534 = shalt.err (!%p5531_p8)
}
  0x33   : > { %s7099_s0 = smov 64   ;;  %s5915_s30 = smov 4  }
  0x34   : > { %s7130_s28 = sld [smem:[#allocation44_spill]]  ;;  %s5546_s24 = scalar_lea.vmem %s654_s7, 16 }
  0x35   : > { %p5547_p11 = scmp.ne.s32.totalorder %s654_s7, %s5546_s24  ;;  %s5553_s4 = scalar_lea.vmem %s654_s7, 32 }
  0x36   : > { %p5554_p2 = scmp.lt.s32.totalorder %s654_s7, %s654_s7  ;;  %p5555_p3 = scmp.lt.s32.totalorder %s5553_s4, %s5546_s24 }
  0x37   : > { %p5549_p0 = pnand %p5547_p11, %p6132_p13 }
  0x38   : > { %p5556_p4 = por %p5555_p3, %p5554_p2 }
  0x39   : > { %p5550_p1 = pneg %p5549_p0 }
  0x3a   : > { %5096 = dma.hbm_to_vmem [thread:$0]  (!%p6126_p12), %s7130_s28, 512, %s621_s1, [#allocation6], %s7099_s0, %s7099_s0, %s5915_s30  }
  0x3b   : > { %p5557_p7 = pnand %p5556_p4, %p5550_p1 }
  0x3d   : > { %5560 = shalt.err (!%p5557_p7)
}
  0x3e   : > { %5102 = dma.hbm_to_vmem [thread:$0]  (!%p6126_p12), %s7069_s9, 16, %s654_s7, [#allocation9]  }
  0x3f   : > { %s5572_s5 = scalar_lea.vmem %s683_s27, 64  ;;  %p5580_p0 = scmp.lt.s32.totalorder %s683_s27, %s683_s27 }
  0x40   : > { %p5573_p8 = scmp.ne.s32.totalorder %s683_s27, %s5572_s5  ;;  %p5581_p6 = scmp.lt.s32.totalorder %s5572_s5, %s5572_s5 }
  0x42   : > { %p5575_p9 = pnand %p5573_p8, %p6132_p13  ;;  %p5582_p5 = por %p5581_p6, %p5580_p0 }
  0x44   : > { %p5576_p11 = pneg %p5575_p9 }
  0x46   : > { %p5583_p10 = pnand %p5582_p5, %p5576_p11 }
  0x48   : > { %5586 = shalt.err (!%p5583_p10)
}
  0x49   : > { %s5916_s24 = smov 32   ;;  %s5917_s28 = smov 2  }
  0x4a   : > { %5108 = dma.hbm_to_vmem [thread:$0]  (!%p6126_p12), %s7073_s13, 64, %s683_s27, [#allocation12], %s5916_s24, %s5916_s24, %s5917_s28  }
  0x4b   : > { %s5918_s3 = smov [#allocation14]   ;;  %s5919_s7 = smov [#allocation17]  }
  0x4c   : > { %s714_s1 = sshll.u32 %s5918_s3, 4  ;;  %s743_s4 = sshll.u32 %s5919_s7, 4  ;;  %s715_s1 = int_to_ptr.vmem [resolvable:$true] %s714_s1  ;;  %s744_s4 = int_to_ptr.vmem [resolvable:$true] %s743_s4 }
  0x4d   : > { %s5598_s0 = scalar_lea.vmem %s715_s1, 64  ;;  %p5606_p10 = scmp.lt.s32.totalorder %s715_s1, %s715_s1 }
  0x4e   : > { %p5599_p9 = scmp.ne.s32.totalorder %s715_s1, %s5598_s0  ;;  %p5607_p1 = scmp.lt.s32.totalorder %s5598_s0, %s5598_s0 }
  0x50   : > { %p5601_p6 = pnand %p5599_p9, %p6132_p13  ;;  %p5608_p2 = por %p5607_p1, %p5606_p10 }
  0x52   : > { %p5602_p5 = pneg %p5601_p6 }
  0x54   : > { %p5609_p3 = pnand %p5608_p2, %p5602_p5 }
  0x56   : > { %5612 = shalt.err (!%p5609_p3)
}
  0x57   : > { %5114 = dma.hbm_to_vmem [thread:$0]  (!%p6126_p12), %s7077_s17, 64, %s715_s1, [#allocation15], %s5916_s24, %s5916_s24, %s5917_s28  }
  0x58   : > { %s5624_s27 = scalar_lea.vmem %s744_s4, 512  ;;  %p5632_p11 = scmp.lt.s32.totalorder %s744_s4, %s744_s4 }
  0x59   : > { %p5625_p4 = scmp.ne.s32.totalorder %s744_s4, %s5624_s27  ;;  %p5633_p0 = scmp.lt.s32.totalorder %s5624_s27, %s5624_s27 }
  0x5b   : > { %p5627_p7 = pnand %p5625_p4, %p6132_p13  ;;  %p5634_p9 = por %p5633_p0, %p5632_p11 }
  0x5d   : > { %p5628_p8 = pneg %p5627_p7 }
  0x5f   : > { %p5635_p6 = pnand %p5634_p9, %p5628_p8 }
  0x61   : > { %5638 = shalt.err (!%p5635_p6)
}
  0x62   : > { %s7131_s0 = smov 64   ;;  %s5920_s24 = smov [#allocation2]  }
  0x63   : > { %5120 = dma.hbm_to_vmem [thread:$0]  (!%p6126_p12), %s7080_s20, 512, %s744_s4, [#allocation18], %s7131_s0, %s7131_s0, %s5915_s30  }
  0x64   : > { %s610_s28 = sshll.u32 %s5920_s24, 4  ;;  %s5921_s1 = smov [#allocation7]   ;;  %s611_s28 = int_to_ptr.vmem [resolvable:$true] %s610_s28 }
  0x65   : > { %s639_s7 = sshll.u32 %s5921_s1, 4  ;;  %s5650_s5 = scalar_lea.vmem %s611_s28, 16  ;;  %s640_s7 = int_to_ptr.vmem [resolvable:$true] %s639_s7 }
  0x66   : > { %p5651_p5 = scmp.ne.s32.totalorder %s611_s28, %s5650_s5  ;;  %s5657_s25 = scalar_lea.vmem %s611_s28, 32 }
  0x67   : > { %p5658_p2 = scmp.lt.s32.totalorder %s611_s28, %s611_s28  ;;  %p5659_p3 = scmp.lt.s32.totalorder %s5657_s25, %s5650_s5 }
  0x68   : > { %p5653_p10 = pnand %p5651_p5, %p6132_p13 }
  0x69   : > { %p5660_p4 = por %p5659_p3, %p5658_p2 }
  0x6a   : > { %p5654_p1 = pneg %p5653_p10 }
  0x6c   : > { %p5661_p7 = pnand %p5660_p4, %p5654_p1 }
  0x6e   : > { %5664 = shalt.err (!%p5661_p7)
}
  0x6f   : > { %s7132_s26 = sld [smem:[#allocation43_spill]]  ;;  %s5676_s3 = scalar_lea.vmem %s640_s7, 256 }
  0x70   : > { %p5677_p8 = scmp.ne.s32.totalorder %s640_s7, %s5676_s3  ;;  %p5684_p9 = scmp.lt.s32.totalorder %s640_s7, %s640_s7 }
  0x71   : > { %p5685_p6 = scmp.lt.s32.totalorder %s5676_s3, %s5676_s3 }
  0x72   : > { %p5679_p11 = pnand %p5677_p8, %p6132_p13 }
  0x73   : > { %p5686_p5 = por %p5685_p6, %p5684_p9 }
  0x74   : > { %p5680_p0 = pneg %p5679_p11 }
  0x75   : > { %5093 = dma.hbm_to_vmem [thread:$0]  (!%p6126_p12), %s7132_s26, 16, %s611_s28, [#allocation3]  }
  0x76   : > { %p5687_p10 = pnand %p5686_p5, %p5680_p0 }
  0x78   : > { %5690 = shalt.err (!%p5687_p10)
}
  0x79   : > { %s7133_s5 = sld [smem:[#allocation47_spill]]  ;;  %s5922_s28 = smov [#allocation10]  }
  0x7a   : > { %s666_s25 = sshll.u32 %s5922_s28, 4  ;;  %s667_s25 = int_to_ptr.vmem [resolvable:$true] %s666_s25 }
  0x7b   : > { %s5702_s27 = scalar_lea.vmem %s667_s25, 96  ;;  %p5710_p4 = scmp.lt.s32.totalorder %s667_s25, %s667_s25 }
  0x7c   : > { %p5703_p1 = scmp.ne.s32.totalorder %s667_s25, %s5702_s27  ;;  %p5711_p7 = scmp.lt.s32.totalorder %s5702_s27, %s5702_s27 }
  0x7e   : > { %p5705_p2 = pnand %p5703_p1, %p6132_p13  ;;  %p5712_p8 = por %p5711_p7, %p5710_p4 }
  0x7f   : > { %5099 = dma.hbm_to_vmem [thread:$0]  (!%p6126_p12), %s7133_s5, 256, %s640_s7, [#allocation6], %s7131_s0, %s7131_s0, %s5915_s30  }
  0x80   : > { %p5706_p3 = pneg %p5705_p2 }
  0x82   : > { %p5713_p11 = pnand %p5712_p8, %p5706_p3 }
  0x84   : > { %5716 = shalt.err (!%p5713_p11)
}
  0x85   : > { %s5923_s4 = smov 48   ;;  %s5924_s26 = smov 3  }
  0x86   : > { %5105 = dma.hbm_to_vmem [thread:$0]  (!%p6126_p12), %s7071_s11, 96, %s667_s25, [#allocation9], %s5923_s4, %s5923_s4, %s5924_s26  }
  0x87   : > { %s5925_s0 = smov [#allocation13]  }
  0x88   : > { %s698_s7 = sshll.u32 %s5925_s0, 4  ;;  %s699_s7 = int_to_ptr.vmem [resolvable:$true] %s698_s7 }
  0x89   : > { %s5728_s24 = scalar_lea.vmem %s699_s7, 32  ;;  %p5736_p5 = scmp.lt.s32.totalorder %s699_s7, %s699_s7 }
  0x8a   : > { %p5729_p0 = scmp.ne.s32.totalorder %s699_s7, %s5728_s24  ;;  %p5737_p10 = scmp.lt.s32.totalorder %s5728_s24, %s5728_s24 }
  0x8c   : > { %p5731_p9 = pnand %p5729_p0, %p6132_p13  ;;  %p5738_p1 = por %p5737_p10, %p5736_p5 }
  0x8e   : > { %p5732_p6 = pneg %p5731_p9 }
  0x90   : > { %p5739_p2 = pnand %p5738_p1, %p5732_p6 }
  0x92   : > { %5742 = shalt.err (!%p5739_p2)
}
  0x93   : > { %s5926_s1 = smov 16   ;;  %s5927_s5 = smov 1  }
  0x94   : > { %5111 = dma.hbm_to_vmem [thread:$0]  (!%p6126_p12), %s7075_s15, 32, %s699_s7, [#allocation12], %s5926_s1, %s5926_s1, %s5927_s5  }
  0x95   : > { %s5928_s27 = smov [#allocation16]   ;;  %s5929_s26 = smov [#allocation19]  }
  0x96   : > { %s730_s4 = sshll.u32 %s5928_s27, 4  ;;  %s757_s3 = sshll.u32 %s5929_s26, 4  ;;  %s731_s4 = int_to_ptr.vmem [resolvable:$true] %s730_s4  ;;  %s758_s3 = int_to_ptr.vmem [resolvable:$true] %s757_s3 }
  0x97   : > { %s5754_s30 = scalar_lea.vmem %s731_s4, 32  ;;  %p5762_p8 = scmp.lt.s32.totalorder %s731_s4, %s731_s4 }
  0x98   : > { %p5755_p3 = scmp.ne.s32.totalorder %s731_s4, %s5754_s30  ;;  %p5763_p11 = scmp.lt.s32.totalorder %s5754_s30, %s5754_s30 }
  0x9a   : > { %p5757_p4 = pnand %p5755_p3, %p6132_p13  ;;  %p5764_p0 = por %p5763_p11, %p5762_p8 }
  0x9c   : > { %p5758_p7 = pneg %p5757_p4 }
  0x9e   : > { %p5765_p9 = pnand %p5764_p0, %p5758_p7 }
  0xa0   : > { %5768 = shalt.err (!%p5765_p9)
}
  0xa1   : > { %5117 = dma.hbm_to_vmem [thread:$0]  (!%p6126_p12), %s7079_s19, 32, %s731_s4, [#allocation15], %s5926_s1, %s5926_s1, %s5927_s5  }
  0xa2   : > { %s5780_s7 = scalar_lea.vmem %s758_s3, 16  ;;  %s5787_s28 = scalar_lea.vmem %s758_s3, 32 }
  0xa3   : > { %p5781_p6 = scmp.ne.s32.totalorder %s758_s3, %s5780_s7  ;;  %p5788_p1 = scmp.lt.s32.totalorder %s758_s3, %s758_s3 }
  0xa4   : > { %p5789_p2 = scmp.lt.s32.totalorder %s5787_s28, %s5780_s7 }
  0xa5   : > { %p5783_p5 = pnand %p5781_p6, %p6132_p13 }
  0xa6   : > { %p5790_p3 = por %p5789_p2, %p5788_p1 }
  0xa7   : > { %p5784_p10 = pneg %p5783_p5 }
  0xa9   : > { %p5791_p4 = pnand %p5790_p3, %p5784_p10 }
  0xab   : > { %5794 = shalt.err (!%p5791_p4)
}
  0xac   : > { %5123 = dma.hbm_to_vmem [thread:$0]  (!%p6126_p12), %s7081_s21, 16, %s758_s3, [#allocation18]  }
  0xad   : > { %s5930_s1 = smov [#allocation20]  }
  0xae   : > { %s771_s5 = sshll.u32 %s5930_s1, 4  ;;  %s772_s5 = int_to_ptr.vmem [resolvable:$true] %s771_s5 }
  0xaf   : > { %s5806_s4 = scalar_lea.vmem %s772_s5, 16  ;;  %s5813_s26 = scalar_lea.vmem %s772_s5, 32 }
  0xb0   : > { %p5807_p7 = scmp.ne.s32.totalorder %s772_s5, %s5806_s4  ;;  %p5814_p0 = scmp.lt.s32.totalorder %s772_s5, %s772_s5 }
  0xb1   : > { %p5815_p9 = scmp.lt.s32.totalorder %s5813_s26, %s5806_s4 }
  0xb2   : > { %p5809_p8 = pnand %p5807_p7, %p6132_p13 }
  0xb3   : > { %p5816_p6 = por %p5815_p9, %p5814_p0 }
  0xb4   : > { %p5810_p11 = pneg %p5809_p8 }
  0xb6   : > { %p5817_p5 = pnand %p5816_p6, %p5810_p11 }
  0xb8   : > { %5820 = shalt.err (!%p5817_p5)
}
  0xb9   : > { %5126 = dma.hbm_to_vmem [thread:$0]  (!%p6126_p12), %s7083_s23, 16, %s772_s5, [#allocation21]  }
  0xba   : > { %p7134_p10 = scmp.ne.s32.totalorder %s7127_s8, 0 }
  0xbb   : > { %p7135_p1 = scmp.eq.s32.totalorder (!%p7134_p10), %s6090_s6, 0 }
  0xbc   : > { %807 = sbr.rel (%p7134_p10) target bundleno = 6681 (0x1a19), region = 116 }
  0xc1   : > { %5864 = dma.done.wait (%p7135_p1), [#allocation3], 16   ;;  %p7136_p13 = pmov %p7135_p1 }
  0xc2   : > { %p7137_p2 = pmov %p7135_p1 }
  0xc3   : > { %5866 = vsyncadd (%p7136_p13), [#allocation3], 4294967280 }
  0xc4   : > { %5868 = dma.done.wait (%p7137_p2), [#allocation6], 768   ;;  %p7138_p3 = pmov %p7135_p1 }
  0xc5   : > { %p7139_p4 = pmov %p7135_p1 }
  0xc6   : > { %5870 = vsyncadd (%p7138_p3), [#allocation6], 4294966528 }
  0xc7   : > { %5872 = dma.done.wait (%p7139_p4), [#allocation9], 112   ;;  %p7140_p12 = pmov %p7135_p1 }
  0xc8   : > { %p7141_p7 = pmov %p7135_p1 }
  0xc9   : > { %5874 = vsyncadd (%p7140_p12), [#allocation9], 4294967184 }
  0xca   : > { %5876 = dma.done.wait (%p7141_p7), [#allocation12], 96   ;;  %p7142_p8 = pmov %p7135_p1 }
  0xcb   : > { %p7143_p11 = pmov %p7135_p1 }
  0xcc   : > { %5878 = vsyncadd (%p7142_p8), [#allocation12], 4294967200 }
  0xcd   : > { %5880 = dma.done.wait (%p7143_p11), [#allocation15], 96   ;;  %p7144_p0 = pmov %p7135_p1 }
  0xcf   : > { %5882 = vsyncadd (%p7144_p0), [#allocation15], 4294967200  ;;  %p7145_p9 = pmov %p7144_p0 }
  0xd0   : > { %p7146_p6 = pmov %p7144_p0 }
  0xd1   : > { %5884 = dma.done.wait (%p7145_p9), [#allocation18], 528  }
  0xd2   : > { %5886 = vsyncadd (%p7146_p6), [#allocation18], 4294966768  ;;  %p7147_p5 = pmov %p7144_p0 }
  0xd3   : > { %p7148_p10 = pmov %p7144_p0 }
  0xd4   : > { %5888 = dma.done.wait (%p7147_p5), [#allocation21], 16  }
  0xd5   : > { %5890 = vsyncadd (%p7148_p10), [#allocation21], 4294967280  ;;  %s7149_s2 = sld [smem:[#allocation42_spill]]  ;;  %p926_p1 = scmp.lt.s32.totalorder %s6090_s6, 1  ;;  %v979_v5 = vlaneseq  ;;  %v5266_v25 = vld [vmem:[#allocation5 + $0x18] sm:$0xff]   ;;  %v5931_v26 = vmov 0.0  }
  0xd6   : > { %s7150_s1 = sld [smem:[#allocation41_spill]]  ;;  %4846 = vmatprep.subr.bf16.mxu1 %v5931_v26  ;;  %v5267_v27 = vld [vmem:[#allocation5 + $0x10] sm:$0xff]   ;;  %v5268_v28 = vld [vmem:[#allocation5 + $0x8] sm:$0xff]   ;;  %v5269_v29 = vld [vmem:[#allocation5] sm:$0xff]   ;;  %vm5932_vm0 = vmmov 0   ;;  %vm1169_vm1 = vcmask 523264  }
  0xd7   : > { %s6279_s30 = scalar_select %p926_p1, %s6090_s6, 1  ;;  %v6284_v8 = vshrl.u32 %v979_v5, 7  ;;  %4847 = vmatpush3.bf16.msra.mxu1 %v5266_v25  ;;  %4854 = vmatprep.mubr.msk.bf16.mxu1 %vm5932_vm0, %v5931_v26  ;;  %v991_v31 = vld [vmem:[#allocation2] sm:$0x1]  ;;  %v5270_v43 = vld [vmem:[#allocation7 + $0x8] sm:$0xff]   ;;  %v5271_v47 = vld [vmem:[#allocation7] sm:$0xff]  }
  0xd8   : > { %4848 = vmatprep.subr.bf16.mxu1 %v5931_v26  ;;  %s7151_s8 = sld [smem:[#allocation40_spill]]  ;;  %vm1240_vm2 = vcmask 261120   ;;  %vm1291_vm3 = vcmask 130048   ;;  %v5275_v53 = vld [vmem:[%s7070_s10 + $0x4c] ss:$12 sps:$4 sm:$0xff]   ;;  %s5934_s4 = smov 64  }
  0xd9   : > { %s4463_s24 = sshll.u32 %s6279_s30, 1  ;;  %v6297_v11 = vsub.s32 1, %v6284_v8  ;;  %v6319_v21 = vsub.s32 0, %v6284_v8  ;;  %s4705_s26 = sshll.u32 %s6279_s30, 4  ;;  %v5273_v54 = vld [vmem:[%s7070_s10 + $0x48] ss:$12 sps:$4 sm:$0xff]  }
  0xda   : > { %s7153_s27 = sld [smem:[#allocation39_spill]]  ;;  %v5276_v55 = vld [vmem:[%s7070_s10 + $0x50] ss:$12 sps:$4 sm:$0xff]   ;;  %v5279_v56 = vld [vmem:[%s7070_s10 + $0x34] ss:$12 sps:$4 sm:$0xff]   ;;  %s7101_s0 = smov 16  }
  0xdb   : > { %v5250_v0 = vld [vmem:[%s7149_s2 + $0x78] sm:$0xff]   ;;  %v5252_v2 = vld [vmem:[%s7149_s2 + $0x70] sm:$0xff]   ;;  %v5254_v4 = vld [vmem:[%s7149_s2 + $0x68] sm:$0xff]   ;;  %4849 = vmatpush3.bf16.msra.mxu1 %v5267_v27  ;;  %s5937_s29 = smov 48   ;;  %s7103_s30 = smov 80   ;;  %vm2197_vm4 = vcmask 392192  }
  0xdc   : > { %v5251_v1 = vld [vmem:[%s7149_s2 + $0x38] sm:$0xff]   ;;  %4708 = vmatprep.subr.bf16.mxu0 %v5250_v0  ;;  %v5253_v3 = vld [vmem:[%s7149_s2 + $0x30] sm:$0xff]   ;;  %v5255_v6 = vld [vmem:[%s7149_s2 + $0x28] sm:$0xff]   ;;  %s939_s5 = scalar_lea.vmem %s7150_s1, %s4463_s24  ;;  %4850 = vmatprep.subr.bf16.mxu1 %v5931_v26  ;;  %s7152_s24 = sld [smem:[#allocation46_spill]] }
  0xdd   : > { %4709 = vmatpush3.bf16.msra.mxu0 %v5251_v1  ;;  %v5256_v7 = vld [vmem:[%s7149_s2 + $0x60] sm:$0xff]   ;;  %v5258_v10 = vld [vmem:[%s7149_s2 + $0x58] sm:$0xff]   ;;  %v5260_v13 = vld [vmem:[%s7149_s2 + $0x50] sm:$0xff]   ;;  %v5933_v1 = vmov 0  }
  0xde   : > { %4710 = vmatprep.subr.bf16.mxu0 %v5252_v2  ;;  %v5257_v9 = vld [vmem:[%s7149_s2 + $0x20] sm:$0xff]   ;;  %v5259_v12 = vld [vmem:[%s7149_s2 + $0x18] sm:$0xff]   ;;  %v5261_v14 = vld [vmem:[%s7149_s2 + $0x10] sm:$0xff]   ;;  %s935_s3 = scalar_lea.vmem %s7151_s8, %s4705_s26  ;;  %s5938_s8 = smov 112  }
  0xdf   : > { %v945_v15 = vld [vmem:[%s939_s5] sm:$0x3]  ;;  %v5262_v16 = vld [vmem:[%s7149_s2 + $0x48] sm:$0xff]   ;;  %4851 = vmatpush3.bf16.msra.mxu1 %v5268_v28  ;;  %v5277_v57 = vld [vmem:[%s7070_s10 + $0x30] ss:$12 sps:$4 sm:$0xff]  }
  0xe0   : > { %v986_v17 = vrot.slane %v945_v15, %v6297_v11  ;;  %v5263_v19 = vld [vmem:[%s7149_s2 + $0x8] sm:$0xff]   ;;  %v5264_v20 = vld [vmem:[%s7149_s2 + $0x40] sm:$0xff]   ;;  %v982_v23 = vrot.slane %v945_v15, %v6319_v21  ;;  %4852 = vmatprep.subr.bf16.mxu1 %v5931_v26  ;;  %s930_s1 = scalar_lea.vmem %s7153_s27, %s4705_s26  ;;  %s7154_s27 = sld [smem:[#allocation45_spill]] }
  0xe1   : > { %4711 = vmatpush3.bf16.msra.mxu0 %v5253_v3  ;;  %v5265_v22 = vld [vmem:[%s7149_s2] sm:$0xff]   ;;  %v944_v46 = vld [vmem:[%s935_s3 + $0x8] sm:$0xff]  ;;  %s7105_s26 = smov 32  }
  0xe2   : > { %4712 = vmatprep.subr.bf16.mxu0 %v5254_v4  ;;  %v990_v18 = vpack.c.bf16 %v986_v17, %v986_v17  ;;  %v989_v24 = vpack.c.bf16 %v982_v23, %v982_v23  ;;  %v943_v45 = vld [vmem:[%s935_s3] sm:$0xff]  ;;  %v942_v51 = vld [vmem:[%s930_s1 + $0x8] sm:$0xff]  ;;  %v4490_v17 = vld [vmem:[#allocation8] ss:$0 sm:$0xff]  ;;  %s5939_s3 = smov 96  }
  0xe3   : > { %4853 = vmatpush3.bf16.msra.mxu1 %v5269_v29  ;;  %v1227_v48 = vpack.c.bf16 %v944_v46, %v943_v45  ;;  %v5272_v49 = vld [vmem:[%s7152_s24] sm:$0xff]   ;;  %v5283_v59 = vld [vmem:[%s7070_s10 + $0x1c] ss:$12 sps:$4 sm:$0xff]   ;;  %s7157_s24 = smov 16  }
  0xe4   : > { %1120 = vmatprep.mubr.bf16.mxu0 %v990_v18  ;;  %4858 = vmatprep.subr.bf16.mxu1 %v5931_v26  ;;  %v941_v50 = vld [vmem:[%s930_s1] sm:$0xff]  ;;  %v5288_v0 = vld [vmem:[%s7070_s10 + $0x8] ss:$12 sps:$4 sm:$0xff]  }
  0xe5   : > { %4713 = vmatpush3.bf16.msra.mxu0 %v5255_v6  ;;  %v1222_v52 = vpack.c.bf16 %v942_v51, %v941_v50  ;;  %v5280_v58 = vld [vmem:[%s7070_s10 + $0x38] ss:$12 sps:$4 sm:$0xff]   ;;  %v5284_v61 = vld [vmem:[%s7070_s10 + $0x20] ss:$12 sps:$4 sm:$0xff]   ;;  %v5291_v45 = vld [vmem:[%s7072_s12 + $0x34] ss:$8 sps:$4 sm:$0xff]  }
  0xe6   : > { %4714 = vmatprep.subr.bf16.mxu0 %v5256_v7  ;;  %v5281_v60 = vld [vmem:[%s7070_s10 + $0x18] ss:$12 sps:$4 sm:$0xff]   ;;  %v5285_v63 = vld [vmem:[%s7070_s10] ss:$12 sps:$4 sm:$0xff]   ;;  %v1438_v50 = vsub.s32 2, %v6284_v8 }
  0xe7   : > { %v5287_v62 = vld [vmem:[%s7070_s10 + $0x4] ss:$12 sps:$4 sm:$0xff]   ;;  %v1144_v2 = vld [vmem:[%s7154_s27] sm:$0x1]  ;;  %v1362_v51 = vld [vmem:[#allocation10] sm:$0x7] }
  0xe8   : > { %v5294_v46 = vld [vmem:[%s7072_s12 + $0x24] ss:$8 sps:$4 sm:$0xff]   ;;  %s4707_s27 = sshll.u32 %s6090_s6, 8 }
  0xe9   : > { %4715 = vmatpush3.bf16.msra.mxu0 %v5257_v9 }
  0xea   : > { %4716 = vmatprep.subr.bf16.mxu0 %v5258_v10 }
  0xed   : > { %4717 = vmatpush3.bf16.msra.mxu0 %v5259_v12 }
  0xee   : > { %4718 = vmatprep.subr.bf16.mxu0 %v5260_v13 }
  0xf1   : > { %4719 = vmatpush3.bf16.msra.mxu0 %v5261_v14 }
  0xf2   : > { %4720 = vmatprep.subr.bf16.mxu0 %v5262_v16 }
  0xf5   : > { %4721 = vmatpush3.bf16.msra.mxu0 %v5263_v19 }
  0xf6   : > { %4722 = vmatprep.subr.bf16.mxu0 %v5264_v20 }
  0xf9   : > { %4723 = vmatpush3.bf16.msra.mxu0 %v5265_v22 }
  0xfa   : > { %1454 = vmatprep.subr.bf16.mxu0 %v5275_v53  ;;  %v5298_v53 = vld [vmem:[%s7072_s12] ss:$8 sps:$4 sm:$0xff]  }
  0xfc   : > { %1121 = vmatmul.mubr.bf16.vlgmr.msra.gmra.mxu0 %v989_v24 }
  0xfd   : > { %1455 = vmatpush1.bf16.msra.mxu0 %v5273_v54  ;;  %1478 = vmatprep.mubr.bf16.mxu0 %v5933_v1  ;;  %v1431_v54 = vrot.slane %v1362_v51, %v6319_v21 }
  0xfe   : > { %1456 = vmatprep.subr.bf16.mxu0 %v5279_v56  ;;  %v1435_v56 = vrot.slane %v1362_v51, %v6297_v11 }
 0x101   : > { %1457 = vmatpush1.bf16.msra.mxu0 %v5277_v57 }
 0x102   : > { %1458 = vmatprep.subr.bf16.mxu0 %v5283_v59 }
 0x105   : > { %1459 = vmatpush1.bf16.msra.mxu0 %v5281_v60 }
 0x106   : > { %1460 = vmatprep.subr.bf16.mxu0 %v5287_v62 }
 0x109   : > { %1461 = vmatpush1.bf16.msra.mxu0 %v5285_v63 }
 0x10a   : > { %1643 = vmatprep.subr.bf16.mxu0 %v5291_v45 }
 0x1bc   : > { %v4724_v30 = vpop.f32.mrf.mxu0 }
 0x1be   : > { %v4725_v32 = vpop.f32.mrf.mxu0 }
 0x1bf   : > { %v4726_v33 = vadd.f32 %v4725_v32, %v4724_v30 }
 0x1c0   : > { %v4727_v34 = vpop.f32.mrf.mxu0 }
 0x1c1   : > { %v1123_v35 = vadd.f32 %v4726_v33, %v991_v31 }
 0x1c2   : > { %v4728_v36 = vpop.f32.mrf.mxu0 }
 0x1c3   : > { %v1128_v37 = vsub.f32 0.0, %v1123_v35 }
 0x1c5   : > { %v1129_v38 = vmul.f32 1.442695, %v1128_v37 }
 0x1c7   : > { %5401 = vpow2.f32 %v1129_v38 }
 0x1d4   : > { %v5402_v39 = vpop.eup %5401 }
 0x1d5   : > { %v1131_v40 = vadd.f32 1.0, %v5402_v39 }
 0x1d7   : > { %5403 = vrcp.f32 %v1131_v40 }
 0x1e4   : > { %v5404_v41 = vpop.eup %5403 }
 0x1e5   : > { %v1134_v42 = vmul.f32 %v5404_v41, %v1123_v35 }
 0x1e7   : > { %v1143_v44 = vpack.c.bf16 %v1134_v42, %v1134_v42 }
 0x1e9   : > { %4855 = vmatmul.mubr.msk.bf16.vlgmr.msra.gmra.mxu1 %vm1169_vm1, %v1143_v44  ;;  %v5289_v44 = vld [vmem:[%s7072_s12 + $0x30] ss:$8 sps:$4 sm:$0xff]  }
 0x1ea   : > { %4859 = vmatpush3.bf16.msra.mxu1 %v5270_v43  ;;  %4862 = vmatprep.mubr.msk.bf16.mxu1 %vm5932_vm0, %v5931_v26 }
 0x1eb   : > { %4860 = vmatprep.subr.bf16.mxu1 %v5931_v26 }
 0x1ee   : > { %4861 = vmatpush3.bf16.msra.mxu1 %v5271_v47  ;;  %v5292_v47 = vld [vmem:[%s7072_s12 + $0x20] ss:$8 sps:$4 sm:$0xff]  }
 0x1ef   : > { %4866 = vmatprep.subr.bf16.mxu1 %v5931_v26 }
 0x1f1   : > { %4863 = vmatmul.mubr.msk.bf16.vlgmr.msra.gmra.mxu1 %vm1240_vm2, %v1227_v48  ;;  %v5297_v48 = vld [vmem:[%s7072_s12 + $0x14] ss:$8 sps:$4 sm:$0xff]  }
 0x1f2   : > { %4867 = vmatpush3.bf16.msra.mxu1 %v5272_v49  ;;  %4868 = vmatprep.mubr.msk.bf16.mxu1 %vm5932_vm0, %v5931_v26  ;;  %v5295_v49 = vld [vmem:[%s7072_s12 + $0x10] ss:$8 sps:$4 sm:$0xff]  }
 0x1f3   : > { %4872 = vmatprep.subr.bf16.mxu1 %v5931_v26 }
 0x1f9   : > { %4869 = vmatmul.mubr.msk.bf16.vlgmr.msra.gmra.mxu1 %vm1291_vm3, %v1222_v52  ;;  %v5300_v52 = vld [vmem:[%s7072_s12 + $0x4] ss:$8 sps:$4 sm:$0xff]  }
 0x1fa   : > { %4880 = vmatprep.mubr.msk.bf16.mxu1 %vm5932_vm0, %v5931_v26  ;;  %4873 = vmatpush3.bf16.msra.mxu1 %v5276_v55  ;;  %v1439_v55 = vrot.slane %v1362_v51, %v1438_v50 }
 0x1fb   : > { %4874 = vmatprep.subr.bf16.mxu1 %v5931_v26 }
 0x1fe   : > { %4875 = vmatpush3.bf16.msra.mxu1 %v5280_v58 }
 0x1ff   : > { %4876 = vmatprep.subr.bf16.mxu1 %v5931_v26 }
 0x202   : > { %4877 = vmatpush3.bf16.msra.mxu1 %v5284_v61 }
 0x203   : > { %4878 = vmatprep.subr.bf16.mxu1 %v5931_v26 }
 0x206   : > { %4879 = vmatpush3.bf16.msra.mxu1 %v5288_v0 }
 0x207   : > { %4884 = vmatprep.subr.bf16.mxu1 %v5931_v26 }
 0x2a9   : > { %v1207_v3 = vpop.f32.mrf.mxu1 }
 0x2aa   : > { %v1208_v4 = vadd.f32 %v1207_v3, %v1144_v2 }
 0x2ab   : > { %v4856_v5 = vpop.f32.mrf.mxu1 }
 0x2ac   : > { %v1213_v6 = vsub.f32 0.0, %v1208_v4 }
 0x2ad   : > { %v1210_v7 = vpop.f32.mrf.mxu1 }
 0x2ae   : > { %v1214_v9 = vmul.f32 1.442695, %v1213_v6 }
 0x2af   : > { %v4857_v10 = vpop.f32.mrf.mxu1 }
 0x2b0   : > { %5405 = vpow2.f32 %v1214_v9 }
 0x2b1   : > { %v1278_v12 = vpop.f32.mrf.mxu1 }
 0x2b3   : > { %v4864_v13 = vpop.f32.mrf.mxu1 }
 0x2b5   : > { %v1281_v14 = vpop.f32.mrf.mxu1 }
 0x2b7   : > { %v4865_v15 = vpop.f32.mrf.mxu1 }
 0x2b9   : > { %v1329_v16 = vpop.f32.mrf.mxu1 }
 0x2ba   : > { %v1330_v18 = vadd.f32 %v1329_v16, %v1278_v12 }
 0x2bb   : > { %v4870_v19 = vpop.f32.mrf.mxu1 }
 0x2bc   : > { %v6398_v20 = vadd.f32 %v4490_v17, %v1330_v18 }
 0x2bd   : > { %v5406_v22 = vpop.eup %5405  ;;  %v1332_v23 = vpop.f32.mrf.mxu1 }
 0x2be   : > { %v1216_v24 = vadd.f32 1.0, %v5406_v22  ;;  %v1333_v25 = vadd.f32 %v1332_v23, %v1281_v14  ;;  %v1527_v27 = vsel %vm1169_vm1, %v6398_v20, 0.0 }
 0x2bf   : > { %1528 = vadd.xlane.f32.xlu0 %v1527_v27  ;;  %v4871_v28 = vpop.f32.mrf.mxu1 }
 0x2c0   : > { %5407 = vrcp.f32 %v1216_v24  ;;  %v6402_v29 = vadd.f32 %v4490_v17, %v1333_v25 }
 0x2c2   : > { %v1530_v30 = vsel %vm1169_vm1, %v6402_v29, 0.0 }
 0x2c3   : > { %1531 = vadd.xlane.f32.xlu0 %v1530_v30  ;;  %v1580_v30 = vld [vmem:[#allocation11] sm:$0x3] }
 0x2cd   : > { %v5408_v31 = vpop.eup %5407 }
 0x2ce   : > { %v1219_v32 = vmul.f32 %v5408_v31, %v1208_v4 }
 0x2d0   : > { %v6406_v33 = vpack.c.bf16 %v1219_v32, %v1219_v32  ;;  %v1585_v32 = vrot.slane %v1580_v30, %v6319_v21 }
 0x2d2   : > { %4503 = vmatmul.mubr.msk.bf16.vlgmr.msra.gmra.mxu0 %vm1169_vm1, %v6406_v33  ;;  %4881 = vmatmul.mubr.msk.bf16.vlgmr.msra.gmra.mxu1 %vm1169_vm1, %v6406_v33 }
 0x2d3   : > { %1667 = vmatprep.mubr.bf16.mxu0 %v5933_v1  ;;  %4886 = vmatprep.mubr.msk.bf16.mxu1 %vm5932_vm0, %v5931_v26 }
 0x2d4   : > { %1644 = vmatpush1.bf16.msra.mxu0 %v5289_v44 }
 0x2d5   : > { %1645 = vmatprep.subr.bf16.mxu0 %v5294_v46 }
 0x2d8   : > { %1646 = vmatpush1.bf16.msra.mxu0 %v5292_v47 }
 0x2d9   : > { %1647 = vmatprep.subr.bf16.mxu0 %v5297_v48 }
 0x2dc   : > { %1648 = vmatpush1.bf16.msra.mxu0 %v5295_v49 }
 0x2dd   : > { %1649 = vmatprep.subr.bf16.mxu0 %v5300_v52 }
 0x2e0   : > { %1650 = vmatpush1.bf16.msra.mxu0 %v5298_v53 }
 0x2e1   : > { %4896 = vmatprep.subr.bf16.mxu0 %v5931_v26 }
 0x348   : > { %v1529_v34 = vpop.xlane.xlu0 %1528 }
 0x349   : > { %v1534_v35 = vmul.f32 0.015625, %v1529_v34 }
 0x34b   : > { %v1536_v36 = vsub.f32 %v6398_v20, %v1534_v35 }
 0x34c   : > { %v1532_v37 = vpop.xlane.xlu0 %1531 }
 0x34d   : > { %v1535_v38 = vmul.f32 0.015625, %v1532_v37  ;;  %v1538_v39 = vmul.f32 %v1536_v36, %v1536_v36 }
 0x34f   : > { %v1537_v40 = vsub.f32 %v6402_v29, %v1535_v38  ;;  %v1540_v41 = vsel %vm1169_vm1, %v1538_v39, 0.0 }
 0x350   : > { %1541 = vadd.xlane.f32.xlu1 %v1540_v41 }
 0x351   : > { %v1539_v42 = vmul.f32 %v1537_v40, %v1537_v40 }
 0x353   : > { %v1543_v43 = vsel %vm1169_vm1, %v1539_v42, 0.0  ;;  %v1589_v42 = vrot.slane %v1580_v30, %v6297_v11 }
 0x354   : > { %1544 = vadd.xlane.f32.xlu1 %v1543_v43 }
 0x392   : > { %v1480_v57 = vpop.f32.mrf.mxu0  ;;  %v1521_v58 = vpop.f32.mrf.mxu1 }
 0x393   : > { %v1481_v59 = vadd.f32 %v1480_v57, %v1431_v54  ;;  %v6449_v60 = vadd.f32 %v1521_v58, %v1439_v55 }
 0x394   : > { %v1482_v61 = vpop.f32.mrf.mxu0  ;;  %v4882_v62 = vpop.f32.mrf.mxu1 }
 0x395   : > { %v1554_v63 = vadd.f32 1.0, %v1481_v59  ;;  %v6451_v0 = vadd.f32 %v1482_v61, %v1435_v56  ;;  %v1568_v22 = vrot.slane %v1481_v59, %v6319_v21 }
 0x396   : > { %v1484_v2 = vpop.f32.mrf.mxu0  ;;  %v1524_v3 = vpop.f32.mrf.mxu1 }
 0x397   : > { %v1558_v4 = vrot.slane %v1554_v63, %v6319_v21 }
 0x398   : > { %v1485_v5 = vpop.f32.mrf.mxu0  ;;  %v4883_v6 = vpop.f32.mrf.mxu1 }
 0x399   : > { %1560 = vrot.lane.b32.xlu0 %v1558_v4, %s5934_s4 }
 0x3d9   : > { %v1542_v7 = vpop.xlane.xlu1 %1541 }
 0x3da   : > { %v1546_v10 = vmul.f32 0.015625, %v1542_v7 }
 0x3dc   : > { %v1548_v13 = vadd.f32 1e-06, %v1546_v10 }
 0x3dd   : > { %v1545_v9 = vpop.xlane.xlu1 %1544 }
 0x3de   : > { %v1547_v12 = vmul.f32 0.015625, %v1545_v9  ;;  %5409 = vrsqrt.f32 %v1548_v13 }
 0x3e0   : > { %v1549_v14 = vadd.f32 1e-06, %v1547_v12 }
 0x3e2   : > { %5411 = vrsqrt.f32 %v1549_v14 }
 0x3eb   : > { %v5410_v15 = vpop.eup %5409 }
 0x3ec   : > { %v1552_v17 = vmul.f32 %v5410_v15, %v1536_v36 }
 0x3ef   : > { %v5412_v16 = vpop.eup %5411 }
 0x3f0   : > { %v1553_v18 = vmul.f32 %v5412_v16, %v1537_v40 }
 0x40b   : > { %v1561_v19 = vpop.permute.xlu0 %1560 }
 0x40c   : > { %v1563_v23 = vmul.f32 %v1561_v19, %v1552_v17  ;;  %v1564_v24 = vmul.f32 %v1561_v19, %v1553_v18 }
 0x40e   : > { %v1569_v25 = vadd.f32 %v1568_v22, %v1563_v23  ;;  %v1570_v27 = vadd.f32 %v1568_v22, %v1564_v24 }
 0x410   : > { %v1579_v28 = vpack.c.bf16 %v1570_v27, %v1569_v25 }
 0x412   : > { %4513 = vmatmul.mubr.msk.bf16.vlgmr.msra.gmra.mxu0 %vm1169_vm1, %v1579_v28 }
 0x413   : > { %4898 = vmatprep.mubr.msk.bf16.mxu0 %vm5932_vm0, %v5931_v26 }
 0x4d2   : > { %v1669_v31 = vpop.f32.mrf.mxu0 }
 0x4d3   : > { %v1670_v36 = vadd.f32 %v1669_v31, %v1585_v32 }
 0x4d4   : > { %v1671_v34 = vpop.f32.mrf.mxu0 }
 0x4d5   : > { %v1672_v46 = vadd.f32 %v1671_v34, %v1589_v42 }
 0x4d6   : > { %v1673_v35 = vpop.f32.mrf.mxu0 }
 0x4d7   : > { %v1674_v37 = vadd.f32 %v1673_v35, %v1585_v32 }
 0x4d8   : > { %v1675_v40 = vpop.f32.mrf.mxu0 }
 0x4d9   : > { %v1678_v38 = vpack.c.bf16 %v1674_v37, %v1670_v36  ;;  %v1676_v43 = vadd.f32 %v1675_v40, %v1589_v42 }
 0x4db   : > { %1925 = vrot.lane.b32.xlu0 %v1678_v38, %s7105_s26  ;;  %1680 = vrot.lane.b32.xlu1 %v1678_v38, %s5934_s4  ;;  %v6472_v47 = vpack.c.bf16 %v1676_v43, %v1672_v46 }
 0x4df   : > { %2048 = vrot.lane.b32.xlu0 %v1678_v38, %s7101_s0  ;;  %1801 = vrot.lane.b32.xlu1 %v1678_v38, %s5937_s29 }
 0x4e3   : > { %1799 = vrot.lane.b32.xlu1 %v1678_v38, %s5938_s8 }
 0x4e7   : > { %1923 = vrot.lane.b32.xlu1 %v1678_v38, %s5939_s3 }
 0x4eb   : > { %2046 = vrot.lane.b32.xlu1 %v1678_v38, %s7103_s30 }
 0x54d   : > { %v1681_v39 = vpop.permute.xlu1 %1680  ;;  %v1926_v48 = vpop.permute.xlu0 %1925 }
 0x54e   : > { %v1686_v41 = vsel %vm1291_vm3, %v1681_v39, 0  ;;  %v1931_v51 = vsel %vm1291_vm3, %v1926_v48, 0 }
 0x54f   : > { %4885 = vmatpush3.bf16.xpose.msra.mxu1 %v1686_v41 }
 0x550   : > { %4890 = vmatprep.subr.bf16.mxu1 %v5931_v26 }
 0x551   : > { %v1802_v44 = vpop.permute.xlu1 %1801  ;;  %v2049_v52 = vpop.permute.xlu0 %2048 }
 0x552   : > { %v1807_v45 = vsel %vm1291_vm3, %v1802_v44, 0  ;;  %v2054_v54 = vsel %vm1291_vm3, %v2049_v52, 0 }
 0x553   : > { %4897 = vmatpush3.bf16.xpose.msra.mxu0 %v1807_v45 }
 0x554   : > { %4908 = vmatprep.subr.bf16.mxu0 %v5931_v26 }
 0x555   : > { %v1800_v49 = vpop.permute.xlu1 %1799 }
 0x556   : > { %4887 = vmatmul.mubr.msk.bf16.vlgmr.msra.gmra.mxu1 %vm1291_vm3, %v1678_v38 }
 0x557   : > { %4891 = vmatpush3.bf16.msra.mxu1 %v6472_v47  ;;  %4892 = vmatprep.mubr.msk.bf16.mxu1 %vm5932_vm0, %v5931_v26 }
 0x558   : > { %4902 = vmatprep.subr.bf16.mxu1 %v5931_v26 }
 0x559   : > { %v1924_v53 = vpop.permute.xlu1 %1923 }
 0x55a   : > { %4899 = vmatmul.mubr.msk.bf16.vlgmr.msra.gmra.mxu0 %vm1291_vm3, %v1800_v49 }
 0x55b   : > { %4909 = vmatpush3.bf16.xpose.msra.mxu0 %v1931_v51  ;;  %4910 = vmatprep.mubr.msk.bf16.mxu0 %vm5932_vm0, %v5931_v26 }
 0x55c   : > { %4920 = vmatprep.subr.bf16.mxu0 %v5931_v26 }
 0x55d   : > { %v2047_v55 = vpop.permute.xlu1 %2046 }
 0x562   : > { %4911 = vmatmul.mubr.msk.bf16.vlgmr.msra.gmra.mxu0 %vm1291_vm3, %v1924_v53 }
 0x563   : > { %4921 = vmatpush3.bf16.xpose.msra.mxu0 %v2054_v54  ;;  %4922 = vmatprep.mubr.msk.bf16.mxu0 %vm5932_vm0, %v5931_v26 }
 0x564   : > { %4932 = vmatprep.subr.bf16.mxu0 %v5931_v26 }
 0x56a   : > { %4923 = vmatmul.mubr.msk.bf16.vlgmr.msra.gmra.mxu0 %vm1291_vm3, %v2047_v55 }
 0x56b   : > { %4940 = vmatprep.mubr.msk.bf16.mxu0 %vm5932_vm0, %v5931_v26 }
 0x616   : > { %v1722_v56 = vpop.f32.mrf.mxu1 }
 0x617   : > { %v1729_v57 = vmul.f32 0.25, %v1722_v56 }
 0x618   : > { %v4888_v58 = vpop.f32.mrf.mxu1 }
 0x619   : > { %v1731_v59 = vsel %vm1291_vm3, %v1729_v57, -inf }
 0x61a   : > { %v1843_v61 = vpop.f32.mrf.mxu0  ;;  %1732 = vmax.xlane.f32.xlu0 %v1731_v59  ;;  %v1725_v62 = vpop.f32.mrf.mxu1 }
 0x61b   : > { %v1850_v63 = vmul.f32 0.25, %v1843_v61  ;;  %v1730_v2 = vmul.f32 0.25, %v1725_v62 }
 0x61c   : > { %v4889_v3 = vpop.f32.mrf.mxu1  ;;  %v4900_v4 = vpop.f32.mrf.mxu0 }
 0x61d   : > { %v1852_v5 = vsel %vm1291_vm3, %v1850_v63, -inf  ;;  %v1734_v6 = vsel %vm1291_vm3, %v1730_v2, -inf }
 0x61e   : > { %v1846_v7 = vpop.f32.mrf.mxu0  ;;  %1853 = vmax.xlane.f32.xlu0 %v1852_v5  ;;  %1735 = vmax.xlane.f32.xlu1 %v1734_v6 }
 0x61f   : > { %v1851_v9 = vmul.f32 0.25, %v1846_v7 }
 0x620   : > { %v4901_v10 = vpop.f32.mrf.mxu0 }
 0x621   : > { %v1855_v12 = vsel %vm1291_vm3, %v1851_v9, -inf }
 0x622   : > { %v1967_v13 = vpop.f32.mrf.mxu0  ;;  %1856 = vmax.xlane.f32.xlu0 %v1855_v12 }
 0x623   : > { %v1974_v14 = vmul.f32 0.25, %v1967_v13 }
 0x624   : > { %v4912_v15 = vpop.f32.mrf.mxu0 }
 0x625   : > { %v1976_v16 = vsel %vm1291_vm3, %v1974_v14, -inf }
 0x626   : > { %v1970_v17 = vpop.f32.mrf.mxu0  ;;  %1977 = vmax.xlane.f32.xlu0 %v1976_v16 }
 0x627   : > { %v1975_v18 = vmul.f32 0.25, %v1970_v17 }
 0x628   : > { %v4913_v19 = vpop.f32.mrf.mxu0 }
 0x629   : > { %v1979_v22 = vsel %vm1291_vm3, %v1975_v18, -inf }
 0x62a   : > { %v2090_v23 = vpop.f32.mrf.mxu0  ;;  %1980 = vmax.xlane.f32.xlu1 %v1979_v22 }
 0x62b   : > { %v2097_v24 = vmul.f32 0.25, %v2090_v23 }
 0x62c   : > { %v4924_v25 = vpop.f32.mrf.mxu0 }
 0x62d   : > { %v2099_v27 = vsel %vm1291_vm3, %v2097_v24, -inf }
 0x62e   : > { %v2093_v28 = vpop.f32.mrf.mxu0  ;;  %2100 = vmax.xlane.f32.xlu0 %v2099_v27 }
 0x62f   : > { %v2098_v30 = vmul.f32 0.25, %v2093_v28 }
 0x630   : > { %v4925_v31 = vpop.f32.mrf.mxu0 }
 0x631   : > { %v2102_v32 = vsel %vm1291_vm3, %v2098_v30, -inf }
 0x632   : > { %2103 = vmax.xlane.f32.xlu1 %v2102_v32 }
 0x6a3   : > { %v1733_v34 = vpop.xlane.xlu0 %1732 }
 0x6a4   : > { %v1737_v35 = vsub.f32 %v1729_v57, %v1733_v34 }
 0x6a6   : > { %v1739_v36 = vmul.f32 1.442695, %v1737_v35 }
 0x6a7   : > { %v1854_v37 = vpop.xlane.xlu0 %1853  ;;  %v1736_v38 = vpop.xlane.xlu1 %1735 }
 0x6a8   : > { %5413 = vpow2.f32 %v1739_v36  ;;  %v1858_v39 = vsub.f32 %v1850_v63, %v1854_v37  ;;  %v1738_v40 = vsub.f32 %v1730_v2, %v1736_v38 }
 0x6aa   : > { %v1860_v41 = vmul.f32 1.442695, %v1858_v39  ;;  %v1741_v42 = vmul.f32 1.442695, %v1738_v40 }
 0x6ab   : > { %v1857_v43 = vpop.xlane.xlu0 %1856 }
 0x6ac   : > { %5415 = vpow2.f32 %v1860_v41  ;;  %v1859_v44 = vsub.f32 %v1851_v9, %v1857_v43 }
 0x6ad   : > { %5417 = vpow2.f32 %v1741_v42 }
 0x6ae   : > { %v1862_v45 = vmul.f32 1.442695, %v1859_v44 }
 0x6af   : > { %v1978_v46 = vpop.xlane.xlu0 %1977 }
 0x6b0   : > { %5419 = vpow2.f32 %v1862_v45  ;;  %v1982_v48 = vsub.f32 %v1974_v14, %v1978_v46 }
 0x6b2   : > { %v1984_v49 = vmul.f32 1.442695, %v1982_v48 }
 0x6b3   : > { %v1981_v51 = vpop.xlane.xlu1 %1980 }
 0x6b4   : > { %5421 = vpow2.f32 %v1984_v49  ;;  %v1983_v52 = vsub.f32 %v1975_v18, %v1981_v51 }
 0x6b5   : > { %v5414_v53 = vpop.eup %5413 }
 0x6b6   : > { %v1986_v54 = vmul.f32 1.442695, %v1983_v52  ;;  %v1743_v55 = vsel %vm1291_vm3, %v5414_v53, 0.0 }
 0x6b7   : > { %1744 = vadd.xlane.f32.xlu0 %v1743_v55  ;;  %v2101_v56 = vpop.xlane.xlu0 %2100 }
 0x6b8   : > { %5423 = vpow2.f32 %v1986_v54  ;;  %v2105_v57 = vsub.f32 %v2097_v24, %v2101_v56 }
 0x6b9   : > { %v5416_v58 = vpop.eup %5415 }
 0x6ba   : > { %v5418_v59 = vpop.eup %5417  ;;  %v2107_v61 = vmul.f32 1.442695, %v2105_v57  ;;  %v1864_v62 = vsel %vm1291_vm3, %v5416_v58, 0.0 }
 0x6bb   : > { %1865 = vadd.xlane.f32.xlu0 %v1864_v62  ;;  %v1746_v63 = vsel %vm1291_vm3, %v5418_v59, 0.0  ;;  %v2104_v12 = vpop.xlane.xlu1 %2103  ;;  %v5301_v62 = vld [vmem:[%s7074_s14 + $0x18] sm:$0xff]  }
 0x6bc   : > { %5425 = vpow2.f32 %v2107_v61  ;;  %1747 = vadd.xlane.f32.xlu1 %v1746_v63  ;;  %v2106_v13 = vsub.f32 %v2098_v30, %v2104_v12  ;;  %4933 = vmatpush3.bf16.msra.mxu0 %v5301_v62  ;;  %v5304_v12 = vld [vmem:[%s7074_s14] sm:$0xff]   ;;  %v5307_v62 = vld [vmem:[%s7076_s16 + $0x34] ss:$8 sps:$4 sm:$0xff]  }
 0x6bd   : > { %v5420_v2 = vpop.eup %5419  ;;  %4934 = vmatprep.subr.bf16.mxu0 %v5931_v26 }
 0x6be   : > { %v1867_v3 = vsel %vm1291_vm3, %v5420_v2, 0.0  ;;  %v2109_v14 = vmul.f32 1.442695, %v2106_v13 }
 0x6c0   : > { %1868 = vadd.xlane.f32.xlu1 %v1867_v3  ;;  %5427 = vpow2.f32 %v2109_v14  ;;  %v5302_v3 = vld [vmem:[%s7074_s14 + $0x10] sm:$0xff]  }
 0x6c1   : > { %v5422_v4 = vpop.eup %5421  ;;  %4935 = vmatpush3.bf16.msra.mxu0 %v5302_v3  ;;  %v5308_v3 = vld [vmem:[%s7076_s16 + $0x20] ss:$8 sps:$4 sm:$0xff]  }
 0x6c2   : > { %v1988_v5 = vsel %vm1291_vm3, %v5422_v4, 0.0  ;;  %4936 = vmatprep.subr.bf16.mxu0 %v5931_v26 }
 0x6c3   : > { %1989 = vadd.xlane.f32.xlu0 %v1988_v5 }
 0x6c5   : > { %v5424_v6 = vpop.eup %5423 }
 0x6c6   : > { %v1991_v7 = vsel %vm1291_vm3, %v5424_v6, 0.0 }
 0x6c7   : > { %1992 = vadd.xlane.f32.xlu1 %v1991_v7 }
 0x6c9   : > { %v5426_v9 = vpop.eup %5425 }
 0x6ca   : > { %v2111_v10 = vsel %vm1291_vm3, %v5426_v9, 0.0 }
 0x6cb   : > { %2112 = vadd.xlane.f32.xlu0 %v2111_v10 }
 0x6cd   : > { %v5428_v15 = vpop.eup %5427 }
 0x6ce   : > { %v2114_v16 = vsel %vm1291_vm3, %v5428_v15, 0.0 }
 0x6d8   : > { %1999 = vrot.lane.b32.xlu1 %v6472_v47, %s5939_s3 }
 0x6e1   : > { %1876 = vrot.lane.b32.xlu0 %v6472_v47, %s5938_s8 }
 0x6fc   : > { %2115 = vadd.xlane.f32.xlu1 %v2114_v16 }
 0x70d   : > { %2122 = vrot.lane.b32.xlu1 %v6472_v47, %s7103_s30  ;;  %s7156_s30 = smov 80  }
 0x740   : > { %v1745_v17 = vpop.xlane.xlu0 %1744 }
 0x741   : > { %5429 = vrcp.f32 %v1745_v17 }
 0x744   : > { %v1866_v19 = vpop.xlane.xlu0 %1865 }
 0x745   : > { %v1748_v18 = vpop.xlane.xlu1 %1747 }
 0x746   : > { %5431 = vrcp.f32 %v1748_v18 }
 0x749   : > { %v1869_v22 = vpop.xlane.xlu1 %1868 }
 0x74a   : > { %5433 = vrcp.f32 %v1869_v22 }
 0x74b   : > { %5435 = vrcp.f32 %v1866_v19 }
 0x74c   : > { %v1990_v23 = vpop.xlane.xlu0 %1989 }
 0x74e   : > { %v5430_v25 = vpop.eup %5429 }
 0x74f   : > { %v1751_v30 = vmul.f32 %v5430_v25, %v5414_v53 }
 0x750   : > { %v1993_v24 = vpop.xlane.xlu1 %1992 }
 0x751   : > { %5437 = vrcp.f32 %v1993_v24 }
 0x752   : > { %5439 = vrcp.f32 %v1990_v23 }
 0x753   : > { %v5432_v27 = vpop.eup %5431 }
 0x754   : > { %v2113_v28 = vpop.xlane.xlu0 %2112  ;;  %v1752_v31 = vmul.f32 %v5432_v27, %v5418_v59  ;;  %v2000_v40 = vpop.permute.xlu1 %1999 }
 0x755   : > { %5441 = vrcp.f32 %v2113_v28 }
 0x756   : > { %v1753_v32 = vpack.c.bf16 %v1752_v31, %v1751_v30 }
 0x757   : > { %v5434_v34 = vpop.eup %5433 }
 0x758   : > { %4893 = vmatmul.mubr.msk.bf16.vlgmr.msra.gmra.mxu1 %vm1291_vm3, %v1753_v32  ;;  %v1877_v47 = vpop.permute.xlu0 %1876  ;;  %v5436_v35 = vpop.eup %5435  ;;  %v1873_v36 = vmul.f32 %v5434_v34, %v5420_v2 }
 0x759   : > { %4903 = vmatpush3.bf16.msra.mxu1 %v1877_v47  ;;  %4904 = vmatprep.mubr.msk.bf16.mxu1 %vm5932_vm0, %v5931_v26  ;;  %v1872_v37 = vmul.f32 %v5436_v35, %v5416_v58 }
 0x75a   : > { %4914 = vmatprep.subr.bf16.mxu1 %v5931_v26 }
 0x75b   : > { %v1874_v38 = vpack.c.bf16 %v1873_v36, %v1872_v37 }
 0x75e   : > { %v5438_v39 = vpop.eup %5437 }
 0x75f   : > { %v5440_v41 = vpop.eup %5439  ;;  %v1997_v42 = vmul.f32 %v5438_v39, %v5424_v6  ;;  %v5303_v6 = vld [vmem:[%s7074_s14 + $0x8] sm:$0xff]  }
 0x760   : > { %4905 = vmatmul.mubr.msk.bf16.vlgmr.msra.gmra.mxu1 %vm1291_vm3, %v1874_v38  ;;  %v1996_v43 = vmul.f32 %v5440_v41, %v5422_v4  ;;  %4937 = vmatpush3.bf16.msra.mxu0 %v5303_v6  ;;  %v4522_v38 = vld [vmem:[#allocation13] ss:$0 sm:$0xff]  ;;  %v5316_v6 = vld [vmem:[%s7076_s16 + $0x4] ss:$8 sps:$4 sm:$0xff]  }
 0x761   : > { %4915 = vmatpush3.bf16.msra.mxu1 %v2000_v40  ;;  %4916 = vmatprep.mubr.msk.bf16.mxu1 %vm5932_vm0, %v5931_v26  ;;  %v2287_v40 = vrot.slane %v6451_v0, %v6319_v21 }
 0x762   : > { %4926 = vmatprep.subr.bf16.mxu1 %v5931_v26  ;;  %v1998_v44 = vpack.c.bf16 %v1997_v42, %v1996_v43  ;;  %v5442_v48 = vpop.eup %5441  ;;  %4938 = vmatprep.subr.bf16.mxu0 %v5931_v26 }
 0x763   : > { %v2119_v51 = vmul.f32 %v5442_v48, %v5426_v9 }
 0x764   : > { %4939 = vmatpush3.bf16.msra.mxu0 %v5304_v12 }
 0x768   : > { %4917 = vmatmul.mubr.msk.bf16.vlgmr.msra.gmra.mxu1 %vm1291_vm3, %v1998_v44 }
 0x769   : > { %4928 = vmatprep.mubr.msk.bf16.mxu1 %vm5932_vm0, %v5931_v26 }
 0x785   : > { %v2116_v45 = vpop.xlane.xlu1 %2115 }
 0x786   : > { %5443 = vrcp.f32 %v2116_v45 }
 0x789   : > { %v2123_v46 = vpop.permute.xlu1 %2122 }
 0x78a   : > { %4927 = vmatpush3.bf16.msra.mxu1 %v2123_v46 }
 0x78b   : > { %2403 = vmatprep.subr.bf16.mxu1 %v5307_v62  ;;  %v2340_v62 = vld [vmem:[#allocation14] sm:$0x3] }
 0x793   : > { %v5444_v49 = vpop.eup %5443 }
 0x794   : > { %v2120_v52 = vmul.f32 %v5444_v49, %v5428_v15 }
 0x796   : > { %v2121_v53 = vpack.c.bf16 %v2120_v52, %v2119_v51 }
 0x798   : > { %4929 = vmatmul.mubr.msk.bf16.vlgmr.msra.gmra.mxu1 %vm1291_vm3, %v2121_v53 }
 0x799   : > { %2427 = vmatprep.mubr.bf16.mxu1 %v5933_v1 }
 0x818   : > { %v1792_v54 = vpop.f32.mrf.mxu1 }
 0x81a   : > { %v4894_v55 = vpop.f32.mrf.mxu1 }
 0x81c   : > { %v1795_v56 = vpop.f32.mrf.mxu1 }
 0x81e   : > { %v4895_v57 = vpop.f32.mrf.mxu1 }
 0x820   : > { %v1916_v58 = vpop.f32.mrf.mxu1 }
 0x822   : > { %v4906_v59 = vpop.f32.mrf.mxu1 }
 0x824   : > { %v1919_v61 = vpop.f32.mrf.mxu1 }
 0x825   : > { %v5220_v63 = vpack.i.bf16 %v1919_v61, %v1916_v58 }
 0x826   : > { %v4907_v2 = vpop.f32.mrf.mxu1 }
 0x827   : > { %5221 = vrot.lane.b32.xlu1 %v5220_v63, %s7101_s0  ;;  %v5305_v63 = vld [vmem:[%s7076_s16 + $0x30] ss:$8 sps:$4 sm:$0xff]   ;;  %v5310_v2 = vld [vmem:[%s7076_s16 + $0x24] ss:$8 sps:$4 sm:$0xff]   ;;  %s7160_s0 = sld [smem:[#allocation48_spill]] }
 0x828   : > { %v2039_v4 = vpop.f32.mrf.mxu1  ;;  %2404 = vmatpush1.bf16.msra.mxu1 %v5305_v63  ;;  %v2345_v63 = vrot.slane %v2340_v62, %v6319_v21 }
 0x829   : > { %2405 = vmatprep.subr.bf16.mxu1 %v5310_v2  ;;  %v2349_v2 = vrot.slane %v2340_v62, %v6297_v11 }
 0x82a   : > { %v4918_v5 = vpop.f32.mrf.mxu1 }
 0x82b   : > { %v5311_v5 = vld [vmem:[%s7076_s16 + $0x10] ss:$8 sps:$4 sm:$0xff]  }
 0x82c   : > { %v2042_v7 = vpop.f32.mrf.mxu1  ;;  %2406 = vmatpush1.bf16.msra.mxu1 %v5308_v3 }
 0x82d   : > { %v5225_v9 = vpack.i.bf16 %v2042_v7, %v2039_v4  ;;  %v5313_v4 = vld [vmem:[%s7076_s16 + $0x14] ss:$8 sps:$4 sm:$0xff]   ;;  %v5314_v7 = vld [vmem:[%s7076_s16] ss:$8 sps:$4 sm:$0xff]  }
 0x82e   : > { %v4919_v10 = vpop.f32.mrf.mxu1  ;;  %2407 = vmatprep.subr.bf16.mxu1 %v5313_v4 }
 0x82f   : > { %5226 = vrot.lane.b32.xlu0 %v5225_v9, %s7105_s26  ;;  %v5319_v9 = vld [vmem:[%s7070_s10 + $0xac] ss:$12 sps:$4 sm:$0xff]   ;;  %s7155_s26 = smov 32  }
 0x830   : > { %2408 = vmatpush1.bf16.msra.mxu1 %v5311_v5 }
 0x831   : > { %2409 = vmatprep.subr.bf16.mxu1 %v5316_v6 }
 0x834   : > { %2410 = vmatpush1.bf16.msra.mxu1 %v5314_v7 }
 0x835   : > { %2783 = vmatprep.subr.bf16.mxu1 %v5319_v9 }
 0x858   : > { %v2162_v13 = vpop.f32.mrf.mxu1 }
 0x85a   : > { %v4930_v14 = vpop.f32.mrf.mxu1 }
 0x85c   : > { %v2165_v15 = vpop.f32.mrf.mxu1 }
 0x85d   : > { %v5230_v16 = vpack.i.bf16 %v2165_v15, %v2162_v13 }
 0x85e   : > { %v4931_v17 = vpop.f32.mrf.mxu1 }
 0x85f   : > { %5231 = vrot.lane.b32.xlu1 %v5230_v16, %s5937_s29  ;;  %v2318_v17 = vadd.f32 1.0, %v6449_v60 }
 0x899   : > { %v5222_v18 = vpop.permute.xlu1 %5221 }
 0x89a   : > { %v5224_v22 = vunpack.i.h.bf16 %v5222_v18  ;;  %v5223_v23 = vunpack.i.l.bf16 %v5222_v18 }
 0x89c   : > { %v2194_v28 = vsel %vm1291_vm3, %v1795_v56, %v5224_v22  ;;  %v2193_v30 = vsel %vm1291_vm3, %v1792_v54, %v5223_v23  ;;  %v2322_v22 = vrot.slane %v2318_v17, %v6319_v21 }
 0x8a1   : > { %v5227_v19 = vpop.permute.xlu0 %5226 }
 0x8a2   : > { %v5229_v24 = vunpack.i.h.bf16 %v5227_v19  ;;  %v5228_v25 = vunpack.i.l.bf16 %v5227_v19 }
 0x8a4   : > { %v2196_v34 = vsel %vm1240_vm2, %v2194_v28, %v5229_v24  ;;  %v2195_v47 = vsel %vm1240_vm2, %v2193_v30, %v5228_v25 }
 0x8d1   : > { %v5232_v27 = vpop.permute.xlu1 %5231 }
 0x8d2   : > { %v5234_v31 = vunpack.i.h.bf16 %v5232_v27  ;;  %v5233_v32 = vunpack.i.l.bf16 %v5232_v27 }
 0x8d4   : > { %v2199_v35 = vsel %vm2197_vm4, %v2196_v34, %v5234_v31  ;;  %v2198_v36 = vsel %vm2197_vm4, %v2195_v47, %v5233_v32  ;;  %v5317_v32 = vld [vmem:[%s7070_s10 + $0xa8] ss:$12 sps:$4 sm:$0xff]  }
 0x8d5   : > { %v2208_v37 = vpack.c.bf16 %v2199_v35, %v2198_v36  ;;  %v5322_v47 = vld [vmem:[%s7070_s10 + $0x94] ss:$12 sps:$4 sm:$0xff]   ;;  %v5320_v35 = vld [vmem:[%s7070_s10 + $0x90] ss:$12 sps:$4 sm:$0xff]  }
 0x8d6   : > { %v5325_v36 = vld [vmem:[%s7070_s10 + $0x7c] ss:$12 sps:$4 sm:$0xff]  }
 0x8d7   : > { %4941 = vmatmul.mubr.msk.bf16.vlgmr.msra.gmra.mxu0 %vm1169_vm1, %v2208_v37  ;;  %v5323_v37 = vld [vmem:[%s7070_s10 + $0x78] ss:$12 sps:$4 sm:$0xff]  }
 0x997   : > { %v2277_v39 = vpop.f32.mrf.mxu0 }
 0x998   : > { %v2278_v41 = vadd.f32 %v4522_v38, %v2277_v39  ;;  %v5326_v39 = vld [vmem:[%s7070_s10 + $0x60] ss:$12 sps:$4 sm:$0xff]  }
 0x999   : > { %v4942_v42 = vpop.f32.mrf.mxu0 }
 0x99a   : > { %v2288_v43 = vmul.f32 %v2287_v40, %v2278_v41  ;;  %v5330_v41 = vld [vmem:[%s7070_s10 + $0x98] ss:$12 sps:$4 sm:$0xff]   ;;  %v5331_v42 = vld [vmem:[%s7070_s10 + $0x80] ss:$12 sps:$4 sm:$0xff]  }
 0x99b   : > { %v2280_v44 = vpop.f32.mrf.mxu0 }
 0x99c   : > { %v6555_v45 = vadd.f32 %v2288_v43, %v6398_v20  ;;  %v2281_v46 = vadd.f32 %v4522_v38, %v2280_v44  ;;  %v5328_v38 = vld [vmem:[%s7070_s10 + $0x64] ss:$12 sps:$4 sm:$0xff]   ;;  %v5332_v43 = vld [vmem:[%s7070_s10 + $0x68] ss:$12 sps:$4 sm:$0xff]   ;;  %v5333_v44 = vld [vmem:[%s7078_s18 + $0x78] sm:$0xff]  }
 0x99d   : > { %v4943_v48 = vpop.f32.mrf.mxu0  ;;  %4766 = vmatprep.subr.bf16.mxu0 %v5333_v44 }
 0x99e   : > { %v2289_v49 = vmul.f32 %v2287_v40, %v2281_v46  ;;  %v2292_v51 = vsel %vm1169_vm1, %v6555_v45, 0.0  ;;  %v5334_v46 = vld [vmem:[%s7078_s18 + $0x38] sm:$0xff]   ;;  %v5335_v48 = vld [vmem:[%s7078_s18 + $0x70] sm:$0xff]  }
 0x99f   : > { %2293 = vadd.xlane.f32.xlu0 %v2292_v51  ;;  %4767 = vmatpush3.bf16.msra.mxu0 %v5334_v46  ;;  %v5337_v51 = vld [vmem:[%s7078_s18 + $0x68] sm:$0xff]  }
 0x9a0   : > { %v6560_v52 = vadd.f32 %v2289_v49, %v6402_v29  ;;  %v5336_v49 = vld [vmem:[%s7078_s18 + $0x30] sm:$0xff]   ;;  %4768 = vmatprep.subr.bf16.mxu0 %v5335_v48 }
 0x9a2   : > { %v2295_v0 = vsel %vm1169_vm1, %v6560_v52, 0.0 }
 0x9a3   : > { %2296 = vadd.xlane.f32.xlu1 %v2295_v0  ;;  %4769 = vmatpush3.bf16.msra.mxu0 %v5336_v49  ;;  %v5338_v0 = vld [vmem:[%s7078_s18 + $0x28] sm:$0xff]  }
 0x9a4   : > { %4770 = vmatprep.subr.bf16.mxu0 %v5337_v51 }
 0x9a7   : > { %4771 = vmatpush3.bf16.msra.mxu0 %v5338_v0 }
 0xa28   : > { %v2294_v53 = vpop.xlane.xlu0 %2293 }
 0xa29   : > { %v2298_v54 = vmul.f32 0.015625, %v2294_v53  ;;  %v5339_v53 = vld [vmem:[%s7078_s18 + $0x60] sm:$0xff]  }
 0xa2a   : > { %4772 = vmatprep.subr.bf16.mxu0 %v5339_v53 }
 0xa2b   : > { %v2300_v55 = vsub.f32 %v6555_v45, %v2298_v54  ;;  %v5340_v54 = vld [vmem:[%s7078_s18 + $0x20] sm:$0xff]  }
 0xa2c   : > { %v2297_v20 = vpop.xlane.xlu1 %2296  ;;  %4773 = vmatpush3.bf16.msra.mxu0 %v5340_v54 }
 0xa2d   : > { %v2299_v56 = vmul.f32 0.015625, %v2297_v20  ;;  %v2302_v57 = vmul.f32 %v2300_v55, %v2300_v55  ;;  %v5342_v20 = vld [vmem:[%s7078_s18 + $0x18] sm:$0xff]  }
 0xa2f   : > { %v2301_v58 = vsub.f32 %v6560_v52, %v2299_v56  ;;  %v2304_v59 = vsel %vm1169_vm1, %v2302_v57, 0.0  ;;  %v5343_v56 = vld [vmem:[%s7078_s18 + $0x50] sm:$0xff]  }
 0xa30   : > { %2305 = vadd.xlane.f32.xlu0 %v2304_v59  ;;  %v5344_v57 = vld [vmem:[%s7078_s18 + $0x10] sm:$0xff]   ;;  %v5346_v59 = vld [vmem:[%s7078_s18 + $0x8] sm:$0xff]  }
 0xa31   : > { %v2303_v61 = vmul.f32 %v2301_v58, %v2301_v58 }
 0xa33   : > { %v2307_v29 = vsel %vm1169_vm1, %v2303_v61, 0.0  ;;  %v5347_v61 = vld [vmem:[%s7078_s18 + $0x40] sm:$0xff]  }
 0xa34   : > { %2308 = vadd.xlane.f32.xlu0 %v2307_v29  ;;  %v5348_v29 = vld [vmem:[%s7078_s18] sm:$0xff]  }
 0xa4a   : > { %2326 = vrot.lane.b32.xlu0 %v2287_v40, %s5934_s4  ;;  %v5329_v40 = vld [vmem:[%s7070_s10 + $0xb0] ss:$12 sps:$4 sm:$0xff]  }
 0xab9   : > { %v2306_v10 = vpop.xlane.xlu0 %2305 }
 0xaba   : > { %v2310_v12 = vmul.f32 0.015625, %v2306_v10 }
 0xabc   : > { %v2312_v13 = vadd.f32 1e-06, %v2310_v12 }
 0xabd   : > { %v2309_v14 = vpop.xlane.xlu0 %2308 }
 0xabe   : > { %5445 = vrsqrt.f32 %v2312_v13  ;;  %v2311_v15 = vmul.f32 0.015625, %v2309_v14 }
 0xac0   : > { %v2313_v16 = vadd.f32 1e-06, %v2311_v15 }
 0xac1   : > { %v2327_v28 = vpop.permute.xlu0 %2326 }
 0xac2   : > { %5447 = vrsqrt.f32 %v2313_v16 }
 0xacb   : > { %v5446_v18 = vpop.eup %5445 }
 0xacc   : > { %v2316_v19 = vmul.f32 %v5446_v18, %v2300_v55  ;;  %v5341_v55 = vld [vmem:[%s7078_s18 + $0x58] sm:$0xff]  }
 0xacd   : > { %4774 = vmatprep.subr.bf16.mxu0 %v5341_v55 }
 0xace   : > { %v2323_v25 = vmul.f32 %v2322_v22, %v2316_v19  ;;  %4775 = vmatpush3.bf16.msra.mxu0 %v5342_v20 }
 0xacf   : > { %v5448_v23 = vpop.eup %5447  ;;  %4776 = vmatprep.subr.bf16.mxu0 %v5343_v56 }
 0xad0   : > { %v2317_v24 = vmul.f32 %v5448_v23, %v2301_v58  ;;  %v2329_v30 = vadd.f32 %v2327_v28, %v2323_v25  ;;  %v5345_v58 = vld [vmem:[%s7078_s18 + $0x48] sm:$0xff]  }
 0xad2   : > { %v2324_v27 = vmul.f32 %v2322_v22, %v2317_v24  ;;  %4777 = vmatpush3.bf16.msra.mxu0 %v5344_v57 }
 0xad3   : > { %4778 = vmatprep.subr.bf16.mxu0 %v5345_v58 }
 0xad4   : > { %v2330_v31 = vadd.f32 %v2327_v28, %v2324_v27 }
 0xad6   : > { %v2339_v34 = vpack.c.bf16 %v2330_v31, %v2329_v30  ;;  %4779 = vmatpush3.bf16.msra.mxu0 %v5346_v59 }
 0xad7   : > { %4780 = vmatprep.subr.bf16.mxu0 %v5347_v61 }
 0xad8   : > { %4536 = vmatmul.mubr.msk.bf16.vlgmr.msra.gmra.mxu1 %vm1169_vm1, %v2339_v34 }
 0xad9   : > { %2784 = vmatpush1.bf16.msra.mxu1 %v5317_v32  ;;  %2807 = vmatprep.mubr.bf16.mxu1 %v5933_v1 }
 0xada   : > { %2785 = vmatprep.subr.bf16.mxu1 %v5322_v47  ;;  %4781 = vmatpush3.bf16.msra.mxu0 %v5348_v29  ;;  %v6696_v47 = vld [vmem:[#allocation10 + $0x3] sm:$0x7] }
 0xadb   : > { %v2771_v48 = vrot.slane %v6696_v47, %v1438_v50 }
 0xadd   : > { %2786 = vmatpush1.bf16.msra.mxu1 %v5320_v35 }
 0xade   : > { %2787 = vmatprep.subr.bf16.mxu1 %v5325_v36  ;;  %v2767_v36 = vrot.slane %v6696_v47, %v6297_v11 }
 0xae1   : > { %2788 = vmatpush1.bf16.msra.mxu1 %v5323_v37 }
 0xae2   : > { %2789 = vmatprep.subr.bf16.mxu1 %v5328_v38 }
 0xae5   : > { %2790 = vmatpush1.bf16.msra.mxu1 %v5326_v39 }
 0xae6   : > { %4944 = vmatprep.subr.bf16.mxu1 %v5931_v26 }
 0xae8   : > { %4582 = vmatmul.mubr.msk.bf16.vlgmr.msra.gmra.mxu1 %vm1169_vm1, %v6406_v33 }
 0xae9   : > { %4945 = vmatpush3.bf16.msra.mxu1 %v5329_v40  ;;  %4952 = vmatprep.mubr.msk.bf16.mxu1 %vm5932_vm0, %v5931_v26 }
 0xaea   : > { %4946 = vmatprep.subr.bf16.mxu1 %v5931_v26 }
 0xaed   : > { %4947 = vmatpush3.bf16.msra.mxu1 %v5330_v41 }
 0xaee   : > { %4948 = vmatprep.subr.bf16.mxu1 %v5931_v26 }
 0xaf1   : > { %4949 = vmatpush3.bf16.msra.mxu1 %v5331_v42 }
 0xaf2   : > { %4950 = vmatprep.subr.bf16.mxu1 %v5931_v26 }
 0xaf5   : > { %4951 = vmatpush3.bf16.msra.mxu1 %v5332_v43 }
 0xaf6   : > { %4956 = vmatprep.subr.bf16.mxu1 %v5931_v26 }
 0xaf8   : > { %4953 = vmatmul.mubr.msk.bf16.vlgmr.msra.gmra.mxu1 %vm1169_vm1, %v6406_v33 }
 0xaf9   : > { %4958 = vmatprep.mubr.msk.bf16.mxu1 %vm5932_vm0, %v5931_v26 }
 0xb98   : > { %v2429_v3 = vpop.f32.mrf.mxu1 }
 0xb99   : > { %v2430_v4 = vadd.f32 %v2429_v3, %v2345_v63 }
 0xb9a   : > { %v2431_v5 = vpop.f32.mrf.mxu1 }
 0xb9b   : > { %v2442_v6 = vmul.f32 0.044715, %v2430_v4  ;;  %v2432_v7 = vadd.f32 %v2431_v5, %v2349_v2  ;;  %v2438_v29 = vmul.f32 0.5, %v2430_v4 }
 0xb9c   : > { %v2433_v9 = vpop.f32.mrf.mxu1 }
 0xb9d   : > { %v2446_v10 = vmul.f32 %v2442_v6, %v2430_v4  ;;  %v2443_v12 = vmul.f32 0.044715, %v2432_v7  ;;  %v2434_v13 = vadd.f32 %v2433_v9, %v2345_v63  ;;  %v2439_v57 = vmul.f32 0.5, %v2432_v7 }
 0xb9e   : > { %v2435_v14 = vpop.f32.mrf.mxu1 }
 0xb9f   : > { %v2450_v15 = vmul.f32 %v2446_v10, %v2430_v4  ;;  %v2447_v16 = vmul.f32 %v2443_v12, %v2432_v7  ;;  %v2444_v17 = vmul.f32 0.044715, %v2434_v13  ;;  %v2436_v18 = vadd.f32 %v2435_v14, %v2349_v2  ;;  %v4537_v10 = vld [vmem:[#allocation16] ss:$0 sm:$0xff] }
 0xba0   : > { %v2440_v55 = vmul.f32 0.5, %v2434_v13 }
 0xba1   : > { %v2454_v19 = vadd.f32 %v2450_v15, %v2430_v4  ;;  %v2451_v22 = vmul.f32 %v2447_v16, %v2432_v7  ;;  %v2448_v23 = vmul.f32 %v2444_v17, %v2434_v13  ;;  %v2445_v24 = vmul.f32 0.044715, %v2436_v18 }
 0xba2   : > { %v2441_v58 = vmul.f32 0.5, %v2436_v18  ;;  %v2655_v17 = vrot.slane %v6449_v60, %v6319_v21  ;;  %v2763_v60 = vrot.slane %v6696_v47, %v6319_v21 }
 0xba3   : > { %v2452_v25 = vmul.f32 %v2448_v23, %v2434_v13  ;;  %v2449_v27 = vmul.f32 %v2445_v24, %v2436_v18  ;;  %v2455_v28 = vadd.f32 %v2451_v22, %v2432_v7  ;;  %v2458_v30 = vmul.f32 0.7978846, %v2454_v19 }
 0xba5   : > { %v2456_v31 = vadd.f32 %v2452_v25, %v2434_v13  ;;  %v2453_v32 = vmul.f32 %v2449_v27, %v2436_v18  ;;  %v2459_v34 = vmul.f32 0.7978846, %v2455_v28 }
 0xba7   : > { %v2460_v35 = vmul.f32 0.7978846, %v2456_v31  ;;  %v2457_v37 = vadd.f32 %v2453_v32, %v2436_v18  ;;  %5449 = vtanh.f32 %v2459_v34 }
 0xba8   : > { %5451 = vtanh.f32 %v2458_v30  ;;  %v2809_v38 = vpop.f32.mrf.mxu1 }
 0xba9   : > { %5453 = vtanh.f32 %v2460_v35  ;;  %v2461_v39 = vmul.f32 0.7978846, %v2457_v37  ;;  %v2810_v32 = vadd.f32 %v2809_v38, %v2763_v60 }
 0xbaa   : > { %v2811_v40 = vpop.f32.mrf.mxu1 }
 0xbab   : > { %v6700_v41 = vadd.f32 %v2811_v40, %v2767_v36  ;;  %5455 = vtanh.f32 %v2461_v39  ;;  %v2882_v34 = vadd.f32 1.0, %v2810_v32 }
 0xbac   : > { %v2813_v42 = vpop.f32.mrf.mxu1 }
 0xbae   : > { %v2814_v43 = vpop.f32.mrf.mxu1 }
 0xbb4   : > { %v5450_v44 = vpop.eup %5449 }
 0xbb5   : > { %v5452_v46 = vpop.eup %5451  ;;  %v2467_v51 = vadd.f32 1.0, %v5450_v44  ;;  %v5351_v44 = vld [vmem:[%s7072_s12 + $0x74] ss:$8 sps:$4 sm:$0xff]  }
 0xbb6   : > { %v5454_v49 = vpop.eup %5453  ;;  %v2466_v20 = vadd.f32 1.0, %v5452_v46  ;;  %v5349_v46 = vld [vmem:[%s7072_s12 + $0x70] ss:$8 sps:$4 sm:$0xff]   ;;  %2973 = vmatprep.subr.bf16.mxu0 %v5351_v44 }
 0xbb7   : > { %v2468_v0 = vadd.f32 1.0, %v5454_v49  ;;  %v2471_v63 = vmul.f32 %v2467_v51, %v2439_v57  ;;  %v5352_v49 = vld [vmem:[%s7072_s12 + $0x60] ss:$8 sps:$4 sm:$0xff]   ;;  %v5355_v51 = vld [vmem:[%s7072_s12 + $0x50] ss:$8 sps:$4 sm:$0xff]  }
 0xbb8   : > { %v5456_v53 = vpop.eup %5455  ;;  %v2850_v54 = vpop.f32.mrf.mxu1  ;;  %v2470_v3 = vmul.f32 %v2466_v20, %v2438_v29 }
 0xbb9   : > { %v6705_v56 = vadd.f32 %v2850_v54, %v2771_v48  ;;  %v2469_v59 = vadd.f32 1.0, %v5456_v53  ;;  %v2472_v62 = vmul.f32 %v2468_v0, %v2440_v55  ;;  %v5354_v48 = vld [vmem:[%s7072_s12 + $0x64] ss:$8 sps:$4 sm:$0xff]   ;;  %v5357_v0 = vld [vmem:[%s7072_s12 + $0x54] ss:$8 sps:$4 sm:$0xff]  }
 0xbba   : > { %v4954_v61 = vpop.f32.mrf.mxu1  ;;  %v5360_v53 = vld [vmem:[%s7072_s12 + $0x44] ss:$8 sps:$4 sm:$0xff]   ;;  %v5358_v54 = vld [vmem:[%s7072_s12 + $0x40] ss:$8 sps:$4 sm:$0xff]  }
 0xbbb   : > { %v2473_v2 = vmul.f32 %v2469_v59, %v2441_v58  ;;  %v2506_v6 = vpack.c.bf16 %v2472_v62, %v2470_v3 }
 0xbbc   : > { %v2853_v8 = vpop.f32.mrf.mxu1 }
 0xbbd   : > { %v2507_v50 = vpack.c.bf16 %v2473_v2, %v2471_v63 }
 0xbbe   : > { %v4955_v5 = vpop.f32.mrf.mxu1 }
 0xbbf   : > { %2643 = vmatprep.mubr.bf16.mxu0 %v2507_v50  ;;  %v2896_v50 = vrot.slane %v2810_v32, %v6319_v21 }
 0xbc0   : > { %2644 = vmatmul.mubr.bf16.vlgmr.msra.gmra.mxu0 %v2506_v6 }
 0xbc1   : > { %2997 = vmatprep.mubr.bf16.mxu0 %v5933_v1  ;;  %2974 = vmatpush1.bf16.msra.mxu0 %v5349_v46 }
 0xbc2   : > { %2975 = vmatprep.subr.bf16.mxu0 %v5354_v48 }
 0xbc5   : > { %2976 = vmatpush1.bf16.msra.mxu0 %v5352_v49 }
 0xbc6   : > { %2977 = vmatprep.subr.bf16.mxu0 %v5357_v0 }
 0xbc9   : > { %2978 = vmatpush1.bf16.msra.mxu0 %v5355_v51 }
 0xbca   : > { %2979 = vmatprep.subr.bf16.mxu0 %v5360_v53 }
 0xbcd   : > { %2980 = vmatpush1.bf16.msra.mxu0 %v5358_v54 }
 0xbce   : > { %4968 = vmatprep.subr.bf16.mxu0 %v5931_v26 }
 0xc80   : > { %v4782_v9 = vpop.f32.mrf.mxu0 }
 0xc82   : > { %v4783_v12 = vpop.f32.mrf.mxu0 }
 0xc83   : > { %v4784_v7 = vadd.f32 %v4783_v12, %v4782_v9  ;;  %v2910_v12 = vld [vmem:[#allocation11 + $0x2] sm:$0x3] }
 0xc84   : > { %v4785_v13 = vpop.f32.mrf.mxu0 }
 0xc85   : > { %v2646_v14 = vadd.f32 %v4784_v7, %v4537_v10 }
 0xc86   : > { %v4786_v15 = vpop.f32.mrf.mxu0 }
 0xc87   : > { %v4787_v4 = vadd.f32 %v4786_v15, %v4785_v13  ;;  %2658 = vrot.lane.b32.xlu1 %v2646_v14, %s5934_s4  ;;  %v2915_v13 = vrot.slane %v2910_v12, %v6319_v21 }
 0xc89   : > { %v2649_v16 = vadd.f32 %v4787_v4, %v4537_v10 }
 0xc8b   : > { %2660 = vrot.lane.b32.xlu1 %v2649_v16, %s5934_s4 }
 0xcf9   : > { %v2659_v18 = vpop.permute.xlu1 %2658 }
 0xcfa   : > { %v2664_v19 = vmul.f32 %v2659_v18, %v2655_v17 }
 0xcfc   : > { %2668 = vrot.lane.b32.xlu1 %v2664_v19, %s5934_s4 }
 0xcfd   : > { %v2661_v22 = vpop.permute.xlu1 %2660 }
 0xcfe   : > { %v2665_v23 = vmul.f32 %v2661_v22, %v2655_v17 }
 0xd00   : > { %2670 = vrot.lane.b32.xlu0 %v2665_v23, %s5934_s4 }
 0xd6e   : > { %v2669_v24 = vpop.permute.xlu1 %2668 }
 0xd6f   : > { %v6715_v25 = vadd.f32 %v2669_v24, %v6555_v45  ;;  %v2886_v45 = vrot.slane %v2882_v34, %v6319_v21 }
 0xd71   : > { %v2856_v27 = vsel %vm1169_vm1, %v6715_v25, 0.0 }
 0xd72   : > { %v2671_v28 = vpop.permute.xlu0 %2670  ;;  %2857 = vadd.xlane.f32.xlu1 %v2856_v27  ;;  %v2919_v27 = vrot.slane %v2910_v12, %v6297_v11 }
 0xd73   : > { %v6720_v30 = vadd.f32 %v2671_v28, %v6560_v52 }
 0xd75   : > { %v2859_v31 = vsel %vm1169_vm1, %v6720_v30, 0.0 }
 0xd76   : > { %2860 = vadd.xlane.f32.xlu0 %v2859_v31 }
 0xd83   : > { %2888 = vrot.lane.b32.xlu1 %v2886_v45, %s5934_s4 }
 0xdfb   : > { %v2858_v35 = vpop.xlane.xlu1 %2857 }
 0xdfc   : > { %v2862_v36 = vmul.f32 0.015625, %v2858_v35 }
 0xdfe   : > { %v2864_v37 = vsub.f32 %v6715_v25, %v2862_v36 }
 0xdff   : > { %v2861_v39 = vpop.xlane.xlu0 %2860  ;;  %v2889_v2 = vpop.permute.xlu1 %2888 }
 0xe00   : > { %v2863_v52 = vmul.f32 0.015625, %v2861_v39  ;;  %v2866_v40 = vmul.f32 %v2864_v37, %v2864_v37 }
 0xe02   : > { %v2865_v42 = vsub.f32 %v6720_v30, %v2863_v52  ;;  %v2868_v47 = vsel %vm1169_vm1, %v2866_v40, 0.0 }
 0xe03   : > { %2869 = vadd.xlane.f32.xlu0 %v2868_v47 }
 0xe04   : > { %v2867_v43 = vmul.f32 %v2865_v42, %v2865_v42 }
 0xe06   : > { %v2871_v38 = vsel %vm1169_vm1, %v2867_v43, 0.0 }
 0xe07   : > { %2872 = vadd.xlane.f32.xlu0 %v2871_v38 }
 0xe8c   : > { %v2870_v55 = vpop.xlane.xlu0 %2869 }
 0xe8d   : > { %v2874_v20 = vmul.f32 0.015625, %v2870_v55 }
 0xe8f   : > { %v2876_v57 = vadd.f32 1e-06, %v2874_v20 }
 0xe90   : > { %v2873_v58 = vpop.xlane.xlu0 %2872 }
 0xe91   : > { %5457 = vrsqrt.f32 %v2876_v57  ;;  %v2875_v59 = vmul.f32 0.015625, %v2873_v58 }
 0xe93   : > { %v2877_v61 = vadd.f32 1e-06, %v2875_v59 }
 0xe95   : > { %5459 = vrsqrt.f32 %v2877_v61 }
 0xe9e   : > { %v5458_v29 = vpop.eup %5457 }
 0xe9f   : > { %v2880_v62 = vmul.f32 %v5458_v29, %v2864_v37 }
 0xea1   : > { %v2891_v3 = vmul.f32 %v2889_v2, %v2880_v62 }
 0xea2   : > { %v5460_v63 = vpop.eup %5459 }
 0xea3   : > { %v2881_v8 = vmul.f32 %v5460_v63, %v2865_v42  ;;  %v2897_v6 = vadd.f32 %v2896_v50, %v2891_v3 }
 0xea5   : > { %v2892_v5 = vmul.f32 %v2889_v2, %v2881_v8 }
 0xea7   : > { %v2898_v9 = vadd.f32 %v2896_v50, %v2892_v5 }
 0xea9   : > { %v2908_v10 = vpack.c.bf16 %v2898_v9, %v2897_v6 }
 0xeab   : > { %4600 = vmatmul.mubr.msk.bf16.vlgmr.msra.gmra.mxu0 %vm1169_vm1, %v2908_v10 }
 0xeac   : > { %4970 = vmatprep.mubr.msk.bf16.mxu0 %vm5932_vm0, %v5931_v26 }
 0xf6b   : > { %v2999_v7 = vpop.f32.mrf.mxu0 }
 0xf6c   : > { %v3000_v4 = vadd.f32 %v2999_v7, %v2915_v13 }
 0xf6d   : > { %v3001_v14 = vpop.f32.mrf.mxu0 }
 0xf6e   : > { %v3002_v31 = vadd.f32 %v3001_v14, %v2919_v27 }
 0xf6f   : > { %v3003_v15 = vpop.f32.mrf.mxu0 }
 0xf70   : > { %v3004_v16 = vadd.f32 %v3003_v15, %v2915_v13 }
 0xf71   : > { %v3005_v22 = vpop.f32.mrf.mxu0 }
 0xf72   : > { %v3008_v17 = vpack.c.bf16 %v3004_v16, %v3000_v4  ;;  %v3006_v28 = vadd.f32 %v3005_v22, %v2919_v27 }
 0xf74   : > { %3131 = vrot.lane.b32.xlu1 %v3008_v17, %s5937_s29  ;;  %3010 = vrot.lane.b32.xlu0 %v3008_v17, %s5934_s4  ;;  %v6774_v32 = vpack.c.bf16 %v3006_v28, %v3002_v31 }
 0xf78   : > { %3129 = vrot.lane.b32.xlu1 %v3008_v17, %s5938_s8  ;;  %3253 = vrot.lane.b32.xlu0 %v3008_v17, %s5939_s3 }
 0xf7c   : > { %3255 = vrot.lane.b32.xlu1 %v3008_v17, %s7155_s26  ;;  %3376 = vrot.lane.b32.xlu0 %v3008_v17, %s7156_s30 }
 0xf80   : > { %3378 = vrot.lane.b32.xlu1 %v3008_v17, %s7157_s24 }
 0xfe6   : > { %v3132_v18 = vpop.permute.xlu1 %3131  ;;  %v3011_v19 = vpop.permute.xlu0 %3010 }
 0xfe7   : > { %v3137_v23 = vsel %vm1291_vm3, %v3132_v18, 0  ;;  %v3016_v24 = vsel %vm1291_vm3, %v3011_v19, 0 }
 0xfe8   : > { %4957 = vmatpush3.bf16.xpose.msra.mxu1 %v3016_v24  ;;  %4969 = vmatpush3.bf16.xpose.msra.mxu0 %v3137_v23 }
 0xfe9   : > { %4962 = vmatprep.subr.bf16.mxu1 %v5931_v26  ;;  %4980 = vmatprep.subr.bf16.mxu0 %v5931_v26 }
 0xfea   : > { %v3130_v60 = vpop.permute.xlu1 %3129  ;;  %v3254_v36 = vpop.permute.xlu0 %3253 }
 0xfee   : > { %v3256_v34 = vpop.permute.xlu1 %3255  ;;  %v3377_v39 = vpop.permute.xlu0 %3376 }
 0xfef   : > { %v3261_v45 = vsel %vm1291_vm3, %v3256_v34, 0  ;;  %4959 = vmatmul.mubr.msk.bf16.vlgmr.msra.gmra.mxu1 %vm1291_vm3, %v3008_v17  ;;  %4971 = vmatmul.mubr.msk.bf16.vlgmr.msra.gmra.mxu0 %vm1291_vm3, %v3130_v60 }
 0xff0   : > { %4963 = vmatpush3.bf16.msra.mxu1 %v6774_v32  ;;  %4981 = vmatpush3.bf16.xpose.msra.mxu0 %v3261_v45 }
 0xff1   : > { %4982 = vmatprep.mubr.msk.bf16.mxu0 %vm5932_vm0, %v5931_v26  ;;  %4992 = vmatprep.subr.bf16.mxu0 %v5931_v26 }
 0xff2   : > { %4964 = vmatprep.mubr.msk.bf16.mxu1 %vm5932_vm0, %v5931_v26  ;;  %4974 = vmatprep.subr.bf16.mxu1 %v5931_v26  ;;  %v3379_v35 = vpop.permute.xlu1 %3378 }
 0xff3   : > { %v3384_v37 = vsel %vm1291_vm3, %v3379_v35, 0 }
 0xff7   : > { %4983 = vmatmul.mubr.msk.bf16.vlgmr.msra.gmra.mxu0 %vm1291_vm3, %v3254_v36 }
 0xff8   : > { %4993 = vmatpush3.bf16.xpose.msra.mxu0 %v3384_v37  ;;  %4994 = vmatprep.mubr.msk.bf16.mxu0 %vm5932_vm0, %v5931_v26 }
 0xff9   : > { %5004 = vmatprep.subr.bf16.mxu0 %v5931_v26 }
 0xfff   : > { %4995 = vmatmul.mubr.msk.bf16.vlgmr.msra.gmra.mxu0 %vm1291_vm3, %v3377_v39 }
0x1000   : > { %5012 = vmatprep.mubr.msk.bf16.mxu0 %vm5932_vm0, %v5931_v26 }
0x10af   : > { %v3052_v52 = vpop.f32.mrf.mxu1  ;;  %v3173_v40 = vpop.f32.mrf.mxu0 }
0x10b0   : > { %v3059_v42 = vmul.f32 0.25, %v3052_v52  ;;  %v6795_v0 = vmul.f32 0.25, %v3173_v40 }
0x10b1   : > { %v4960_v47 = vpop.f32.mrf.mxu1  ;;  %v4972_v43 = vpop.f32.mrf.mxu0 }
0x10b2   : > { %v3061_v38 = vsel %vm1291_vm3, %v3059_v42, -inf  ;;  %v3182_v58 = vsel %vm1291_vm3, %v6795_v0, -inf }
0x10b3   : > { %v3176_v44 = vpop.f32.mrf.mxu0  ;;  %3062 = vmax.xlane.f32.xlu1 %v3061_v38  ;;  %v3055_v46 = vpop.f32.mrf.mxu1 }
0x10b4   : > { %v3060_v48 = vmul.f32 0.25, %v3055_v46  ;;  %v3181_v57 = vmul.f32 0.25, %v3176_v44 }
0x10b5   : > { %v4961_v49 = vpop.f32.mrf.mxu1  ;;  %v4973_v51 = vpop.f32.mrf.mxu0 }
0x10b6   : > { %v3064_v53 = vsel %vm1291_vm3, %v3060_v48, -inf  ;;  %v3185_v63 = vsel %vm1291_vm3, %v3181_v57, -inf }
0x10b7   : > { %3065 = vmax.xlane.f32.xlu0 %v3064_v53  ;;  %v3297_v54 = vpop.f32.mrf.mxu0 }
0x10b8   : > { %v6798_v55 = vmul.f32 0.25, %v3297_v54 }
0x10b9   : > { %v4984_v20 = vpop.f32.mrf.mxu0 }
0x10ba   : > { %v3306_v59 = vsel %vm1291_vm3, %v6798_v55, -inf }
0x10bb   : > { %3183 = vmax.xlane.f32.xlu0 %v3182_v58  ;;  %3307 = vmax.xlane.f32.xlu1 %v3306_v59  ;;  %v3300_v61 = vpop.f32.mrf.mxu0 }
0x10bc   : > { %v3305_v62 = vmul.f32 0.25, %v3300_v61 }
0x10bd   : > { %v4985_v29 = vpop.f32.mrf.mxu0 }
0x10be   : > { %v3309_v50 = vsel %vm1291_vm3, %v3305_v62, -inf }
0x10bf   : > { %3186 = vmax.xlane.f32.xlu0 %v3185_v63  ;;  %v3420_v2 = vpop.f32.mrf.mxu0 }
0x10c0   : > { %v3427_v8 = vmul.f32 0.25, %v3420_v2 }
0x10c1   : > { %v4996_v3 = vpop.f32.mrf.mxu0 }
0x10c2   : > { %v3429_v5 = vsel %vm1291_vm3, %v3427_v8, -inf }
0x10c3   : > { %3310 = vmax.xlane.f32.xlu0 %v3309_v50  ;;  %3430 = vmax.xlane.f32.xlu1 %v3429_v5  ;;  %v3423_v6 = vpop.f32.mrf.mxu0 }
0x10c4   : > { %v3428_v9 = vmul.f32 0.25, %v3423_v6 }
0x10c5   : > { %v4997_v10 = vpop.f32.mrf.mxu0 }
0x10c6   : > { %v3432_v12 = vsel %vm1291_vm3, %v3428_v9, -inf }
0x10c7   : > { %3433 = vmax.xlane.f32.xlu0 %v3432_v12 }
0x113c   : > { %v3063_v7 = vpop.xlane.xlu1 %3062 }
0x113d   : > { %v3067_v13 = vsub.f32 %v3059_v42, %v3063_v7 }
0x113f   : > { %v3069_v14 = vmul.f32 1.442695, %v3067_v13 }
0x1140   : > { %v3066_v15 = vpop.xlane.xlu0 %3065 }
0x1141   : > { %5461 = vpow2.f32 %v3069_v14  ;;  %v3068_v4 = vsub.f32 %v3060_v48, %v3066_v15 }
0x1143   : > { %v3071_v16 = vmul.f32 1.442695, %v3068_v4 }
0x1144   : > { %v3184_v17 = vpop.xlane.xlu0 %3183  ;;  %v3308_v38 = vpop.xlane.xlu1 %3307 }
0x1145   : > { %5463 = vpow2.f32 %v3071_v16  ;;  %v3188_v43 = vsub.f32 %v6795_v0, %v3184_v17  ;;  %v3312_v44 = vsub.f32 %v6798_v55, %v3308_v38 }
0x1147   : > { %v3190_v46 = vmul.f32 1.442695, %v3188_v43  ;;  %v3314_v49 = vmul.f32 1.442695, %v3312_v44  ;;  %v5363_v43 = vld [vmem:[%s7074_s14 + $0x28] sm:$0xff]  }
0x1148   : > { %v3187_v18 = vpop.xlane.xlu0 %3186 }
0x1149   : > { %v3189_v19 = vsub.f32 %v3181_v57, %v3187_v18 }
0x114b   : > { %v3192_v22 = vmul.f32 1.442695, %v3189_v19 }
0x114c   : > { %v3311_v23 = vpop.xlane.xlu0 %3310  ;;  %v3431_v48 = vpop.xlane.xlu1 %3430 }
0x114d   : > { %5465 = vpow2.f32 %v3192_v22  ;;  %v3313_v24 = vsub.f32 %v3305_v62, %v3311_v23  ;;  %v3435_v51 = vsub.f32 %v3427_v8, %v3431_v48  ;;  %v5364_v48 = vld [vmem:[%s7074_s14 + $0x20] sm:$0xff]  }
0x114e   : > { %v5462_v27 = vpop.eup %5461 }
0x114f   : > { %v3316_v28 = vmul.f32 1.442695, %v3313_v24  ;;  %v3073_v60 = vsel %vm1291_vm3, %v5462_v27, 0.0  ;;  %v3437_v53 = vmul.f32 1.442695, %v3435_v51 }
0x1150   : > { %3074 = vadd.xlane.f32.xlu1 %v3073_v60  ;;  %v3434_v31 = vpop.xlane.xlu0 %3433 }
0x1151   : > { %v3436_v34 = vsub.f32 %v3428_v9, %v3434_v31  ;;  %5467 = vpow2.f32 %v3316_v28 }
0x1152   : > { %v5464_v45 = vpop.eup %5463 }
0x1153   : > { %v3439_v35 = vmul.f32 1.442695, %v3436_v34  ;;  %v3076_v36 = vsel %vm1291_vm3, %v5464_v45, 0.0 }
0x1154   : > { %3077 = vadd.xlane.f32.xlu0 %v3076_v36 }
0x1155   : > { %5469 = vpow2.f32 %v3439_v35 }
0x1156   : > { %5471 = vpow2.f32 %v3190_v46 }
0x1157   : > { %5473 = vpow2.f32 %v3314_v49 }
0x1158   : > { %5475 = vpow2.f32 %v3437_v53 }
0x115a   : > { %v5466_v37 = vpop.eup %5465 }
0x115b   : > { %v3197_v39 = vsel %vm1291_vm3, %v5466_v37, 0.0 }
0x115c   : > { %3198 = vadd.xlane.f32.xlu0 %v3197_v39 }
0x115e   : > { %v6811_v52 = vpop.eup %5467 }
0x115f   : > { %v3321_v40 = vsel %vm1291_vm3, %v6811_v52, 0.0 }
0x1160   : > { %3322 = vadd.xlane.f32.xlu0 %v3321_v40 }
0x1161   : > { %3206 = vrot.lane.b32.xlu1 %v6774_v32, %s5938_s8 }
0x1162   : > { %v6817_v42 = vpop.eup %5469 }
0x1163   : > { %v3444_v47 = vsel %vm1291_vm3, %v6817_v42, 0.0  ;;  %v5472_v54 = vpop.eup %5471 }
0x1164   : > { %3445 = vadd.xlane.f32.xlu0 %v3444_v47  ;;  %v3194_v20 = vsel %vm1291_vm3, %v5472_v54, 0.0  ;;  %v5474_v57 = vpop.eup %5473 }
0x1165   : > { %v3318_v0 = vsel %vm1291_vm3, %v5474_v57, 0.0  ;;  %v5476_v58 = vpop.eup %5475 }
0x1166   : > { %v3441_v55 = vsel %vm1291_vm3, %v5476_v58, 0.0 }
0x117a   : > { %3329 = vrot.lane.b32.xlu0 %v6774_v32, %s5939_s3  ;;  %s7159_s3 = sld [smem:[#allocation37_spill]] }
0x1180   : > { %p7161_p2 = scmp.ne.s32.totalorder %s7159_s3, 0 }
0x1185   : > { %3195 = vadd.xlane.f32.xlu1 %v3194_v20 }
0x1189   : > { %3319 = vadd.xlane.f32.xlu1 %v3318_v0 }
0x118d   : > { %3442 = vadd.xlane.f32.xlu1 %v3441_v55 }
0x119e   : > { %3452 = vrot.lane.b32.xlu1 %v6774_v32, %s7156_s30 }
0x11d9   : > { %v3075_v59 = vpop.xlane.xlu1 %3074 }
0x11da   : > { %5477 = vrcp.f32 %v3075_v59 }
0x11dd   : > { %v3078_v61 = vpop.xlane.xlu0 %3077  ;;  %v3207_v3 = vpop.permute.xlu1 %3206 }
0x11de   : > { %5479 = vrcp.f32 %v3078_v61 }
0x11e5   : > { %v3199_v50 = vpop.xlane.xlu0 %3198 }
0x11e6   : > { %5481 = vrcp.f32 %v3199_v50 }
0x11e7   : > { %v5478_v29 = vpop.eup %5477 }
0x11e8   : > { %v3081_v63 = vmul.f32 %v5478_v29, %v5462_v27 }
0x11e9   : > { %v3323_v5 = vpop.xlane.xlu0 %3322 }
0x11eb   : > { %v5480_v62 = vpop.eup %5479 }
0x11ec   : > { %v3082_v2 = vmul.f32 %v5480_v62, %v5464_v45 }
0x11ed   : > { %v3446_v12 = vpop.xlane.xlu0 %3445 }
0x11ee   : > { %v3083_v8 = vpack.c.bf16 %v3082_v2, %v3081_v63 }
0x11f0   : > { %4965 = vmatmul.mubr.msk.bf16.vlgmr.msra.gmra.mxu1 %vm1291_vm3, %v3083_v8 }
0x11f1   : > { %4975 = vmatpush3.bf16.msra.mxu1 %v3207_v3  ;;  %4976 = vmatprep.mubr.msk.bf16.mxu1 %vm5932_vm0, %v5931_v26  ;;  %v3330_v16 = vpop.permute.xlu0 %3329 }
0x11f2   : > { %4986 = vmatprep.subr.bf16.mxu1 %v5931_v26 }
0x11f3   : > { %v5482_v10 = vpop.eup %5481 }
0x11f4   : > { %v3203_v14 = vmul.f32 %v5482_v10, %v5466_v37  ;;  %v5361_v37 = vld [vmem:[%s7074_s14 + $0x38] sm:$0xff]  }
0x11f5   : > { %5005 = vmatpush3.bf16.msra.mxu0 %v5361_v37  ;;  %v5367_v37 = vld [vmem:[%s7076_s16 + $0x74] ss:$8 sps:$4 sm:$0xff]  }
0x11f6   : > { %5006 = vmatprep.subr.bf16.mxu0 %v5931_v26 }
0x120e   : > { %v3196_v32 = vpop.xlane.xlu1 %3195 }
0x120f   : > { %5483 = vrcp.f32 %v3196_v32 }
0x1212   : > { %v3320_v6 = vpop.xlane.xlu1 %3319 }
0x1213   : > { %5485 = vrcp.f32 %v3320_v6 }
0x1214   : > { %5487 = vrcp.f32 %v3323_v5 }
0x1216   : > { %v3443_v9 = vpop.xlane.xlu1 %3442 }
0x1217   : > { %5489 = vrcp.f32 %v3443_v9 }
0x1218   : > { %5491 = vrcp.f32 %v3446_v12  ;;  %v4617_v12 = vld [vmem:[#allocation13 + $0x1] ss:$0 sm:$0xff] }
0x121a   : > { %v3453_v24 = vpop.permute.xlu1 %3452 }
0x121c   : > { %v5484_v7 = vpop.eup %5483 }
0x121d   : > { %v3202_v13 = vmul.f32 %v5484_v7, %v5472_v54 }
0x121f   : > { %v3204_v15 = vpack.c.bf16 %v3203_v14, %v3202_v13  ;;  %v3618_v13 = vrot.slane %v6700_v41, %v6319_v21 }
0x1220   : > { %v5486_v4 = vpop.eup %5485 }
0x1221   : > { %4977 = vmatmul.mubr.msk.bf16.vlgmr.msra.gmra.mxu1 %vm1291_vm3, %v3204_v15  ;;  %v5488_v17 = vpop.eup %5487  ;;  %v3326_v18 = vmul.f32 %v5486_v4, %v5474_v57 }
0x1222   : > { %4987 = vmatpush3.bf16.msra.mxu1 %v3330_v16  ;;  %4988 = vmatprep.mubr.msk.bf16.mxu1 %vm5932_vm0, %v5931_v26  ;;  %v3327_v19 = vmul.f32 %v5488_v17, %v6811_v52 }
0x1223   : > { %4998 = vmatprep.subr.bf16.mxu1 %v5931_v26 }
0x1224   : > { %v3328_v22 = vpack.c.bf16 %v3327_v19, %v3326_v18  ;;  %v5490_v23 = vpop.eup %5489 }
0x1225   : > { %v5492_v27 = vpop.eup %5491  ;;  %v3449_v28 = vmul.f32 %v5490_v23, %v5476_v58 }
0x1226   : > { %v3450_v60 = vmul.f32 %v5492_v27, %v6817_v42  ;;  %v5362_v42 = vld [vmem:[%s7074_s14 + $0x30] sm:$0xff]  }
0x1227   : > { %5007 = vmatpush3.bf16.msra.mxu0 %v5362_v42  ;;  %v5373_v42 = vld [vmem:[%s7076_s16 + $0x54] ss:$8 sps:$4 sm:$0xff]  }
0x1228   : > { %v3451_v31 = vpack.c.bf16 %v3450_v60, %v3449_v28  ;;  %5008 = vmatprep.subr.bf16.mxu0 %v5931_v26 }
0x1229   : > { %4989 = vmatmul.mubr.msk.bf16.vlgmr.msra.gmra.mxu1 %vm1291_vm3, %v3328_v22 }
0x122a   : > { %4999 = vmatpush3.bf16.msra.mxu1 %v3453_v24  ;;  %5000 = vmatprep.mubr.msk.bf16.mxu1 %vm5932_vm0, %v5931_v26 }
0x122b   : > { %5009 = vmatpush3.bf16.msra.mxu0 %v5363_v43  ;;  %3736 = vmatprep.subr.bf16.mxu1 %v5367_v37  ;;  %v5374_v43 = vld [vmem:[%s7076_s16 + $0x40] ss:$8 sps:$4 sm:$0xff]  }
0x122c   : > { %5010 = vmatprep.subr.bf16.mxu0 %v5931_v26 }
0x122f   : > { %5011 = vmatpush3.bf16.msra.mxu0 %v5364_v48 }
0x1231   : > { %5001 = vmatmul.mubr.msk.bf16.vlgmr.msra.gmra.mxu1 %vm1291_vm3, %v3451_v31 }
0x1232   : > { %3760 = vmatprep.mubr.bf16.mxu1 %v5933_v1 }
0x12b0   : > { %v3122_v34 = vpop.f32.mrf.mxu1 }
0x12b2   : > { %v4966_v45 = vpop.f32.mrf.mxu1 }
0x12b4   : > { %v3125_v35 = vpop.f32.mrf.mxu1 }
0x12b6   : > { %v4967_v36 = vpop.f32.mrf.mxu1 }
0x12e1   : > { %v3246_v39 = vpop.f32.mrf.mxu1 }
0x12e3   : > { %v4978_v52 = vpop.f32.mrf.mxu1 }
0x12e4   : > { %v5370_v52 = vld [vmem:[%s7076_s16 + $0x64] ss:$8 sps:$4 sm:$0xff]  }
0x12e5   : > { %v3249_v40 = vpop.f32.mrf.mxu1 }
0x12e6   : > { %v5235_v47 = vpack.i.bf16 %v3249_v40, %v3246_v39  ;;  %v5365_v39 = vld [vmem:[%s7076_s16 + $0x70] ss:$8 sps:$4 sm:$0xff]   ;;  %v5368_v40 = vld [vmem:[%s7076_s16 + $0x60] ss:$8 sps:$4 sm:$0xff]  }
0x12e7   : > { %v4979_v1 = vpop.f32.mrf.mxu1  ;;  %3737 = vmatpush1.bf16.msra.mxu1 %v5365_v39 }
0x12e8   : > { %5236 = vrot.lane.b32.xlu1 %v5235_v47, %s7157_s24  ;;  %3738 = vmatprep.subr.bf16.mxu1 %v5370_v52  ;;  %v5371_v47 = vld [vmem:[%s7076_s16 + $0x50] ss:$8 sps:$4 sm:$0xff]   ;;  %v5376_v1 = vld [vmem:[%s7076_s16 + $0x44] ss:$8 sps:$4 sm:$0xff]  }
0x12e9   : > { %v3369_v38 = vpop.f32.mrf.mxu1 }
0x12eb   : > { %v4990_v44 = vpop.f32.mrf.mxu1  ;;  %3739 = vmatpush1.bf16.msra.mxu1 %v5368_v40 }
0x12ec   : > { %3740 = vmatprep.subr.bf16.mxu1 %v5373_v42 }
0x12ed   : > { %v3372_v46 = vpop.f32.mrf.mxu1 }
0x12ee   : > { %v5240_v49 = vpack.i.bf16 %v3372_v46, %v3369_v38 }
0x12ef   : > { %v4991_v51 = vpop.f32.mrf.mxu1  ;;  %3741 = vmatpush1.bf16.msra.mxu1 %v5371_v47 }
0x12f0   : > { %5241 = vrot.lane.b32.xlu1 %v5240_v49, %s7155_s26  ;;  %3742 = vmatprep.subr.bf16.mxu1 %v5376_v1  ;;  %s5941_s26 = smov [#allocation22]  }
0x12f1   : > { %v3492_v53 = vpop.f32.mrf.mxu1  ;;  %s5825_s30 = sshll.u32 %s5941_s26, 4  ;;  %s5826_s30 = int_to_ptr.vmem [resolvable:$false] %s5825_s30 }
0x12f3   : > { %v5002_v54 = vpop.f32.mrf.mxu1  ;;  %3743 = vmatpush1.bf16.msra.mxu1 %v5374_v43 }
0x12f4   : > { %5016 = vmatprep.subr.bf16.mxu1 %v5931_v26 }
0x12f5   : > { %v3495_v20 = vpop.f32.mrf.mxu1 }
0x12f6   : > { %v5245_v57 = vpack.i.bf16 %v3495_v20, %v3492_v53  ;;  %v3649_v53 = vadd.f32 1.0, %v6705_v56 }
0x12f7   : > { %v5003_v0 = vpop.f32.mrf.mxu1 }
0x12f8   : > { %5246 = vrot.lane.b32.xlu0 %v5245_v57, %s5937_s29  ;;  %v3653_v57 = vrot.slane %v3649_v53, %v6319_v21  ;;  %s7017_s29 = scalar_lea.hbm %s7160_s0, %s4707_s27 }
0x135a   : > { %v5237_v58 = vpop.permute.xlu1 %5236 }
0x135b   : > { %v5239_v59 = vunpack.i.h.bf16 %v5237_v58  ;;  %v5238_v61 = vunpack.i.l.bf16 %v5237_v58 }
0x135d   : > { %v3524_v2 = vsel %vm1291_vm3, %v3125_v35, %v5239_v59  ;;  %v3523_v8 = vsel %vm1291_vm3, %v3122_v34, %v5238_v61 }
0x1362   : > { %v5242_v55 = vpop.permute.xlu1 %5241 }
0x1363   : > { %v5244_v29 = vunpack.i.h.bf16 %v5242_v55  ;;  %v5243_v62 = vunpack.i.l.bf16 %v5242_v55 }
0x1365   : > { %v3526_v32 = vsel %vm1240_vm2, %v3524_v2, %v5244_v29  ;;  %v3525_v5 = vsel %vm1240_vm2, %v3523_v8, %v5243_v62  ;;  %v5378_v8 = vld [vmem:[#allocation17 + $0x10] sm:$0xff]  }
0x136a   : > { %v5247_v63 = vpop.permute.xlu0 %5246 }
0x136b   : > { %v5249_v3 = vunpack.i.h.bf16 %v5247_v63  ;;  %v5248_v50 = vunpack.i.l.bf16 %v5247_v63  ;;  %v5377_v63 = vld [vmem:[#allocation17 + $0x18] sm:$0xff]  }
0x136d   : > { %v3528_v6 = vsel %vm2197_vm4, %v3526_v32, %v5249_v3  ;;  %v3527_v9 = vsel %vm2197_vm4, %v3525_v5, %v5248_v50  ;;  %v5379_v3 = vld [vmem:[#allocation17 + $0x8] sm:$0xff]   ;;  %v5380_v50 = vld [vmem:[#allocation17] sm:$0xff]   ;;  %v5381_v32 = vld [vmem:[%s7078_s18 + $0xf8] sm:$0xff]  }
0x136e   : > { %v3538_v10 = vpack.c.bf16 %v3528_v6, %v3527_v9  ;;  %v5382_v5 = vld [vmem:[%s7078_s18 + $0xb8] sm:$0xff]   ;;  %4814 = vmatprep.subr.bf16.mxu0 %v5381_v32  ;;  %v5383_v6 = vld [vmem:[%s7078_s18 + $0xf0] sm:$0xff]   ;;  %v5385_v9 = vld [vmem:[%s7078_s18 + $0xe8] sm:$0xff]  }
0x1370   : > { %5013 = vmatmul.mubr.msk.bf16.vlgmr.msra.gmra.mxu0 %vm1169_vm1, %v3538_v10  ;;  %v5386_v10 = vld [vmem:[%s7078_s18 + $0xa8] sm:$0xff]  }
0x1371   : > { %4815 = vmatpush3.bf16.msra.mxu0 %v5382_v5 }
0x1372   : > { %4816 = vmatprep.subr.bf16.mxu0 %v5383_v6 }
0x1430   : > { %v3608_v7 = vpop.f32.mrf.mxu0 }
0x1431   : > { %v3609_v14 = vadd.f32 %v4617_v12, %v3608_v7  ;;  %v5388_v7 = vld [vmem:[%s7078_s18 + $0xa0] sm:$0xff]  }
0x1432   : > { %v5014_v15 = vpop.f32.mrf.mxu0 }
0x1433   : > { %v3619_v4 = vmul.f32 %v3618_v13, %v3609_v14  ;;  %v5390_v14 = vld [vmem:[%s7078_s18 + $0x98] sm:$0xff]   ;;  %v5391_v15 = vld [vmem:[%s7078_s18 + $0xd0] sm:$0xff]  }
0x1434   : > { %v3611_v16 = vpop.f32.mrf.mxu0 }
0x1435   : > { %v6873_v17 = vadd.f32 %v3619_v4, %v6715_v25  ;;  %v3612_v18 = vadd.f32 %v4617_v12, %v3611_v16  ;;  %v5387_v12 = vld [vmem:[%s7078_s18 + $0xe0] sm:$0xff]   ;;  %v5392_v4 = vld [vmem:[%s7078_s18 + $0x90] sm:$0xff]   ;;  %v5393_v16 = vld [vmem:[%s7078_s18 + $0xc8] sm:$0xff]  }
0x1436   : > { %v5015_v19 = vpop.f32.mrf.mxu0 }
0x1437   : > { %v3620_v22 = vmul.f32 %v3618_v13, %v3612_v18  ;;  %v3623_v23 = vsel %vm1169_vm1, %v6873_v17, 0.0  ;;  %v5394_v18 = vld [vmem:[%s7078_s18 + $0x88] sm:$0xff]   ;;  %v5395_v19 = vld [vmem:[%s7078_s18 + $0xc0] sm:$0xff]  }
0x1438   : > { %3624 = vadd.xlane.f32.xlu1 %v3623_v23  ;;  %v3673_v23 = vld [vmem:[#allocation14 + $0x2] sm:$0x3] }
0x1439   : > { %v6878_v24 = vadd.f32 %v3620_v22, %v6720_v30  ;;  %v5396_v22 = vld [vmem:[%s7078_s18 + $0x80] sm:$0xff]  }
0x143b   : > { %v3626_v41 = vsel %vm1169_vm1, %v6878_v24, 0.0 }
0x143c   : > { %3627 = vadd.xlane.f32.xlu0 %v3626_v41  ;;  %v3678_v41 = vrot.slane %v3673_v23, %v6319_v21 }
0x1449   : > { %3657 = vrot.lane.b32.xlu1 %v3618_v13, %s5934_s4  ;;  %v5389_v13 = vld [vmem:[%s7078_s18 + $0xd8] sm:$0xff]  }
0x14c1   : > { %v3625_v27 = vpop.xlane.xlu1 %3624 }
0x14c2   : > { %v3629_v28 = vmul.f32 0.015625, %v3625_v27  ;;  %v3682_v27 = vrot.slane %v3673_v23, %v6297_v11 }
0x14c4   : > { %v3631_v25 = vsub.f32 %v6873_v17, %v3629_v28 }
0x14c5   : > { %v3628_v60 = vpop.xlane.xlu0 %3627  ;;  %v3658_v61 = vpop.permute.xlu1 %3657 }
0x14c6   : > { %v3630_v31 = vmul.f32 0.015625, %v3628_v60  ;;  %v3633_v34 = vmul.f32 %v3631_v25, %v3631_v25 }
0x14c8   : > { %v3632_v45 = vsub.f32 %v6878_v24, %v3630_v31  ;;  %v3635_v35 = vsel %vm1169_vm1, %v3633_v34, 0.0 }
0x14c9   : > { %3636 = vadd.xlane.f32.xlu0 %v3635_v35 }
0x14ca   : > { %v3634_v30 = vmul.f32 %v3632_v45, %v3632_v45 }
0x14cc   : > { %v3638_v36 = vsel %vm1169_vm1, %v3634_v30, 0.0 }
0x14cd   : > { %3639 = vadd.xlane.f32.xlu0 %v3638_v36 }
0x1552   : > { %v3637_v38 = vpop.xlane.xlu0 %3636 }
0x1553   : > { %v3641_v44 = vmul.f32 0.015625, %v3637_v38 }
0x1555   : > { %v3643_v46 = vadd.f32 1e-06, %v3641_v44 }
0x1556   : > { %v3640_v48 = vpop.xlane.xlu0 %3639 }
0x1557   : > { %5493 = vrsqrt.f32 %v3643_v46  ;;  %v3642_v49 = vmul.f32 0.015625, %v3640_v48 }
0x1559   : > { %v3644_v51 = vadd.f32 1e-06, %v3642_v49 }
0x155b   : > { %5495 = vrsqrt.f32 %v3644_v51 }
0x1564   : > { %v5494_v54 = vpop.eup %5493 }
0x1565   : > { %v3647_v20 = vmul.f32 %v5494_v54, %v3631_v25 }
0x1567   : > { %v3654_v55 = vmul.f32 %v3653_v57, %v3647_v20 }
0x1568   : > { %v5496_v0 = vpop.eup %5495 }
0x1569   : > { %v3648_v58 = vmul.f32 %v5496_v0, %v3632_v45  ;;  %v3660_v29 = vadd.f32 %v3658_v61, %v3654_v55 }
0x156b   : > { %v3655_v59 = vmul.f32 %v3653_v57, %v3648_v58 }
0x156d   : > { %v3661_v62 = vadd.f32 %v3658_v61, %v3655_v59 }
0x156f   : > { %v3671_v2 = vpack.c.bf16 %v3661_v62, %v3660_v29 }
0x1571   : > { %4639 = vmatmul.mubr.msk.bf16.vlgmr.msra.gmra.mxu1 %vm1169_vm1, %v3671_v2 }
0x1572   : > { %5017 = vmatpush3.bf16.msra.mxu1 %v5377_v63  ;;  %5024 = vmatprep.mubr.msk.bf16.mxu1 %vm5932_vm0, %v5931_v26 }
0x1573   : > { %5018 = vmatprep.subr.bf16.mxu1 %v5931_v26 }
0x1576   : > { %5019 = vmatpush3.bf16.msra.mxu1 %v5378_v8 }
0x1577   : > { %5020 = vmatprep.subr.bf16.mxu1 %v5931_v26 }
0x157a   : > { %5021 = vmatpush3.bf16.msra.mxu1 %v5379_v3 }
0x157b   : > { %5022 = vmatprep.subr.bf16.mxu1 %v5931_v26 }
0x157e   : > { %5023 = vmatpush3.bf16.msra.mxu1 %v5380_v50 }
0x157f   : > { %5028 = vmatprep.subr.bf16.mxu1 %v5931_v26 }
0x1581   : > { %5025 = vmatmul.mubr.msk.bf16.vlgmr.msra.gmra.mxu1 %vm1169_vm1, %v6406_v33  ;;  %v5384_v33 = vld [vmem:[%s7078_s18 + $0xb0] sm:$0xff]  }
0x1582   : > { %5036 = vmatprep.mubr.msk.bf16.mxu1 %vm5932_vm0, %v5931_v26  ;;  %4817 = vmatpush3.bf16.msra.mxu0 %v5384_v33 }
0x1583   : > { %4818 = vmatprep.subr.bf16.mxu0 %v5385_v9 }
0x1586   : > { %4819 = vmatpush3.bf16.msra.mxu0 %v5386_v10 }
0x1587   : > { %4820 = vmatprep.subr.bf16.mxu0 %v5387_v12 }
0x158a   : > { %4821 = vmatpush3.bf16.msra.mxu0 %v5388_v7 }
0x158b   : > { %4822 = vmatprep.subr.bf16.mxu0 %v5389_v13 }
0x158e   : > { %4823 = vmatpush3.bf16.msra.mxu0 %v5390_v14 }
0x158f   : > { %4824 = vmatprep.subr.bf16.mxu0 %v5391_v15 }
0x1592   : > { %4825 = vmatpush3.bf16.msra.mxu0 %v5392_v4  ;;  %v4672_v4 = vld [vmem:[#allocation16 + $0x1] ss:$0 sm:$0xff] }
0x1593   : > { %4826 = vmatprep.subr.bf16.mxu0 %v5393_v16 }
0x1596   : > { %4827 = vmatpush3.bf16.msra.mxu0 %v5394_v18 }
0x1597   : > { %4828 = vmatprep.subr.bf16.mxu0 %v5395_v19 }
0x159a   : > { %4829 = vmatpush3.bf16.msra.mxu0 %v5396_v22 }
0x1631   : > { %v3762_v28 = vpop.f32.mrf.mxu1 }
0x1632   : > { %v3763_v25 = vadd.f32 %v3762_v28, %v3678_v41  ;;  %v3990_v28 = vrot.slane %v6705_v56, %v6319_v21 }
0x1633   : > { %v3764_v60 = vpop.f32.mrf.mxu1 }
0x1634   : > { %v3775_v31 = vmul.f32 0.044715, %v3763_v25  ;;  %v3765_v34 = vadd.f32 %v3764_v60, %v3682_v27  ;;  %v3771_v33 = vmul.f32 0.5, %v3763_v25 }
0x1635   : > { %v3766_v45 = vpop.f32.mrf.mxu1 }
0x1636   : > { %v3779_v35 = vmul.f32 %v3775_v31, %v3763_v25  ;;  %v3776_v30 = vmul.f32 0.044715, %v3765_v34  ;;  %v3767_v36 = vadd.f32 %v3766_v45, %v3678_v41  ;;  %v3772_v32 = vmul.f32 0.5, %v3765_v34 }
0x1637   : > { %v3768_v37 = vpop.f32.mrf.mxu1 }
0x1638   : > { %v3783_v39 = vmul.f32 %v3779_v35, %v3763_v25  ;;  %v3780_v52 = vmul.f32 %v3776_v30, %v3765_v34  ;;  %v3777_v40 = vmul.f32 0.044715, %v3767_v36  ;;  %v3769_v42 = vadd.f32 %v3768_v37, %v3682_v27 }
0x1639   : > { %v3773_v3 = vmul.f32 0.5, %v3767_v36 }
0x163a   : > { %v3787_v47 = vadd.f32 %v3783_v39, %v3763_v25  ;;  %v3784_v1 = vmul.f32 %v3780_v52, %v3765_v34  ;;  %v3781_v43 = vmul.f32 %v3777_v40, %v3767_v36  ;;  %v3778_v38 = vmul.f32 0.044715, %v3769_v42 }
0x163b   : > { %v3774_v5 = vmul.f32 0.5, %v3769_v42 }
0x163c   : > { %v3785_v44 = vmul.f32 %v3781_v43, %v3767_v36  ;;  %v3782_v11 = vmul.f32 %v3778_v38, %v3769_v42  ;;  %v3788_v46 = vadd.f32 %v3784_v1, %v3765_v34  ;;  %v3791_v48 = vmul.f32 0.7978846, %v3787_v47 }
0x163e   : > { %v3789_v49 = vadd.f32 %v3785_v44, %v3767_v36  ;;  %v3786_v51 = vmul.f32 %v3782_v11, %v3769_v42  ;;  %v3792_v53 = vmul.f32 0.7978846, %v3788_v46  ;;  %v4019_v11 = vld [vmem:[#allocation19] sm:$0x1] }
0x1640   : > { %v3793_v54 = vmul.f32 0.7978846, %v3789_v49  ;;  %v3790_v20 = vadd.f32 %v3786_v51, %v3769_v42  ;;  %5497 = vtanh.f32 %v3792_v53  ;;  %v5397_v49 = vld [vmem:[%s7082_s22 + $0x18] sm:$0xff]   ;;  %v5398_v51 = vld [vmem:[%s7082_s22 + $0x10] sm:$0xff]   ;;  %v5399_v53 = vld [vmem:[%s7082_s22 + $0x8] sm:$0xff]  }
0x1641   : > { %5499 = vtanh.f32 %v3791_v48  ;;  %v6975_v57 = vpop.f32.mrf.mxu1  ;;  %5029 = vmatpush3.bf16.msra.mxu1 %v5397_v49 }
0x1642   : > { %5501 = vtanh.f32 %v3793_v54  ;;  %v3794_v0 = vmul.f32 0.7978846, %v3790_v20  ;;  %5030 = vmatprep.subr.bf16.mxu1 %v5931_v26  ;;  %v5400_v54 = vld [vmem:[%s7082_s22] sm:$0xff]  }
0x1643   : > { %v5026_v58 = vpop.f32.mrf.mxu1 }
0x1644   : > { %5503 = vtanh.f32 %v3794_v0 }
0x1645   : > { %v4081_v55 = vpop.f32.mrf.mxu1  ;;  %5031 = vmatpush3.bf16.msra.mxu1 %v5398_v51 }
0x1646   : > { %5032 = vmatprep.subr.bf16.mxu1 %v5931_v26 }
0x1647   : > { %v5027_v59 = vpop.f32.mrf.mxu1 }
0x1649   : > { %5033 = vmatpush3.bf16.msra.mxu1 %v5399_v53 }
0x164a   : > { %5034 = vmatprep.subr.bf16.mxu1 %v5931_v26 }
0x164d   : > { %v5498_v61 = vpop.eup %5497  ;;  %5035 = vmatpush3.bf16.msra.mxu1 %v5400_v54 }
0x164e   : > { %v5500_v29 = vpop.eup %5499  ;;  %v3800_v63 = vadd.f32 1.0, %v5498_v61 }
0x164f   : > { %v5502_v62 = vpop.eup %5501  ;;  %v3799_v50 = vadd.f32 1.0, %v5500_v29 }
0x1650   : > { %v3801_v2 = vadd.f32 1.0, %v5502_v62  ;;  %v3804_v10 = vmul.f32 %v3800_v63, %v3772_v32 }
0x1651   : > { %v5504_v8 = vpop.eup %5503  ;;  %v3803_v7 = vmul.f32 %v3799_v50, %v3771_v33 }
0x1652   : > { %v3802_v6 = vadd.f32 1.0, %v5504_v8  ;;  %v3805_v9 = vmul.f32 %v3801_v2, %v3773_v3 }
0x1654   : > { %v3806_v12 = vmul.f32 %v3802_v6, %v3774_v5  ;;  %v3840_v14 = vpack.c.bf16 %v3805_v9, %v3803_v7  ;;  %v4694_v6 = vld [vmem:[#allocation20] ss:$0 sm:$0xff] }
0x1656   : > { %v3841_v13 = vpack.c.bf16 %v3806_v12, %v3804_v10 }
0x1658   : > { %3978 = vmatprep.mubr.bf16.mxu0 %v3841_v13 }
0x1659   : > { %3979 = vmatmul.mubr.bf16.vlgmr.msra.gmra.mxu0 %v3840_v14 }
0x1719   : > { %v4830_v15 = vpop.f32.mrf.mxu0 }
0x171b   : > { %v4831_v16 = vpop.f32.mrf.mxu0 }
0x171c   : > { %v4832_v18 = vadd.f32 %v4831_v16, %v4830_v15 }
0x171d   : > { %v4833_v19 = vpop.f32.mrf.mxu0 }
0x171e   : > { %v3981_v22 = vadd.f32 %v4832_v18, %v4672_v4 }
0x171f   : > { %v4834_v23 = vpop.f32.mrf.mxu0 }
0x1720   : > { %v4835_v41 = vadd.f32 %v4834_v23, %v4833_v19  ;;  %3993 = vrot.lane.b32.xlu0 %v3981_v22, %s5934_s4 }
0x1722   : > { %v3984_v27 = vadd.f32 %v4835_v41, %v4672_v4 }
0x1724   : > { %3995 = vrot.lane.b32.xlu1 %v3984_v27, %s5934_s4 }
0x1792   : > { %v3994_v25 = vpop.permute.xlu0 %3993 }
0x1793   : > { %v3999_v60 = vmul.f32 %v3994_v25, %v3990_v28 }
0x1795   : > { %4003 = vrot.lane.b32.xlu1 %v3999_v60, %s5934_s4 }
0x1796   : > { %v3996_v31 = vpop.permute.xlu1 %3995 }
0x1797   : > { %v4000_v34 = vmul.f32 %v3996_v31, %v3990_v28 }
0x1799   : > { %4005 = vrot.lane.b32.xlu1 %v4000_v34, %s5934_s4 }
0x1807   : > { %v4004_v45 = vpop.permute.xlu1 %4003 }
0x1808   : > { %v4009_v35 = vadd.f32 %v4004_v45, %v6873_v17 }
0x180a   : > { %v4084_v30 = vsel %vm1169_vm1, %v4009_v35, 0.0 }
0x180b   : > { %4085 = vadd.xlane.f32.xlu0 %v4084_v30  ;;  %v4006_v36 = vpop.permute.xlu1 %4005 }
0x180c   : > { %v4010_v37 = vadd.f32 %v4006_v36, %v6878_v24  ;;  %v4079_v24 = vadd.f32 %v6975_v57, %v4019_v11 }
0x180e   : > { %v4087_v39 = vsel %vm1169_vm1, %v4010_v37, 0.0  ;;  %v4110_v46 = vadd.f32 1.0, %v4079_v24  ;;  %v4124_v8 = vrot.slane %v4079_v24, %v6319_v21 }
0x180f   : > { %4088 = vadd.xlane.f32.xlu1 %v4087_v39 }
0x1810   : > { %v4114_v48 = vrot.slane %v4110_v46, %v6319_v21 }
0x1894   : > { %v4086_v56 = vpop.xlane.xlu0 %4085 }
0x1895   : > { %v4090_v52 = vmul.f32 0.015625, %v4086_v56 }
0x1897   : > { %v4092_v40 = vsub.f32 %v4009_v35, %v4090_v52 }
0x1898   : > { %v4089_v42 = vpop.xlane.xlu1 %4088 }
0x1899   : > { %v4091_v47 = vmul.f32 0.015625, %v4089_v42  ;;  %v4094_v1 = vmul.f32 %v4092_v40, %v4092_v40 }
0x189b   : > { %v4093_v43 = vsub.f32 %v4010_v37, %v4091_v47  ;;  %v4096_v38 = vsel %vm1169_vm1, %v4094_v1, 0.0 }
0x189c   : > { %4097 = vadd.xlane.f32.xlu0 %v4096_v38 }
0x189d   : > { %v4095_v17 = vmul.f32 %v4093_v43, %v4093_v43 }
0x189f   : > { %v4099_v44 = vsel %vm1169_vm1, %v4095_v17, 0.0 }
0x18a0   : > { %4100 = vadd.xlane.f32.xlu0 %v4099_v44 }
0x18b6   : > { %4116 = vrot.lane.b32.xlu0 %v4114_v48, %s5934_s4  ;;  %s7158_s4 = sld [smem:[#allocation32_spill]] }
0x18bc   : > { %s923_s24 = sand.u32 1, %s7158_s4   ;;  %s5827_s4 = scalar_lea.vmem %s5826_s30, 512 }
0x18bd   : > { %s4458_s8 = sshll.u32 %s923_s24, 4  ;;  %s7020_s7 = scalar_lea.sflag [#allocation4], %s923_s24 }
0x18be   : > { %s925_s28 = scalar_lea.vmem [#allocation22], %s4458_s8 }
0x18bf   : > { %s4227_s25 = sshll.u32 %s925_s28, 4  ;;  %s7012_s25 = int_to_ptr.vmem [resolvable:$true] %s4227_s25 }
0x18c0   : > { %s5821_s6 = scalar_lea.vmem %s7012_s25, 256  ;;  %p5828_p12 = scmp.lt.s32.totalorder %s7012_s25, %s5826_s30 }
0x18c1   : > { %p5822_p13 = scmp.ne.s32.totalorder %s7012_s25, %s5821_s6  ;;  %p5829_p7 = scmp.lt.s32.totalorder %s5827_s4, %s5821_s6 }
0x18c3   : > { %p5823_p3 = pnand %p5822_p13, %p7161_p2  ;;  %p5830_p8 = por %p5829_p7, %p5828_p12 }
0x18c5   : > { %p5824_p4 = pneg %p5823_p3 }
0x18c7   : > { %p5831_p11 = pnand %p5830_p8, %p5824_p4 }
0x1925   : > { %v4098_v20 = vpop.xlane.xlu0 %4097 }
0x1926   : > { %v4102_v57 = vmul.f32 0.015625, %v4098_v20 }
0x1928   : > { %v4104_v0 = vadd.f32 1e-06, %v4102_v57 }
0x1929   : > { %v4101_v58 = vpop.xlane.xlu0 %4100 }
0x192a   : > { %5505 = vrsqrt.f32 %v4104_v0  ;;  %v4103_v55 = vmul.f32 0.015625, %v4101_v58 }
0x192c   : > { %v4105_v59 = vadd.f32 1e-06, %v4103_v55 }
0x192d   : > { %v4117_v63 = vpop.permute.xlu0 %4116 }
0x192e   : > { %5507 = vrsqrt.f32 %v4105_v59 }
0x1937   : > { %v5506_v61 = vpop.eup %5505 }
0x1938   : > { %v4108_v29 = vmul.f32 %v5506_v61, %v4092_v40 }
0x193a   : > { %v4119_v26 = vmul.f32 %v4117_v63, %v4108_v29 }
0x193b   : > { %v5508_v62 = vpop.eup %5507 }
0x193c   : > { %v4109_v2 = vmul.f32 %v5508_v62, %v4093_v43  ;;  %v4125_v50 = vadd.f32 %v4124_v8, %v4119_v26 }
0x193e   : > { %v4120_v3 = vmul.f32 %v4117_v63, %v4109_v2 }
0x1940   : > { %v4126_v32 = vadd.f32 %v4124_v8, %v4120_v3 }
0x1942   : > { %v4135_v5 = vpack.c.bf16 %v4126_v32, %v4125_v50 }
0x1944   : > { %5037 = vmatmul.mubr.msk.bf16.vlgmr.msra.gmra.mxu1 %vm1169_vm1, %v4135_v5 }
0x1a04   : > { %v4204_v33 = vpop.f32.mrf.mxu1 }
0x1a05   : > { %v4205_v9 = vadd.f32 %v4694_v6, %v4204_v33 }
0x1a06   : > { %v5038_v10 = vpop.f32.mrf.mxu1 }
0x1a07   : > { %4211 = vst.msk [vmem:[%s925_s28] sm:$0xff] %vm1291_vm3, %v4205_v9 }
0x1a08   : > { %v4207_v21 = vpop.f32.mrf.mxu1 }
0x1a09   : > { %v4208_v12 = vadd.f32 %v4694_v6, %v4207_v21 }
0x1a0a   : > { %v5039_v7 = vpop.f32.mrf.mxu1 }
0x1a0b   : > { %4212 = vst.msk [vmem:[%s925_s28 + $0x8] sm:$0xff] %vm1291_vm3, %v4208_v12 }
0x1a0c   : > { %5834 = shalt.err (!%p5831_p11)
}
0x1a0d   : > { %s5835_s24 = scalar_lea.hbm %s7017_s29, 256  ;;  %s5839_s27 = scalar_lea.hbm %s7160_s0, 512 }
0x1a0e   : > { %p5836_p0 = scmp.ne.s32.totalorder %s7017_s29, %s5835_s24  ;;  %p5840_p5 = scmp.lt.s32.totalorder %s7017_s29, %s7160_s0 }
0x1a0f   : > { %p5841_p10 = scmp.lt.s32.totalorder %s5839_s27, %s5835_s24 }
0x1a10   : > { %p5837_p9 = pnand %p5836_p0, %p7161_p2 }
0x1a11   : > { %p5842_p1 = por %p5841_p10, %p5840_p5 }
0x1a12   : > { %p5838_p6 = pneg %p5837_p9 }
0x1a14   : > { %p5843_p13 = pnand %p5842_p1, %p5838_p6 }
0x1a16   : > { %5846 = shalt.err (!%p5843_p13)
}
0x1a17   : > { %s5942_s6 = smov 128   ;;  %s5943_s26 = smov 8  }
0x1a18   : > { %5088 = dma.vmem_to_hbm [thread:$0]  (%p7161_p2), %s7012_s25, 256, %s7017_s29, %s7020_s7, %s5942_s6, %s5942_s6, %s5943_s26  }
0x1a19 PF: > { %s7162_s30 = sld [smem:[#allocation34_spill]] }
0x1a1a   : > { %s7163_s4 = sld [smem:[#allocation31_spill]] }
0x1a1b   : > { %s7164_s8 = sld [smem:[#allocation38_spill]] }
0x1a1f   : > { %p5155_p3 = scmp.ge.s32.totalorder %s7162_s30, 2 }
0x1a20   : > { %s4242_s28 = sand.u32 1, %s7163_s4  }
0x1a21   : > { %p7165_p4 = scmp.ne.s32.totalorder %s7164_s8, 0  ;;  %s4243_s24 = scalar_lea.sflag [#allocation4], %s4242_s28 }
0x1a23   : > { %p5128_p12 = pnand %p5155_p3, %p7165_p4 }
0x1a25   : > { %p5129_p7 = pneg %p5128_p12 }
0x1a27   : > { %5892 = dma.done.wait (%p5129_p7), %s4243_s24, 256  }
0x1a28   : > { %5894 = vsyncadd (%p5129_p7), %s4243_s24, 4294967040  ;;  %s7166_s28 = sld [smem:[#allocation35_spill]] }
0x1a29   : > { %s7167_s5 = sld [smem:[#allocation32_spill]] }
0x1a2a   : > { %s7168_s26 = sld [smem:[#allocation33_spill]] }
0x1a2b   : > { %s7169_s27 = sld [smem:[#allocation36_spill]] }
0x1a2e   : > { %p41_p8 = scmp.ge.s32.totalorder %s7166_s28, 4  }
0x1a30   :  { %43 = sbr.rel (!%p41_p8) target bundleno = 21 (0x15), region = 216 }
0x1a35   :  { %4248 = vsyncpa [#allocation3], 1 }
0x1a36   :  { %4250 = vsyncpa [#allocation3 + $0x1], 1 }
0x1a37   :  { %4251 = vsyncpa [#allocation6], 1 }
0x1a38   :  { %4252 = vsyncpa [#allocation9], 1 }
0x1a39   :  { %4253 = vsyncpa [#allocation12], 1 }
0x1a3a   :  { %4254 = vsyncpa [#allocation15], 1 }
0x1a3b   :  { %4255 = vsyncpa [#allocation18], 1 }
0x1a3c   :  { %4256 = vsyncpa [#allocation21], 1 }
0x1a3d   :  { %4257 = vsyncpa [#allocation4], 1 }
0x1a3e   :  { %4259 = vsyncpa [#allocation4 + $0x1], 1 }

</bundles_post_ra>
